<compile_context>
chip_gen: v7x
topology: tpu7x:2x2x1
jax: 0.10.0
libtpu: 0.0.40
codegen_flags: <defaults>
</compile_context>

<pallas_src>
import functools

import jax
import jax.numpy as jnp
from jax.experimental import pallas as pl
from jax.experimental.pallas import tpu as pltpu


def _residual_block_kernel(x_ref, w1_ref, w2_ref, w3_ref, wd_ref,
                           t1_ref, t2_ref, t3_ref, td_ref, mask_ref,
                           out_ref, pad_ref, slab_ref,
                           *, KH, KW, PH, PW, W, BASE):
    """One batch element per grid step.

    x_ref    : (1, P,  HW)   f32, pixels on lanes
    w1_ref   : (P,  P)       bf16  (BN1 scale folded, rows = Cout)
    w2_ref   : (C2, KH*KW*P) bf16  (BN2 scale folded, im2col weight)
    w3_ref   : (C4, C2)      bf16  (BN3 scale folded)
    wd_ref   : (C4, P)       bf16  (BNd scale folded)
    t*_ref   : (C, 1)        f32   BN shifts
    mask_ref : (KW, HW)      f32   horizontal validity masks per kw tap
    out_ref  : (1, C4, HW)   f32
    pad_ref  : (P, LPAD)     f32   flat, vertically zero-haloed line buffer
    slab_ref : (KH*KW*P, HW) f32   im2col slab
    """
    _, P, HW = x_ref.shape

    x = x_ref[0]                                  # (P, HW) f32
    xb = x.astype(jnp.bfloat16)

    # ---- c1: 1x1 conv (+ folded bn1 scale) + shift + relu ----
    o1 = jnp.dot(w1_ref[...], xb, preferred_element_type=jnp.float32)
    o1 = jnp.maximum(o1 + t1_ref[...], 0.0)       # (P, HW) f32

    # ---- zero the halo of the flat line buffer only once; the interior is
    #      overwritten every step and the halo stays zero across iterations ----
    @pl.when(pl.program_id(0) == 0)
    def _():
        pad_ref[...] = jnp.zeros_like(pad_ref)

    pad_ref[:, pl.ds(BASE, HW)] = o1              # lane-aligned interior write

    # ---- im2col: build one (KH*KW*P, HW) slab of shifted windows ----
    for kh in range(KH):
        for kw in range(KW):
            t = kh * KW + kw
            off = BASE + (kh - PH) * W + (kw - PW)        # static lane offset
            win = pad_ref[:, pl.ds(off, HW)]              # (P, HW)
            if kw != PW:                                  # kill horizontal wrap
                win = win * mask_ref[pl.ds(kw, 1), :]
            slab_ref[pl.ds(t * P, P), :] = win

    # ---- c2: one depth-(KH*KW*P) matmul (+ folded bn2 scale) + shift + relu ----
    o2 = jnp.dot(w2_ref[...], slab_ref[...].astype(jnp.bfloat16),
                 preferred_element_type=jnp.float32)
    o2 = jnp.maximum(o2 + t2_ref[...], 0.0)       # (C2, HW)

    # ---- c3: 1x1 conv (+ folded bn3 scale) + shift ----
    o3 = jnp.dot(w3_ref[...], o2.astype(jnp.bfloat16),
                 preferred_element_type=jnp.float32) + t3_ref[...]

    # ---- downsample branch on the original input ----
    idn = jnp.dot(wd_ref[...], xb,
                  preferred_element_type=jnp.float32) + td_ref[...]

    # ---- residual add + relu, lane-dense (HW on lanes) store ----
    out_ref[0] = jnp.maximum(o3 + idn, 0.0)


def _fold_bn(gamma, beta, mean, var, eps=1e-5):
    scale = gamma / jnp.sqrt(var + eps)
    shift = beta - mean * scale
    return scale.astype(jnp.float32), shift.astype(jnp.float32)


@jax.jit
def residual_block_2d(x_nchw, w1, w2, w3, wd, bn1, bn2, bn3, bnd):
    """x_nchw: (B, P, H, W) f32.  w1:(P,P) (Cin,Cout), w2:(KH,KW,P,2P) HWIO,
    w3:(2P,4P), wd:(P,4P).  Returns (B, 4P, H, W) f32 (NCHW)."""
    B, P, H, W = x_nchw.shape
    KH, KW, _, C2 = w2.shape
    C4 = w3.shape[1]
    HW = H * W
    PH, PW = (KH - 1) // 2, (KW - 1) // 2     # "same" padding (11,5)->(5,2)

    x = x_nchw.reshape(B, P, HW)              # free, contiguous (no transpose)

    # Fold BN scales into the conv weights (rows = Cout); keep shifts separate.
    s1, t1 = _fold_bn(*bn1)
    s2, t2 = _fold_bn(*bn2)
    s3, t3 = _fold_bn(*bn3)
    sd, td = _fold_bn(*bnd)

    w1f = (s1[:, None] * w1.T).astype(jnp.bfloat16)                     # (P, P)
    w2col = w2.reshape(KH * KW * P, C2).T                               # (C2, KH*KW*P)
    w2f = (s2[:, None] * w2col).astype(jnp.bfloat16)
    w3f = (s3[:, None] * w3.T).astype(jnp.bfloat16)                     # (C4, C2)
    wdf = (sd[:, None] * wd.T).astype(jnp.bfloat16)                     # (C4, P)

    t1c = t1.reshape(P, 1)
    t2c = t2.reshape(C2, 1)
    t3c = t3.reshape(C4, 1)
    tdc = td.reshape(C4, 1)

    # Horizontal validity masks per kw tap (vertical handled by the zero halo).
    w_idx = jnp.arange(HW, dtype=jnp.int32) % W
    masks = jnp.stack(
        [((w_idx + (kw - PW) >= 0) & (w_idx + (kw - PW) < W)).astype(jnp.float32)
         for kw in range(KW)], axis=0)                                  # (KW, HW)

    # Flat line-buffer geometry: interior starts at a 128-aligned lane offset
    # >= PH*W + PW so every tap slice start is >= 0 and in-bounds.
    BASE = ((PH * W + PW + 127) // 128) * 128
    LPAD = ((BASE + HW + PH * W + PW + 127) // 128) * 128

    kernel = functools.partial(_residual_block_kernel,
                               KH=KH, KW=KW, PH=PH, PW=PW, W=W, BASE=BASE)

    out = pl.pallas_call(
        kernel,
        out_shape=jax.ShapeDtypeStruct((B, C4, HW), jnp.float32),
        grid_spec=pltpu.PrefetchScalarGridSpec(
            num_scalar_prefetch=0,
            grid=(B,),
            in_specs=[
                pl.BlockSpec((1, P, HW), lambda b: (b, 0, 0)),           # x
                pl.BlockSpec((P, P), lambda b: (0, 0)),                  # w1 (folded)
                pl.BlockSpec((C2, KH * KW * P), lambda b: (0, 0)),       # w2 im2col
                pl.BlockSpec((C4, C2), lambda b: (0, 0)),                # w3
                pl.BlockSpec((C4, P), lambda b: (0, 0)),                 # wd
                pl.BlockSpec((P, 1), lambda b: (0, 0)),                  # t1
                pl.BlockSpec((C2, 1), lambda b: (0, 0)),                 # t2
                pl.BlockSpec((C4, 1), lambda b: (0, 0)),                 # t3
                pl.BlockSpec((C4, 1), lambda b: (0, 0)),                 # td
                pl.BlockSpec((KW, HW), lambda b: (0, 0)),                # masks
            ],
            out_specs=pl.BlockSpec((1, C4, HW), lambda b: (b, 0, 0)),
            scratch_shapes=[
                pltpu.VMEM((P, LPAD), jnp.float32),          # flat padded line buffer
                pltpu.VMEM((KH * KW * P, HW), jnp.float32),  # im2col slab
            ],
        ),
        compiler_params=pltpu.CompilerParams(
            dimension_semantics=("parallel",)),
    )(x, w1f, w2f, w3f, wdf, t1c, t2c, t3c, tdc, masks)

    return out.reshape(B, C4, H, W)            # free reshape, already NCHW


# ---------------------------------------------------------------------------
# Pure-JAX reference (same math, XLA conv, f32-highest) for a correctness check.
# ---------------------------------------------------------------------------
def _reference(x_nchw, w1, w2, w3, wd, bn1, bn2, bn3, bnd):
    x = jnp.transpose(x_nchw, (0, 2, 3, 1))
    KH, KW = w2.shape[0], w2.shape[1]

    def bn(v, p, eps=1e-5):
        g, b, m, var = p
        return (v - m) / jnp.sqrt(var + eps) * g + b

    def conv1x1(v, w):
        return jnp.einsum('bhwc,cd->bhwd', v, w, precision='highest')

    o = jax.nn.relu(bn(conv1x1(x, w1), bn1))
    o = jax.lax.conv_general_dilated(
        o, w2, window_strides=(1, 1),
        padding=(((KH - 1) // 2, (KH - 1) // 2), ((KW - 1) // 2, (KW - 1) // 2)),
        dimension_numbers=('NHWC', 'HWIO', 'NHWC'), precision='highest')
    o = jax.nn.relu(bn(o, bn2))
    o = bn(conv1x1(o, w3), bn3)
    idn = bn(conv1x1(x, wd), bnd)
    out = jax.nn.relu(o + idn)
    return jnp.transpose(out, (0, 3, 1, 2))


if __name__ == "__main__":
    B, P, H, W = 2, 4, 16, 16
    KH, KW = 11, 5
    C2, C4 = 2 * P, 4 * P

    key = jax.random.PRNGKey(0)
    kx, k1, k2, k3, kd = jax.random.split(key, 5)

    def msra(k, shape):
        # c2_msra_fill: kaiming_normal, fan_out, relu gain -> std = sqrt(2/fan_out)
        if len(shape) == 2:       # (Cin, Cout) 1x1 conv
            fan_out = shape[1]
        else:                     # (KH, KW, Cin, Cout)
            fan_out = shape[0] * shape[1] * shape[3]
        return (2.0 / fan_out) ** 0.5 * jax.random.normal(k, shape, jnp.float32)

    x = jax.random.normal(kx, (B, P, H, W), jnp.float32)          # NCHW input
    w1 = msra(k1, (P, P))
    w2 = msra(k2, (KH, KW, P, C2))
    w3 = msra(k3, (C2, C4))
    wd = msra(kd, (P, C4))

    # BatchNorm params exactly as left by __init__ (eval-mode running stats):
    # gamma=1, beta=0, running_mean=0, running_var=1.
    def bn_params(c):
        return (jnp.ones((c,), jnp.float32), jnp.zeros((c,), jnp.float32),
                jnp.zeros((c,), jnp.float32), jnp.ones((c,), jnp.float32))
    bn1, bn2, bn3, bnd = bn_params(P), bn_params(C2), bn_params(C4), bn_params(C4)

    out = residual_block_2d(x, w1, w2, w3, wd, bn1, bn2, bn3, bnd)
    out = jax.block_until_ready(out)

    ref = jax.block_until_ready(_reference(x, w1, w2, w3, wd, bn1, bn2, bn3, bnd))
    assert out.shape == (B, C4, H, W), out.shape
    # bf16 MXU operands (f32 accumulation) vs f32-highest reference.
    assert jnp.allclose(out, ref, atol=3e-2, rtol=3e-2), \
        float(jnp.max(jnp.abs(out - ref)))

    print("KERNEL_OK")
</pallas_src>

<mosaic_0001>
module attributes {stable_mosaic.version = 11 : i64} {
  func.func @_residual_block_kernel(%arg0: i32, %arg1: memref<1x4x256xf32, #tpu.memory_space<vmem>>, %arg2: memref<4x4xbf16, #tpu.memory_space<vmem>>, %arg3: memref<8x220xbf16, #tpu.memory_space<vmem>>, %arg4: memref<16x8xbf16, #tpu.memory_space<vmem>>, %arg5: memref<16x4xbf16, #tpu.memory_space<vmem>>, %arg6: memref<4x1xf32, #tpu.memory_space<vmem>>, %arg7: memref<8x1xf32, #tpu.memory_space<vmem>>, %arg8: memref<16x1xf32, #tpu.memory_space<vmem>>, %arg9: memref<16x1xf32, #tpu.memory_space<vmem>>, %arg10: memref<5x256xf32, #tpu.memory_space<vmem>>, %arg11: memref<1x16x256xf32, #tpu.memory_space<vmem>>, %arg12: memref<4x512xf32, #tpu.memory_space<vmem>>, %arg13: memref<220x256xf32, #tpu.memory_space<vmem>>) attributes {dimension_semantics = [#tpu.dimension_semantics<parallel>], iteration_bounds = array<i64: 2>, scalar_prefetch = 0 : i64, scratch_operands = 2 : i64, tpu.core_type = #tpu.core_type<tc>, window_params = [{transform_indices = @transform_0, window_bounds = array<i64: 1, 4, 256>}, {pipeline_mode = #tpu.pipeline_mode<synchronous>, transform_indices = @transform_1, window_bounds = array<i64: 4, 4>}, {pipeline_mode = #tpu.pipeline_mode<synchronous>, transform_indices = @transform_2, window_bounds = array<i64: 8, 220>}, {pipeline_mode = #tpu.pipeline_mode<synchronous>, transform_indices = @transform_3, window_bounds = array<i64: 16, 8>}, {pipeline_mode = #tpu.pipeline_mode<synchronous>, transform_indices = @transform_4, window_bounds = array<i64: 16, 4>}, {pipeline_mode = #tpu.pipeline_mode<synchronous>, transform_indices = @transform_5, window_bounds = array<i64: 4, 1>}, {pipeline_mode = #tpu.pipeline_mode<synchronous>, transform_indices = @transform_6, window_bounds = array<i64: 8, 1>}, {pipeline_mode = #tpu.pipeline_mode<synchronous>, transform_indices = @transform_7, window_bounds = array<i64: 16, 1>}, {pipeline_mode = #tpu.pipeline_mode<synchronous>, transform_indices = @transform_8, window_bounds = array<i64: 16, 1>}, {pipeline_mode = #tpu.pipeline_mode<synchronous>, transform_indices = @transform_9, window_bounds = array<i64: 5, 256>}, {transform_indices = @transform_10, window_bounds = array<i64: 1, 16, 256>}]} {
    %c0 = arith.constant 0 : index
    %c0_0 = arith.constant 0 : index
    %c0_1 = arith.constant 0 : index
    %0 = vector.load %arg1[%c0, %c0_0, %c0_1] : memref<1x4x256xf32, #tpu.memory_space<vmem>>, vector<1x4x256xf32>
    %1 = vector.shape_cast %0 : vector<1x4x256xf32> to vector<4x256xf32>
    %2 = arith.truncf %1 : vector<4x256xf32> to vector<4x256xbf16>
    %c0_2 = arith.constant 0 : index
    %c0_3 = arith.constant 0 : index
    %3 = vector.load %arg2[%c0_2, %c0_3] : memref<4x4xbf16, #tpu.memory_space<vmem>>, vector<4x4xbf16>
    %cst = arith.constant dense<0.000000e+00> : vector<4x256xf32>
    %4 = tpu.matmul %3, %2, %cst {dimension_numbers = #tpu.dot_dimension_numbers<[1], [0], [0], [1], [0, 0, 1, 1], [], []>} : vector<4x4xbf16>, vector<4x256xbf16>, vector<4x256xf32> -> vector<4x256xf32>
    %c0_4 = arith.constant 0 : index
    %c0_5 = arith.constant 0 : index
    %5 = vector.load %arg6[%c0_4, %c0_5] : memref<4x1xf32, #tpu.memory_space<vmem>>, vector<4x1xf32>
    %6 = vector.broadcast %5 : vector<4x1xf32> to vector<4x256xf32>
    %7 = arith.addf %4, %6 : vector<4x256xf32>
    %cst_6 = arith.constant 0.000000e+00 : f32
    %8 = vector.broadcast %cst_6 : f32 to vector<4x256xf32>
    %9 = arith.maximumf %7, %8 : vector<4x256xf32>
    %c0_i32 = arith.constant 0 : i32
    %10 = arith.cmpi eq, %arg0, %c0_i32 : i32
    %11 = arith.extui %10 : i1 to i32
    %c0_i32_7 = arith.constant 0 : i32
    %12 = arith.cmpi ne, %11, %c0_i32_7 : i32
    scf.if %12 {
      %cst_240 = arith.constant 0.000000e+00 : f32
      %282 = vector.broadcast %cst_240 : f32 to vector<4x512xf32>
      %c0_241 = arith.constant 0 : index
      %c0_242 = arith.constant 0 : index
      %283 = vector.load %arg12[%c0_241, %c0_242] : memref<4x512xf32, #tpu.memory_space<vmem>>, vector<4x512xf32>
      tpu.vector_store %arg12[%c0_241, %c0_242], %282 {strides = array<i32>} : memref<4x512xf32, #tpu.memory_space<vmem>>, vector<4x512xf32>,
    } else {
    }
    %c0_8 = arith.constant 0 : index
    %c128 = arith.constant 128 : index
    %13 = vector.load %arg12[%c0_8, %c128] : memref<4x512xf32, #tpu.memory_space<vmem>>, vector<4x256xf32>
    tpu.vector_store %arg12[%c0_8, %c128], %9 {strides = array<i32>} : memref<4x512xf32, #tpu.memory_space<vmem>>, vector<4x256xf32>,
    %c0_9 = arith.constant 0 : index
    %c46 = arith.constant 46 : index
    %14 = vector.load %arg12[%c0_9, %c46] : memref<4x512xf32, #tpu.memory_space<vmem>>, vector<4x256xf32>
    %c0_10 = arith.constant 0 : index
    %c0_11 = arith.constant 0 : index
    %15 = vector.load %arg10[%c0_10, %c0_11] : memref<5x256xf32, #tpu.memory_space<vmem>>, vector<1x256xf32>
    %16 = vector.broadcast %15 : vector<1x256xf32> to vector<4x256xf32>
    %17 = arith.mulf %14, %16 : vector<4x256xf32>
    %c0_12 = arith.constant 0 : index
    %c0_13 = arith.constant 0 : index
    %18 = vector.load %arg13[%c0_12, %c0_13] : memref<220x256xf32, #tpu.memory_space<vmem>>, vector<4x256xf32>
    tpu.vector_store %arg13[%c0_12, %c0_13], %17 {strides = array<i32>} : memref<220x256xf32, #tpu.memory_space<vmem>>, vector<4x256xf32>,
    %c0_14 = arith.constant 0 : index
    %c47 = arith.constant 47 : index
    %19 = vector.load %arg12[%c0_14, %c47] : memref<4x512xf32, #tpu.memory_space<vmem>>, vector<4x256xf32>
    %c1 = arith.constant 1 : index
    %c0_15 = arith.constant 0 : index
    %20 = vector.load %arg10[%c1, %c0_15] : memref<5x256xf32, #tpu.memory_space<vmem>>, vector<1x256xf32>
    %21 = vector.broadcast %20 : vector<1x256xf32> to vector<4x256xf32>
    %22 = arith.mulf %19, %21 : vector<4x256xf32>
    %c4 = arith.constant 4 : index
    %c0_16 = arith.constant 0 : index
    %23 = vector.load %arg13[%c4, %c0_16] : memref<220x256xf32, #tpu.memory_space<vmem>>, vector<4x256xf32>
    tpu.vector_store %arg13[%c4, %c0_16], %22 {strides = array<i32>} : memref<220x256xf32, #tpu.memory_space<vmem>>, vector<4x256xf32>,
    %c0_17 = arith.constant 0 : index
    %c48 = arith.constant 48 : index
    %24 = vector.load %arg12[%c0_17, %c48] : memref<4x512xf32, #tpu.memory_space<vmem>>, vector<4x256xf32>
    %c8 = arith.constant 8 : index
    %c0_18 = arith.constant 0 : index
    %25 = vector.load %arg13[%c8, %c0_18] : memref<220x256xf32, #tpu.memory_space<vmem>>, vector<4x256xf32>
    tpu.vector_store %arg13[%c8, %c0_18], %24 {strides = array<i32>} : memref<220x256xf32, #tpu.memory_space<vmem>>, vector<4x256xf32>,
    %c0_19 = arith.constant 0 : index
    %c49 = arith.constant 49 : index
    %26 = vector.load %arg12[%c0_19, %c49] : memref<4x512xf32, #tpu.memory_space<vmem>>, vector<4x256xf32>
    %c3 = arith.constant 3 : index
    %c0_20 = arith.constant 0 : index
    %27 = vector.load %arg10[%c3, %c0_20] : memref<5x256xf32, #tpu.memory_space<vmem>>, vector<1x256xf32>
    %28 = vector.broadcast %27 : vector<1x256xf32> to vector<4x256xf32>
    %29 = arith.mulf %26, %28 : vector<4x256xf32>
    %c12 = arith.constant 12 : index
    %c0_21 = arith.constant 0 : index
    %30 = vector.load %arg13[%c12, %c0_21] : memref<220x256xf32, #tpu.memory_space<vmem>>, vector<4x256xf32>
    tpu.vector_store %arg13[%c12, %c0_21], %29 {strides = array<i32>} : memref<220x256xf32, #tpu.memory_space<vmem>>, vector<4x256xf32>,
    %c0_22 = arith.constant 0 : index
    %c50 = arith.constant 50 : index
    %31 = vector.load %arg12[%c0_22, %c50] : memref<4x512xf32, #tpu.memory_space<vmem>>, vector<4x256xf32>
    %c4_23 = arith.constant 4 : index
    %c0_24 = arith.constant 0 : index
    %32 = vector.load %arg10[%c4_23, %c0_24] : memref<5x256xf32, #tpu.memory_space<vmem>>, vector<1x256xf32>
    %33 = vector.broadcast %32 : vector<1x256xf32> to vector<4x256xf32>
    %34 = arith.mulf %31, %33 : vector<4x256xf32>
    %c16 = arith.constant 16 : index
    %c0_25 = arith.constant 0 : index
    %35 = vector.load %arg13[%c16, %c0_25] : memref<220x256xf32, #tpu.memory_space<vmem>>, vector<4x256xf32>
    tpu.vector_store %arg13[%c16, %c0_25], %34 {strides = array<i32>} : memref<220x256xf32, #tpu.memory_space<vmem>>, vector<4x256xf32>,
    %c0_26 = arith.constant 0 : index
    %c62 = arith.constant 62 : index
    %36 = vector.load %arg12[%c0_26, %c62] : memref<4x512xf32, #tpu.memory_space<vmem>>, vector<4x256xf32>
    %c0_27 = arith.constant 0 : index
    %c0_28 = arith.constant 0 : index
    %37 = vector.load %arg10[%c0_27, %c0_28] : memref<5x256xf32, #tpu.memory_space<vmem>>, vector<1x256xf32>
    %38 = vector.broadcast %37 : vector<1x256xf32> to vector<4x256xf32>
    %39 = arith.mulf %36, %38 : vector<4x256xf32>
    %c20 = arith.constant 20 : index
    %c0_29 = arith.constant 0 : index
    %40 = vector.load %arg13[%c20, %c0_29] : memref<220x256xf32, #tpu.memory_space<vmem>>, vector<4x256xf32>
    tpu.vector_store %arg13[%c20, %c0_29], %39 {strides = array<i32>} : memref<220x256xf32, #tpu.memory_space<vmem>>, vector<4x256xf32>,
    %c0_30 = arith.constant 0 : index
    %c63 = arith.constant 63 : index
    %41 = vector.load %arg12[%c0_30, %c63] : memref<4x512xf32, #tpu.memory_space<vmem>>, vector<4x256xf32>
    %c1_31 = arith.constant 1 : index
    %c0_32 = arith.constant 0 : index
    %42 = vector.load %arg10[%c1_31, %c0_32] : memref<5x256xf32, #tpu.memory_space<vmem>>, vector<1x256xf32>
    %43 = vector.broadcast %42 : vector<1x256xf32> to vector<4x256xf32>
    %44 = arith.mulf %41, %43 : vector<4x256xf32>
    %c24 = arith.constant 24 : index
    %c0_33 = arith.constant 0 : index
    %45 = vector.load %arg13[%c24, %c0_33] : memref<220x256xf32, #tpu.memory_space<vmem>>, vector<4x256xf32>
    tpu.vector_store %arg13[%c24, %c0_33], %44 {strides = array<i32>} : memref<220x256xf32, #tpu.memory_space<vmem>>, vector<4x256xf32>,
    %c0_34 = arith.constant 0 : index
    %c64 = arith.constant 64 : index
    %46 = vector.load %arg12[%c0_34, %c64] : memref<4x512xf32, #tpu.memory_space<vmem>>, vector<4x256xf32>
    %c28 = arith.constant 28 : index
    %c0_35 = arith.constant 0 : index
    %47 = vector.load %arg13[%c28, %c0_35] : memref<220x256xf32, #tpu.memory_space<vmem>>, vector<4x256xf32>
    tpu.vector_store %arg13[%c28, %c0_35], %46 {strides = array<i32>} : memref<220x256xf32, #tpu.memory_space<vmem>>, vector<4x256xf32>,
    %c0_36 = arith.constant 0 : index
    %c65 = arith.constant 65 : index
    %48 = vector.load %arg12[%c0_36, %c65] : memref<4x512xf32, #tpu.memory_space<vmem>>, vector<4x256xf32>
    %c3_37 = arith.constant 3 : index
    %c0_38 = arith.constant 0 : index
    %49 = vector.load %arg10[%c3_37, %c0_38] : memref<5x256xf32, #tpu.memory_space<vmem>>, vector<1x256xf32>
    %50 = vector.broadcast %49 : vector<1x256xf32> to vector<4x256xf32>
    %51 = arith.mulf %48, %50 : vector<4x256xf32>
    %c32 = arith.constant 32 : index
    %c0_39 = arith.constant 0 : index
    %52 = vector.load %arg13[%c32, %c0_39] : memref<220x256xf32, #tpu.memory_space<vmem>>, vector<4x256xf32>
    tpu.vector_store %arg13[%c32, %c0_39], %51 {strides = array<i32>} : memref<220x256xf32, #tpu.memory_space<vmem>>, vector<4x256xf32>,
    %c0_40 = arith.constant 0 : index
    %c66 = arith.constant 66 : index
    %53 = vector.load %arg12[%c0_40, %c66] : memref<4x512xf32, #tpu.memory_space<vmem>>, vector<4x256xf32>
    %c4_41 = arith.constant 4 : index
    %c0_42 = arith.constant 0 : index
    %54 = vector.load %arg10[%c4_41, %c0_42] : memref<5x256xf32, #tpu.memory_space<vmem>>, vector<1x256xf32>
    %55 = vector.broadcast %54 : vector<1x256xf32> to vector<4x256xf32>
    %56 = arith.mulf %53, %55 : vector<4x256xf32>
    %c36 = arith.constant 36 : index
    %c0_43 = arith.constant 0 : index
    %57 = vector.load %arg13[%c36, %c0_43] : memref<220x256xf32, #tpu.memory_space<vmem>>, vector<4x256xf32>
    tpu.vector_store %arg13[%c36, %c0_43], %56 {strides = array<i32>} : memref<220x256xf32, #tpu.memory_space<vmem>>, vector<4x256xf32>,
    %c0_44 = arith.constant 0 : index
    %c78 = arith.constant 78 : index
    %58 = vector.load %arg12[%c0_44, %c78] : memref<4x512xf32, #tpu.memory_space<vmem>>, vector<4x256xf32>
    %c0_45 = arith.constant 0 : index
    %c0_46 = arith.constant 0 : index
    %59 = vector.load %arg10[%c0_45, %c0_46] : memref<5x256xf32, #tpu.memory_space<vmem>>, vector<1x256xf32>
    %60 = vector.broadcast %59 : vector<1x256xf32> to vector<4x256xf32>
    %61 = arith.mulf %58, %60 : vector<4x256xf32>
    %c40 = arith.constant 40 : index
    %c0_47 = arith.constant 0 : index
    %62 = vector.load %arg13[%c40, %c0_47] : memref<220x256xf32, #tpu.memory_space<vmem>>, vector<4x256xf32>
    tpu.vector_store %arg13[%c40, %c0_47], %61 {strides = array<i32>} : memref<220x256xf32, #tpu.memory_space<vmem>>, vector<4x256xf32>,
    %c0_48 = arith.constant 0 : index
    %c79 = arith.constant 79 : index
    %63 = vector.load %arg12[%c0_48, %c79] : memref<4x512xf32, #tpu.memory_space<vmem>>, vector<4x256xf32>
    %c1_49 = arith.constant 1 : index
    %c0_50 = arith.constant 0 : index
    %64 = vector.load %arg10[%c1_49, %c0_50] : memref<5x256xf32, #tpu.memory_space<vmem>>, vector<1x256xf32>
    %65 = vector.broadcast %64 : vector<1x256xf32> to vector<4x256xf32>
    %66 = arith.mulf %63, %65 : vector<4x256xf32>
    %c44 = arith.constant 44 : index
    %c0_51 = arith.constant 0 : index
    %67 = vector.load %arg13[%c44, %c0_51] : memref<220x256xf32, #tpu.memory_space<vmem>>, vector<4x256xf32>
    tpu.vector_store %arg13[%c44, %c0_51], %66 {strides = array<i32>} : memref<220x256xf32, #tpu.memory_space<vmem>>, vector<4x256xf32>,
    %c0_52 = arith.constant 0 : index
    %c80 = arith.constant 80 : index
    %68 = vector.load %arg12[%c0_52, %c80] : memref<4x512xf32, #tpu.memory_space<vmem>>, vector<4x256xf32>
    %c48_53 = arith.constant 48 : index
    %c0_54 = arith.constant 0 : index
    %69 = vector.load %arg13[%c48_53, %c0_54] : memref<220x256xf32, #tpu.memory_space<vmem>>, vector<4x256xf32>
    tpu.vector_store %arg13[%c48_53, %c0_54], %68 {strides = array<i32>} : memref<220x256xf32, #tpu.memory_space<vmem>>, vector<4x256xf32>,
    %c0_55 = arith.constant 0 : index
    %c81 = arith.constant 81 : index
    %70 = vector.load %arg12[%c0_55, %c81] : memref<4x512xf32, #tpu.memory_space<vmem>>, vector<4x256xf32>
    %c3_56 = arith.constant 3 : index
    %c0_57 = arith.constant 0 : index
    %71 = vector.load %arg10[%c3_56, %c0_57] : memref<5x256xf32, #tpu.memory_space<vmem>>, vector<1x256xf32>
    %72 = vector.broadcast %71 : vector<1x256xf32> to vector<4x256xf32>
    %73 = arith.mulf %70, %72 : vector<4x256xf32>
    %c52 = arith.constant 52 : index
    %c0_58 = arith.constant 0 : index
    %74 = vector.load %arg13[%c52, %c0_58] : memref<220x256xf32, #tpu.memory_space<vmem>>, vector<4x256xf32>
    tpu.vector_store %arg13[%c52, %c0_58], %73 {strides = array<i32>} : memref<220x256xf32, #tpu.memory_space<vmem>>, vector<4x256xf32>,
    %c0_59 = arith.constant 0 : index
    %c82 = arith.constant 82 : index
    %75 = vector.load %arg12[%c0_59, %c82] : memref<4x512xf32, #tpu.memory_space<vmem>>, vector<4x256xf32>
    %c4_60 = arith.constant 4 : index
    %c0_61 = arith.constant 0 : index
    %76 = vector.load %arg10[%c4_60, %c0_61] : memref<5x256xf32, #tpu.memory_space<vmem>>, vector<1x256xf32>
    %77 = vector.broadcast %76 : vector<1x256xf32> to vector<4x256xf32>
    %78 = arith.mulf %75, %77 : vector<4x256xf32>
    %c56 = arith.constant 56 : index
    %c0_62 = arith.constant 0 : index
    %79 = vector.load %arg13[%c56, %c0_62] : memref<220x256xf32, #tpu.memory_space<vmem>>, vector<4x256xf32>
    tpu.vector_store %arg13[%c56, %c0_62], %78 {strides = array<i32>} : memref<220x256xf32, #tpu.memory_space<vmem>>, vector<4x256xf32>,
    %c0_63 = arith.constant 0 : index
    %c94 = arith.constant 94 : index
    %80 = vector.load %arg12[%c0_63, %c94] : memref<4x512xf32, #tpu.memory_space<vmem>>, vector<4x256xf32>
    %c0_64 = arith.constant 0 : index
    %c0_65 = arith.constant 0 : index
    %81 = vector.load %arg10[%c0_64, %c0_65] : memref<5x256xf32, #tpu.memory_space<vmem>>, vector<1x256xf32>
    %82 = vector.broadcast %81 : vector<1x256xf32> to vector<4x256xf32>
    %83 = arith.mulf %80, %82 : vector<4x256xf32>
    %c60 = arith.constant 60 : index
    %c0_66 = arith.constant 0 : index
    %84 = vector.load %arg13[%c60, %c0_66] : memref<220x256xf32, #tpu.memory_space<vmem>>, vector<4x256xf32>
    tpu.vector_store %arg13[%c60, %c0_66], %83 {strides = array<i32>} : memref<220x256xf32, #tpu.memory_space<vmem>>, vector<4x256xf32>,
    %c0_67 = arith.constant 0 : index
    %c95 = arith.constant 95 : index
    %85 = vector.load %arg12[%c0_67, %c95] : memref<4x512xf32, #tpu.memory_space<vmem>>, vector<4x256xf32>
    %c1_68 = arith.constant 1 : index
    %c0_69 = arith.constant 0 : index
    %86 = vector.load %arg10[%c1_68, %c0_69] : memref<5x256xf32, #tpu.memory_space<vmem>>, vector<1x256xf32>
    %87 = vector.broadcast %86 : vector<1x256xf32> to vector<4x256xf32>
    %88 = arith.mulf %85, %87 : vector<4x256xf32>
    %c64_70 = arith.constant 64 : index
    %c0_71 = arith.constant 0 : index
    %89 = vector.load %arg13[%c64_70, %c0_71] : memref<220x256xf32, #tpu.memory_space<vmem>>, vector<4x256xf32>
    tpu.vector_store %arg13[%c64_70, %c0_71], %88 {strides = array<i32>} : memref<220x256xf32, #tpu.memory_space<vmem>>, vector<4x256xf32>,
    %c0_72 = arith.constant 0 : index
    %c96 = arith.constant 96 : index
    %90 = vector.load %arg12[%c0_72, %c96] : memref<4x512xf32, #tpu.memory_space<vmem>>, vector<4x256xf32>
    %c68 = arith.constant 68 : index
    %c0_73 = arith.constant 0 : index
    %91 = vector.load %arg13[%c68, %c0_73] : memref<220x256xf32, #tpu.memory_space<vmem>>, vector<4x256xf32>
    tpu.vector_store %arg13[%c68, %c0_73], %90 {strides = array<i32>} : memref<220x256xf32, #tpu.memory_space<vmem>>, vector<4x256xf32>,
    %c0_74 = arith.constant 0 : index
    %c97 = arith.constant 97 : index
    %92 = vector.load %arg12[%c0_74, %c97] : memref<4x512xf32, #tpu.memory_space<vmem>>, vector<4x256xf32>
    %c3_75 = arith.constant 3 : index
    %c0_76 = arith.constant 0 : index
    %93 = vector.load %arg10[%c3_75, %c0_76] : memref<5x256xf32, #tpu.memory_space<vmem>>, vector<1x256xf32>
    %94 = vector.broadcast %93 : vector<1x256xf32> to vector<4x256xf32>
    %95 = arith.mulf %92, %94 : vector<4x256xf32>
    %c72 = arith.constant 72 : index
    %c0_77 = arith.constant 0 : index
    %96 = vector.load %arg13[%c72, %c0_77] : memref<220x256xf32, #tpu.memory_space<vmem>>, vector<4x256xf32>
    tpu.vector_store %arg13[%c72, %c0_77], %95 {strides = array<i32>} : memref<220x256xf32, #tpu.memory_space<vmem>>, vector<4x256xf32>,
    %c0_78 = arith.constant 0 : index
    %c98 = arith.constant 98 : index
    %97 = vector.load %arg12[%c0_78, %c98] : memref<4x512xf32, #tpu.memory_space<vmem>>, vector<4x256xf32>
    %c4_79 = arith.constant 4 : index
    %c0_80 = arith.constant 0 : index
    %98 = vector.load %arg10[%c4_79, %c0_80] : memref<5x256xf32, #tpu.memory_space<vmem>>, vector<1x256xf32>
    %99 = vector.broadcast %98 : vector<1x256xf32> to vector<4x256xf32>
    %100 = arith.mulf %97, %99 : vector<4x256xf32>
    %c76 = arith.constant 76 : index
    %c0_81 = arith.constant 0 : index
    %101 = vector.load %arg13[%c76, %c0_81] : memref<220x256xf32, #tpu.memory_space<vmem>>, vector<4x256xf32>
    tpu.vector_store %arg13[%c76, %c0_81], %100 {strides = array<i32>} : memref<220x256xf32, #tpu.memory_space<vmem>>, vector<4x256xf32>,
    %c0_82 = arith.constant 0 : index
    %c110 = arith.constant 110 : index
    %102 = vector.load %arg12[%c0_82, %c110] : memref<4x512xf32, #tpu.memory_space<vmem>>, vector<4x256xf32>
    %c0_83 = arith.constant 0 : index
    %c0_84 = arith.constant 0 : index
    %103 = vector.load %arg10[%c0_83, %c0_84] : memref<5x256xf32, #tpu.memory_space<vmem>>, vector<1x256xf32>
    %104 = vector.broadcast %103 : vector<1x256xf32> to vector<4x256xf32>
    %105 = arith.mulf %102, %104 : vector<4x256xf32>
    %c80_85 = arith.constant 80 : index
    %c0_86 = arith.constant 0 : index
    %106 = vector.load %arg13[%c80_85, %c0_86] : memref<220x256xf32, #tpu.memory_space<vmem>>, vector<4x256xf32>
    tpu.vector_store %arg13[%c80_85, %c0_86], %105 {strides = array<i32>} : memref<220x256xf32, #tpu.memory_space<vmem>>, vector<4x256xf32>,
    %c0_87 = arith.constant 0 : index
    %c111 = arith.constant 111 : index
    %107 = vector.load %arg12[%c0_87, %c111] : memref<4x512xf32, #tpu.memory_space<vmem>>, vector<4x256xf32>
    %c1_88 = arith.constant 1 : index
    %c0_89 = arith.constant 0 : index
    %108 = vector.load %arg10[%c1_88, %c0_89] : memref<5x256xf32, #tpu.memory_space<vmem>>, vector<1x256xf32>
    %109 = vector.broadcast %108 : vector<1x256xf32> to vector<4x256xf32>
    %110 = arith.mulf %107, %109 : vector<4x256xf32>
    %c84 = arith.constant 84 : index
    %c0_90 = arith.constant 0 : index
    %111 = vector.load %arg13[%c84, %c0_90] : memref<220x256xf32, #tpu.memory_space<vmem>>, vector<4x256xf32>
    tpu.vector_store %arg13[%c84, %c0_90], %110 {strides = array<i32>} : memref<220x256xf32, #tpu.memory_space<vmem>>, vector<4x256xf32>,
    %c0_91 = arith.constant 0 : index
    %c112 = arith.constant 112 : index
    %112 = vector.load %arg12[%c0_91, %c112] : memref<4x512xf32, #tpu.memory_space<vmem>>, vector<4x256xf32>
    %c88 = arith.constant 88 : index
    %c0_92 = arith.constant 0 : index
    %113 = vector.load %arg13[%c88, %c0_92] : memref<220x256xf32, #tpu.memory_space<vmem>>, vector<4x256xf32>
    tpu.vector_store %arg13[%c88, %c0_92], %112 {strides = array<i32>} : memref<220x256xf32, #tpu.memory_space<vmem>>, vector<4x256xf32>,
    %c0_93 = arith.constant 0 : index
    %c113 = arith.constant 113 : index
    %114 = vector.load %arg12[%c0_93, %c113] : memref<4x512xf32, #tpu.memory_space<vmem>>, vector<4x256xf32>
    %c3_94 = arith.constant 3 : index
    %c0_95 = arith.constant 0 : index
    %115 = vector.load %arg10[%c3_94, %c0_95] : memref<5x256xf32, #tpu.memory_space<vmem>>, vector<1x256xf32>
    %116 = vector.broadcast %115 : vector<1x256xf32> to vector<4x256xf32>
    %117 = arith.mulf %114, %116 : vector<4x256xf32>
    %c92 = arith.constant 92 : index
    %c0_96 = arith.constant 0 : index
    %118 = vector.load %arg13[%c92, %c0_96] : memref<220x256xf32, #tpu.memory_space<vmem>>, vector<4x256xf32>
    tpu.vector_store %arg13[%c92, %c0_96], %117 {strides = array<i32>} : memref<220x256xf32, #tpu.memory_space<vmem>>, vector<4x256xf32>,
    %c0_97 = arith.constant 0 : index
    %c114 = arith.constant 114 : index
    %119 = vector.load %arg12[%c0_97, %c114] : memref<4x512xf32, #tpu.memory_space<vmem>>, vector<4x256xf32>
    %c4_98 = arith.constant 4 : index
    %c0_99 = arith.constant 0 : index
    %120 = vector.load %arg10[%c4_98, %c0_99] : memref<5x256xf32, #tpu.memory_space<vmem>>, vector<1x256xf32>
    %121 = vector.broadcast %120 : vector<1x256xf32> to vector<4x256xf32>
    %122 = arith.mulf %119, %121 : vector<4x256xf32>
    %c96_100 = arith.constant 96 : index
    %c0_101 = arith.constant 0 : index
    %123 = vector.load %arg13[%c96_100, %c0_101] : memref<220x256xf32, #tpu.memory_space<vmem>>, vector<4x256xf32>
    tpu.vector_store %arg13[%c96_100, %c0_101], %122 {strides = array<i32>} : memref<220x256xf32, #tpu.memory_space<vmem>>, vector<4x256xf32>,
    %c0_102 = arith.constant 0 : index
    %c126 = arith.constant 126 : index
    %124 = vector.load %arg12[%c0_102, %c126] : memref<4x512xf32, #tpu.memory_space<vmem>>, vector<4x256xf32>
    %c0_103 = arith.constant 0 : index
    %c0_104 = arith.constant 0 : index
    %125 = vector.load %arg10[%c0_103, %c0_104] : memref<5x256xf32, #tpu.memory_space<vmem>>, vector<1x256xf32>
    %126 = vector.broadcast %125 : vector<1x256xf32> to vector<4x256xf32>
    %127 = arith.mulf %124, %126 : vector<4x256xf32>
    %c100 = arith.constant 100 : index
    %c0_105 = arith.constant 0 : index
    %128 = vector.load %arg13[%c100, %c0_105] : memref<220x256xf32, #tpu.memory_space<vmem>>, vector<4x256xf32>
    tpu.vector_store %arg13[%c100, %c0_105], %127 {strides = array<i32>} : memref<220x256xf32, #tpu.memory_space<vmem>>, vector<4x256xf32>,
    %c0_106 = arith.constant 0 : index
    %c127 = arith.constant 127 : index
    %129 = vector.load %arg12[%c0_106, %c127] : memref<4x512xf32, #tpu.memory_space<vmem>>, vector<4x256xf32>
    %c1_107 = arith.constant 1 : index
    %c0_108 = arith.constant 0 : index
    %130 = vector.load %arg10[%c1_107, %c0_108] : memref<5x256xf32, #tpu.memory_space<vmem>>, vector<1x256xf32>
    %131 = vector.broadcast %130 : vector<1x256xf32> to vector<4x256xf32>
    %132 = arith.mulf %129, %131 : vector<4x256xf32>
    %c104 = arith.constant 104 : index
    %c0_109 = arith.constant 0 : index
    %133 = vector.load %arg13[%c104, %c0_109] : memref<220x256xf32, #tpu.memory_space<vmem>>, vector<4x256xf32>
    tpu.vector_store %arg13[%c104, %c0_109], %132 {strides = array<i32>} : memref<220x256xf32, #tpu.memory_space<vmem>>, vector<4x256xf32>,
    %c0_110 = arith.constant 0 : index
    %c128_111 = arith.constant 128 : index
    %134 = vector.load %arg12[%c0_110, %c128_111] : memref<4x512xf32, #tpu.memory_space<vmem>>, vector<4x256xf32>
    %c108 = arith.constant 108 : index
    %c0_112 = arith.constant 0 : index
    %135 = vector.load %arg13[%c108, %c0_112] : memref<220x256xf32, #tpu.memory_space<vmem>>, vector<4x256xf32>
    tpu.vector_store %arg13[%c108, %c0_112], %134 {strides = array<i32>} : memref<220x256xf32, #tpu.memory_space<vmem>>, vector<4x256xf32>,
    %c0_113 = arith.constant 0 : index
    %c129 = arith.constant 129 : index
    %136 = vector.load %arg12[%c0_113, %c129] : memref<4x512xf32, #tpu.memory_space<vmem>>, vector<4x256xf32>
    %c3_114 = arith.constant 3 : index
    %c0_115 = arith.constant 0 : index
    %137 = vector.load %arg10[%c3_114, %c0_115] : memref<5x256xf32, #tpu.memory_space<vmem>>, vector<1x256xf32>
    %138 = vector.broadcast %137 : vector<1x256xf32> to vector<4x256xf32>
    %139 = arith.mulf %136, %138 : vector<4x256xf32>
    %c112_116 = arith.constant 112 : index
    %c0_117 = arith.constant 0 : index
    %140 = vector.load %arg13[%c112_116, %c0_117] : memref<220x256xf32, #tpu.memory_space<vmem>>, vector<4x256xf32>
    tpu.vector_store %arg13[%c112_116, %c0_117], %139 {strides = array<i32>} : memref<220x256xf32, #tpu.memory_space<vmem>>, vector<4x256xf32>,
    %c0_118 = arith.constant 0 : index
    %c130 = arith.constant 130 : index
    %141 = vector.load %arg12[%c0_118, %c130] : memref<4x512xf32, #tpu.memory_space<vmem>>, vector<4x256xf32>
    %c4_119 = arith.constant 4 : index
    %c0_120 = arith.constant 0 : index
    %142 = vector.load %arg10[%c4_119, %c0_120] : memref<5x256xf32, #tpu.memory_space<vmem>>, vector<1x256xf32>
    %143 = vector.broadcast %142 : vector<1x256xf32> to vector<4x256xf32>
    %144 = arith.mulf %141, %143 : vector<4x256xf32>
    %c116 = arith.constant 116 : index
    %c0_121 = arith.constant 0 : index
    %145 = vector.load %arg13[%c116, %c0_121] : memref<220x256xf32, #tpu.memory_space<vmem>>, vector<4x256xf32>
    tpu.vector_store %arg13[%c116, %c0_121], %144 {strides = array<i32>} : memref<220x256xf32, #tpu.memory_space<vmem>>, vector<4x256xf32>,
    %c0_122 = arith.constant 0 : index
    %c142 = arith.constant 142 : index
    %146 = vector.load %arg12[%c0_122, %c142] : memref<4x512xf32, #tpu.memory_space<vmem>>, vector<4x256xf32>
    %c0_123 = arith.constant 0 : index
    %c0_124 = arith.constant 0 : index
    %147 = vector.load %arg10[%c0_123, %c0_124] : memref<5x256xf32, #tpu.memory_space<vmem>>, vector<1x256xf32>
    %148 = vector.broadcast %147 : vector<1x256xf32> to vector<4x256xf32>
    %149 = arith.mulf %146, %148 : vector<4x256xf32>
    %c120 = arith.constant 120 : index
    %c0_125 = arith.constant 0 : index
    %150 = vector.load %arg13[%c120, %c0_125] : memref<220x256xf32, #tpu.memory_space<vmem>>, vector<4x256xf32>
    tpu.vector_store %arg13[%c120, %c0_125], %149 {strides = array<i32>} : memref<220x256xf32, #tpu.memory_space<vmem>>, vector<4x256xf32>,
    %c0_126 = arith.constant 0 : index
    %c143 = arith.constant 143 : index
    %151 = vector.load %arg12[%c0_126, %c143] : memref<4x512xf32, #tpu.memory_space<vmem>>, vector<4x256xf32>
    %c1_127 = arith.constant 1 : index
    %c0_128 = arith.constant 0 : index
    %152 = vector.load %arg10[%c1_127, %c0_128] : memref<5x256xf32, #tpu.memory_space<vmem>>, vector<1x256xf32>
    %153 = vector.broadcast %152 : vector<1x256xf32> to vector<4x256xf32>
    %154 = arith.mulf %151, %153 : vector<4x256xf32>
    %c124 = arith.constant 124 : index
    %c0_129 = arith.constant 0 : index
    %155 = vector.load %arg13[%c124, %c0_129] : memref<220x256xf32, #tpu.memory_space<vmem>>, vector<4x256xf32>
    tpu.vector_store %arg13[%c124, %c0_129], %154 {strides = array<i32>} : memref<220x256xf32, #tpu.memory_space<vmem>>, vector<4x256xf32>,
    %c0_130 = arith.constant 0 : index
    %c144 = arith.constant 144 : index
    %156 = vector.load %arg12[%c0_130, %c144] : memref<4x512xf32, #tpu.memory_space<vmem>>, vector<4x256xf32>
    %c128_131 = arith.constant 128 : index
    %c0_132 = arith.constant 0 : index
    %157 = vector.load %arg13[%c128_131, %c0_132] : memref<220x256xf32, #tpu.memory_space<vmem>>, vector<4x256xf32>
    tpu.vector_store %arg13[%c128_131, %c0_132], %156 {strides = array<i32>} : memref<220x256xf32, #tpu.memory_space<vmem>>, vector<4x256xf32>,
    %c0_133 = arith.constant 0 : index
    %c145 = arith.constant 145 : index
    %158 = vector.load %arg12[%c0_133, %c145] : memref<4x512xf32, #tpu.memory_space<vmem>>, vector<4x256xf32>
    %c3_134 = arith.constant 3 : index
    %c0_135 = arith.constant 0 : index
    %159 = vector.load %arg10[%c3_134, %c0_135] : memref<5x256xf32, #tpu.memory_space<vmem>>, vector<1x256xf32>
    %160 = vector.broadcast %159 : vector<1x256xf32> to vector<4x256xf32>
    %161 = arith.mulf %158, %160 : vector<4x256xf32>
    %c132 = arith.constant 132 : index
    %c0_136 = arith.constant 0 : index
    %162 = vector.load %arg13[%c132, %c0_136] : memref<220x256xf32, #tpu.memory_space<vmem>>, vector<4x256xf32>
    tpu.vector_store %arg13[%c132, %c0_136], %161 {strides = array<i32>} : memref<220x256xf32, #tpu.memory_space<vmem>>, vector<4x256xf32>,
    %c0_137 = arith.constant 0 : index
    %c146 = arith.constant 146 : index
    %163 = vector.load %arg12[%c0_137, %c146] : memref<4x512xf32, #tpu.memory_space<vmem>>, vector<4x256xf32>
    %c4_138 = arith.constant 4 : index
    %c0_139 = arith.constant 0 : index
    %164 = vector.load %arg10[%c4_138, %c0_139] : memref<5x256xf32, #tpu.memory_space<vmem>>, vector<1x256xf32>
    %165 = vector.broadcast %164 : vector<1x256xf32> to vector<4x256xf32>
    %166 = arith.mulf %163, %165 : vector<4x256xf32>
    %c136 = arith.constant 136 : index
    %c0_140 = arith.constant 0 : index
    %167 = vector.load %arg13[%c136, %c0_140] : memref<220x256xf32, #tpu.memory_space<vmem>>, vector<4x256xf32>
    tpu.vector_store %arg13[%c136, %c0_140], %166 {strides = array<i32>} : memref<220x256xf32, #tpu.memory_space<vmem>>, vector<4x256xf32>,
    %c0_141 = arith.constant 0 : index
    %c158 = arith.constant 158 : index
    %168 = vector.load %arg12[%c0_141, %c158] : memref<4x512xf32, #tpu.memory_space<vmem>>, vector<4x256xf32>
    %c0_142 = arith.constant 0 : index
    %c0_143 = arith.constant 0 : index
    %169 = vector.load %arg10[%c0_142, %c0_143] : memref<5x256xf32, #tpu.memory_space<vmem>>, vector<1x256xf32>
    %170 = vector.broadcast %169 : vector<1x256xf32> to vector<4x256xf32>
    %171 = arith.mulf %168, %170 : vector<4x256xf32>
    %c140 = arith.constant 140 : index
    %c0_144 = arith.constant 0 : index
    %172 = vector.load %arg13[%c140, %c0_144] : memref<220x256xf32, #tpu.memory_space<vmem>>, vector<4x256xf32>
    tpu.vector_store %arg13[%c140, %c0_144], %171 {strides = array<i32>} : memref<220x256xf32, #tpu.memory_space<vmem>>, vector<4x256xf32>,
    %c0_145 = arith.constant 0 : index
    %c159 = arith.constant 159 : index
    %173 = vector.load %arg12[%c0_145, %c159] : memref<4x512xf32, #tpu.memory_space<vmem>>, vector<4x256xf32>
    %c1_146 = arith.constant 1 : index
    %c0_147 = arith.constant 0 : index
    %174 = vector.load %arg10[%c1_146, %c0_147] : memref<5x256xf32, #tpu.memory_space<vmem>>, vector<1x256xf32>
    %175 = vector.broadcast %174 : vector<1x256xf32> to vector<4x256xf32>
    %176 = arith.mulf %173, %175 : vector<4x256xf32>
    %c144_148 = arith.constant 144 : index
    %c0_149 = arith.constant 0 : index
    %177 = vector.load %arg13[%c144_148, %c0_149] : memref<220x256xf32, #tpu.memory_space<vmem>>, vector<4x256xf32>
    tpu.vector_store %arg13[%c144_148, %c0_149], %176 {strides = array<i32>} : memref<220x256xf32, #tpu.memory_space<vmem>>, vector<4x256xf32>,
    %c0_150 = arith.constant 0 : index
    %c160 = arith.constant 160 : index
    %178 = vector.load %arg12[%c0_150, %c160] : memref<4x512xf32, #tpu.memory_space<vmem>>, vector<4x256xf32>
    %c148 = arith.constant 148 : index
    %c0_151 = arith.constant 0 : index
    %179 = vector.load %arg13[%c148, %c0_151] : memref<220x256xf32, #tpu.memory_space<vmem>>, vector<4x256xf32>
    tpu.vector_store %arg13[%c148, %c0_151], %178 {strides = array<i32>} : memref<220x256xf32, #tpu.memory_space<vmem>>, vector<4x256xf32>,
    %c0_152 = arith.constant 0 : index
    %c161 = arith.constant 161 : index
    %180 = vector.load %arg12[%c0_152, %c161] : memref<4x512xf32, #tpu.memory_space<vmem>>, vector<4x256xf32>
    %c3_153 = arith.constant 3 : index
    %c0_154 = arith.constant 0 : index
    %181 = vector.load %arg10[%c3_153, %c0_154] : memref<5x256xf32, #tpu.memory_space<vmem>>, vector<1x256xf32>
    %182 = vector.broadcast %181 : vector<1x256xf32> to vector<4x256xf32>
    %183 = arith.mulf %180, %182 : vector<4x256xf32>
    %c152 = arith.constant 152 : index
    %c0_155 = arith.constant 0 : index
    %184 = vector.load %arg13[%c152, %c0_155] : memref<220x256xf32, #tpu.memory_space<vmem>>, vector<4x256xf32>
    tpu.vector_store %arg13[%c152, %c0_155], %183 {strides = array<i32>} : memref<220x256xf32, #tpu.memory_space<vmem>>, vector<4x256xf32>,
    %c0_156 = arith.constant 0 : index
    %c162 = arith.constant 162 : index
    %185 = vector.load %arg12[%c0_156, %c162] : memref<4x512xf32, #tpu.memory_space<vmem>>, vector<4x256xf32>
    %c4_157 = arith.constant 4 : index
    %c0_158 = arith.constant 0 : index
    %186 = vector.load %arg10[%c4_157, %c0_158] : memref<5x256xf32, #tpu.memory_space<vmem>>, vector<1x256xf32>
    %187 = vector.broadcast %186 : vector<1x256xf32> to vector<4x256xf32>
    %188 = arith.mulf %185, %187 : vector<4x256xf32>
    %c156 = arith.constant 156 : index
    %c0_159 = arith.constant 0 : index
    %189 = vector.load %arg13[%c156, %c0_159] : memref<220x256xf32, #tpu.memory_space<vmem>>, vector<4x256xf32>
    tpu.vector_store %arg13[%c156, %c0_159], %188 {strides = array<i32>} : memref<220x256xf32, #tpu.memory_space<vmem>>, vector<4x256xf32>,
    %c0_160 = arith.constant 0 : index
    %c174 = arith.constant 174 : index
    %190 = vector.load %arg12[%c0_160, %c174] : memref<4x512xf32, #tpu.memory_space<vmem>>, vector<4x256xf32>
    %c0_161 = arith.constant 0 : index
    %c0_162 = arith.constant 0 : index
    %191 = vector.load %arg10[%c0_161, %c0_162] : memref<5x256xf32, #tpu.memory_space<vmem>>, vector<1x256xf32>
    %192 = vector.broadcast %191 : vector<1x256xf32> to vector<4x256xf32>
    %193 = arith.mulf %190, %192 : vector<4x256xf32>
    %c160_163 = arith.constant 160 : index
    %c0_164 = arith.constant 0 : index
    %194 = vector.load %arg13[%c160_163, %c0_164] : memref<220x256xf32, #tpu.memory_space<vmem>>, vector<4x256xf32>
    tpu.vector_store %arg13[%c160_163, %c0_164], %193 {strides = array<i32>} : memref<220x256xf32, #tpu.memory_space<vmem>>, vector<4x256xf32>,
    %c0_165 = arith.constant 0 : index
    %c175 = arith.constant 175 : index
    %195 = vector.load %arg12[%c0_165, %c175] : memref<4x512xf32, #tpu.memory_space<vmem>>, vector<4x256xf32>
    %c1_166 = arith.constant 1 : index
    %c0_167 = arith.constant 0 : index
    %196 = vector.load %arg10[%c1_166, %c0_167] : memref<5x256xf32, #tpu.memory_space<vmem>>, vector<1x256xf32>
    %197 = vector.broadcast %196 : vector<1x256xf32> to vector<4x256xf32>
    %198 = arith.mulf %195, %197 : vector<4x256xf32>
    %c164 = arith.constant 164 : index
    %c0_168 = arith.constant 0 : index
    %199 = vector.load %arg13[%c164, %c0_168] : memref<220x256xf32, #tpu.memory_space<vmem>>, vector<4x256xf32>
    tpu.vector_store %arg13[%c164, %c0_168], %198 {strides = array<i32>} : memref<220x256xf32, #tpu.memory_space<vmem>>, vector<4x256xf32>,
    %c0_169 = arith.constant 0 : index
    %c176 = arith.constant 176 : index
    %200 = vector.load %arg12[%c0_169, %c176] : memref<4x512xf32, #tpu.memory_space<vmem>>, vector<4x256xf32>
    %c168 = arith.constant 168 : index
    %c0_170 = arith.constant 0 : index
    %201 = vector.load %arg13[%c168, %c0_170] : memref<220x256xf32, #tpu.memory_space<vmem>>, vector<4x256xf32>
    tpu.vector_store %arg13[%c168, %c0_170], %200 {strides = array<i32>} : memref<220x256xf32, #tpu.memory_space<vmem>>, vector<4x256xf32>,
    %c0_171 = arith.constant 0 : index
    %c177 = arith.constant 177 : index
    %202 = vector.load %arg12[%c0_171, %c177] : memref<4x512xf32, #tpu.memory_space<vmem>>, vector<4x256xf32>
    %c3_172 = arith.constant 3 : index
    %c0_173 = arith.constant 0 : index
    %203 = vector.load %arg10[%c3_172, %c0_173] : memref<5x256xf32, #tpu.memory_space<vmem>>, vector<1x256xf32>
    %204 = vector.broadcast %203 : vector<1x256xf32> to vector<4x256xf32>
    %205 = arith.mulf %202, %204 : vector<4x256xf32>
    %c172 = arith.constant 172 : index
    %c0_174 = arith.constant 0 : index
    %206 = vector.load %arg13[%c172, %c0_174] : memref<220x256xf32, #tpu.memory_space<vmem>>, vector<4x256xf32>
    tpu.vector_store %arg13[%c172, %c0_174], %205 {strides = array<i32>} : memref<220x256xf32, #tpu.memory_space<vmem>>, vector<4x256xf32>,
    %c0_175 = arith.constant 0 : index
    %c178 = arith.constant 178 : index
    %207 = vector.load %arg12[%c0_175, %c178] : memref<4x512xf32, #tpu.memory_space<vmem>>, vector<4x256xf32>
    %c4_176 = arith.constant 4 : index
    %c0_177 = arith.constant 0 : index
    %208 = vector.load %arg10[%c4_176, %c0_177] : memref<5x256xf32, #tpu.memory_space<vmem>>, vector<1x256xf32>
    %209 = vector.broadcast %208 : vector<1x256xf32> to vector<4x256xf32>
    %210 = arith.mulf %207, %209 : vector<4x256xf32>
    %c176_178 = arith.constant 176 : index
    %c0_179 = arith.constant 0 : index
    %211 = vector.load %arg13[%c176_178, %c0_179] : memref<220x256xf32, #tpu.memory_space<vmem>>, vector<4x256xf32>
    tpu.vector_store %arg13[%c176_178, %c0_179], %210 {strides = array<i32>} : memref<220x256xf32, #tpu.memory_space<vmem>>, vector<4x256xf32>,
    %c0_180 = arith.constant 0 : index
    %c190 = arith.constant 190 : index
    %212 = vector.load %arg12[%c0_180, %c190] : memref<4x512xf32, #tpu.memory_space<vmem>>, vector<4x256xf32>
    %c0_181 = arith.constant 0 : index
    %c0_182 = arith.constant 0 : index
    %213 = vector.load %arg10[%c0_181, %c0_182] : memref<5x256xf32, #tpu.memory_space<vmem>>, vector<1x256xf32>
    %214 = vector.broadcast %213 : vector<1x256xf32> to vector<4x256xf32>
    %215 = arith.mulf %212, %214 : vector<4x256xf32>
    %c180 = arith.constant 180 : index
    %c0_183 = arith.constant 0 : index
    %216 = vector.load %arg13[%c180, %c0_183] : memref<220x256xf32, #tpu.memory_space<vmem>>, vector<4x256xf32>
    tpu.vector_store %arg13[%c180, %c0_183], %215 {strides = array<i32>} : memref<220x256xf32, #tpu.memory_space<vmem>>, vector<4x256xf32>,
    %c0_184 = arith.constant 0 : index
    %c191 = arith.constant 191 : index
    %217 = vector.load %arg12[%c0_184, %c191] : memref<4x512xf32, #tpu.memory_space<vmem>>, vector<4x256xf32>
    %c1_185 = arith.constant 1 : index
    %c0_186 = arith.constant 0 : index
    %218 = vector.load %arg10[%c1_185, %c0_186] : memref<5x256xf32, #tpu.memory_space<vmem>>, vector<1x256xf32>
    %219 = vector.broadcast %218 : vector<1x256xf32> to vector<4x256xf32>
    %220 = arith.mulf %217, %219 : vector<4x256xf32>
    %c184 = arith.constant 184 : index
    %c0_187 = arith.constant 0 : index
    %221 = vector.load %arg13[%c184, %c0_187] : memref<220x256xf32, #tpu.memory_space<vmem>>, vector<4x256xf32>
    tpu.vector_store %arg13[%c184, %c0_187], %220 {strides = array<i32>} : memref<220x256xf32, #tpu.memory_space<vmem>>, vector<4x256xf32>,
    %c0_188 = arith.constant 0 : index
    %c192 = arith.constant 192 : index
    %222 = vector.load %arg12[%c0_188, %c192] : memref<4x512xf32, #tpu.memory_space<vmem>>, vector<4x256xf32>
    %c188 = arith.constant 188 : index
    %c0_189 = arith.constant 0 : index
    %223 = vector.load %arg13[%c188, %c0_189] : memref<220x256xf32, #tpu.memory_space<vmem>>, vector<4x256xf32>
    tpu.vector_store %arg13[%c188, %c0_189], %222 {strides = array<i32>} : memref<220x256xf32, #tpu.memory_space<vmem>>, vector<4x256xf32>,
    %c0_190 = arith.constant 0 : index
    %c193 = arith.constant 193 : index
    %224 = vector.load %arg12[%c0_190, %c193] : memref<4x512xf32, #tpu.memory_space<vmem>>, vector<4x256xf32>
    %c3_191 = arith.constant 3 : index
    %c0_192 = arith.constant 0 : index
    %225 = vector.load %arg10[%c3_191, %c0_192] : memref<5x256xf32, #tpu.memory_space<vmem>>, vector<1x256xf32>
    %226 = vector.broadcast %225 : vector<1x256xf32> to vector<4x256xf32>
    %227 = arith.mulf %224, %226 : vector<4x256xf32>
    %c192_193 = arith.constant 192 : index
    %c0_194 = arith.constant 0 : index
    %228 = vector.load %arg13[%c192_193, %c0_194] : memref<220x256xf32, #tpu.memory_space<vmem>>, vector<4x256xf32>
    tpu.vector_store %arg13[%c192_193, %c0_194], %227 {strides = array<i32>} : memref<220x256xf32, #tpu.memory_space<vmem>>, vector<4x256xf32>,
    %c0_195 = arith.constant 0 : index
    %c194 = arith.constant 194 : index
    %229 = vector.load %arg12[%c0_195, %c194] : memref<4x512xf32, #tpu.memory_space<vmem>>, vector<4x256xf32>
    %c4_196 = arith.constant 4 : index
    %c0_197 = arith.constant 0 : index
    %230 = vector.load %arg10[%c4_196, %c0_197] : memref<5x256xf32, #tpu.memory_space<vmem>>, vector<1x256xf32>
    %231 = vector.broadcast %230 : vector<1x256xf32> to vector<4x256xf32>
    %232 = arith.mulf %229, %231 : vector<4x256xf32>
    %c196 = arith.constant 196 : index
    %c0_198 = arith.constant 0 : index
    %233 = vector.load %arg13[%c196, %c0_198] : memref<220x256xf32, #tpu.memory_space<vmem>>, vector<4x256xf32>
    tpu.vector_store %arg13[%c196, %c0_198], %232 {strides = array<i32>} : memref<220x256xf32, #tpu.memory_space<vmem>>, vector<4x256xf32>,
    %c0_199 = arith.constant 0 : index
    %c206 = arith.constant 206 : index
    %234 = vector.load %arg12[%c0_199, %c206] : memref<4x512xf32, #tpu.memory_space<vmem>>, vector<4x256xf32>
    %c0_200 = arith.constant 0 : index
    %c0_201 = arith.constant 0 : index
    %235 = vector.load %arg10[%c0_200, %c0_201] : memref<5x256xf32, #tpu.memory_space<vmem>>, vector<1x256xf32>
    %236 = vector.broadcast %235 : vector<1x256xf32> to vector<4x256xf32>
    %237 = arith.mulf %234, %236 : vector<4x256xf32>
    %c200 = arith.constant 200 : index
    %c0_202 = arith.constant 0 : index
    %238 = vector.load %arg13[%c200, %c0_202] : memref<220x256xf32, #tpu.memory_space<vmem>>, vector<4x256xf32>
    tpu.vector_store %arg13[%c200, %c0_202], %237 {strides = array<i32>} : memref<220x256xf32, #tpu.memory_space<vmem>>, vector<4x256xf32>,
    %c0_203 = arith.constant 0 : index
    %c207 = arith.constant 207 : index
    %239 = vector.load %arg12[%c0_203, %c207] : memref<4x512xf32, #tpu.memory_space<vmem>>, vector<4x256xf32>
    %c1_204 = arith.constant 1 : index
    %c0_205 = arith.constant 0 : index
    %240 = vector.load %arg10[%c1_204, %c0_205] : memref<5x256xf32, #tpu.memory_space<vmem>>, vector<1x256xf32>
    %241 = vector.broadcast %240 : vector<1x256xf32> to vector<4x256xf32>
    %242 = arith.mulf %239, %241 : vector<4x256xf32>
    %c204 = arith.constant 204 : index
    %c0_206 = arith.constant 0 : index
    %243 = vector.load %arg13[%c204, %c0_206] : memref<220x256xf32, #tpu.memory_space<vmem>>, vector<4x256xf32>
    tpu.vector_store %arg13[%c204, %c0_206], %242 {strides = array<i32>} : memref<220x256xf32, #tpu.memory_space<vmem>>, vector<4x256xf32>,
    %c0_207 = arith.constant 0 : index
    %c208 = arith.constant 208 : index
    %244 = vector.load %arg12[%c0_207, %c208] : memref<4x512xf32, #tpu.memory_space<vmem>>, vector<4x256xf32>
    %c208_208 = arith.constant 208 : index
    %c0_209 = arith.constant 0 : index
    %245 = vector.load %arg13[%c208_208, %c0_209] : memref<220x256xf32, #tpu.memory_space<vmem>>, vector<4x256xf32>
    tpu.vector_store %arg13[%c208_208, %c0_209], %244 {strides = array<i32>} : memref<220x256xf32, #tpu.memory_space<vmem>>, vector<4x256xf32>,
    %c0_210 = arith.constant 0 : index
    %c209 = arith.constant 209 : index
    %246 = vector.load %arg12[%c0_210, %c209] : memref<4x512xf32, #tpu.memory_space<vmem>>, vector<4x256xf32>
    %c3_211 = arith.constant 3 : index
    %c0_212 = arith.constant 0 : index
    %247 = vector.load %arg10[%c3_211, %c0_212] : memref<5x256xf32, #tpu.memory_space<vmem>>, vector<1x256xf32>
    %248 = vector.broadcast %247 : vector<1x256xf32> to vector<4x256xf32>
    %249 = arith.mulf %246, %248 : vector<4x256xf32>
    %c212 = arith.constant 212 : index
    %c0_213 = arith.constant 0 : index
    %250 = vector.load %arg13[%c212, %c0_213] : memref<220x256xf32, #tpu.memory_space<vmem>>, vector<4x256xf32>
    tpu.vector_store %arg13[%c212, %c0_213], %249 {strides = array<i32>} : memref<220x256xf32, #tpu.memory_space<vmem>>, vector<4x256xf32>,
    %c0_214 = arith.constant 0 : index
    %c210 = arith.constant 210 : index
    %251 = vector.load %arg12[%c0_214, %c210] : memref<4x512xf32, #tpu.memory_space<vmem>>, vector<4x256xf32>
    %c4_215 = arith.constant 4 : index
    %c0_216 = arith.constant 0 : index
    %252 = vector.load %arg10[%c4_215, %c0_216] : memref<5x256xf32, #tpu.memory_space<vmem>>, vector<1x256xf32>
    %253 = vector.broadcast %252 : vector<1x256xf32> to vector<4x256xf32>
    %254 = arith.mulf %251, %253 : vector<4x256xf32>
    %c216 = arith.constant 216 : index
    %c0_217 = arith.constant 0 : index
    %255 = vector.load %arg13[%c216, %c0_217] : memref<220x256xf32, #tpu.memory_space<vmem>>, vector<4x256xf32>
    tpu.vector_store %arg13[%c216, %c0_217], %254 {strides = array<i32>} : memref<220x256xf32, #tpu.memory_space<vmem>>, vector<4x256xf32>,
    %c0_218 = arith.constant 0 : index
    %c0_219 = arith.constant 0 : index
    %256 = vector.load %arg3[%c0_218, %c0_219] : memref<8x220xbf16, #tpu.memory_space<vmem>>, vector<8x220xbf16>
    %c0_220 = arith.constant 0 : index
    %c0_221 = arith.constant 0 : index
    %257 = vector.load %arg13[%c0_220, %c0_221] : memref<220x256xf32, #tpu.memory_space<vmem>>, vector<220x256xf32>
    %258 = arith.truncf %257 : vector<220x256xf32> to vector<220x256xbf16>
    %cst_222 = arith.constant dense<0.000000e+00> : vector<8x256xf32>
    %259 = tpu.matmul %256, %258, %cst_222 {dimension_numbers = #tpu.dot_dimension_numbers<[1], [0], [0], [1], [0, 0, 1, 1], [], []>} : vector<8x220xbf16>, vector<220x256xbf16>, vector<8x256xf32> -> vector<8x256xf32>
    %c0_223 = arith.constant 0 : index
    %c0_224 = arith.constant 0 : index
    %260 = vector.load %arg7[%c0_223, %c0_224] : memref<8x1xf32, #tpu.memory_space<vmem>>, vector<8x1xf32>
    %261 = vector.broadcast %260 : vector<8x1xf32> to vector<8x256xf32>
    %262 = arith.addf %259, %261 : vector<8x256xf32>
    %cst_225 = arith.constant 0.000000e+00 : f32
    %263 = vector.broadcast %cst_225 : f32 to vector<8x256xf32>
    %264 = arith.maximumf %262, %263 : vector<8x256xf32>
    %c0_226 = arith.constant 0 : index
    %c0_227 = arith.constant 0 : index
    %265 = vector.load %arg4[%c0_226, %c0_227] : memref<16x8xbf16, #tpu.memory_space<vmem>>, vector<16x8xbf16>
    %266 = arith.truncf %264 : vector<8x256xf32> to vector<8x256xbf16>
    %cst_228 = arith.constant dense<0.000000e+00> : vector<16x256xf32>
    %267 = tpu.matmul %265, %266, %cst_228 {dimension_numbers = #tpu.dot_dimension_numbers<[1], [0], [0], [1], [0, 0, 1, 1], [], []>} : vector<16x8xbf16>, vector<8x256xbf16>, vector<16x256xf32> -> vector<16x256xf32>
    %c0_229 = arith.constant 0 : index
    %c0_230 = arith.constant 0 : index
    %268 = vector.load %arg8[%c0_229, %c0_230] : memref<16x1xf32, #tpu.memory_space<vmem>>, vector<16x1xf32>
    %269 = vector.broadcast %268 : vector<16x1xf32> to vector<16x256xf32>
    %270 = arith.addf %267, %269 : vector<16x256xf32>
    %c0_231 = arith.constant 0 : index
    %c0_232 = arith.constant 0 : index
    %271 = vector.load %arg5[%c0_231, %c0_232] : memref<16x4xbf16, #tpu.memory_space<vmem>>, vector<16x4xbf16>
    %cst_233 = arith.constant dense<0.000000e+00> : vector<16x256xf32>
    %272 = tpu.matmul %271, %2, %cst_233 {dimension_numbers = #tpu.dot_dimension_numbers<[1], [0], [0], [1], [0, 0, 1, 1], [], []>} : vector<16x4xbf16>, vector<4x256xbf16>, vector<16x256xf32> -> vector<16x256xf32>
    %c0_234 = arith.constant 0 : index
    %c0_235 = arith.constant 0 : index
    %273 = vector.load %arg9[%c0_234, %c0_235] : memref<16x1xf32, #tpu.memory_space<vmem>>, vector<16x1xf32>
    %274 = vector.broadcast %273 : vector<16x1xf32> to vector<16x256xf32>
    %275 = arith.addf %272, %274 : vector<16x256xf32>
    %276 = arith.addf %270, %275 : vector<16x256xf32>
    %cst_236 = arith.constant 0.000000e+00 : f32
    %277 = vector.broadcast %cst_236 : f32 to vector<16x256xf32>
    %278 = arith.maximumf %276, %277 : vector<16x256xf32>
    %c0_237 = arith.constant 0 : index
    %c0_238 = arith.constant 0 : index
    %c0_239 = arith.constant 0 : index
    %279 = vector.load %arg11[%c0_237, %c0_238, %c0_239] : memref<1x16x256xf32, #tpu.memory_space<vmem>>, vector<1x16x256xf32>
    %280 = vector.shape_cast %279 : vector<1x16x256xf32> to vector<16x256xf32>
    %281 = vector.shape_cast %278 : vector<16x256xf32> to vector<1x16x256xf32>
    tpu.vector_store %arg11[%c0_237, %c0_238, %c0_239], %281 {strides = array<i32>} : memref<1x16x256xf32, #tpu.memory_space<vmem>>, vector<1x16x256xf32>,
    return
  }
  func.func @transform_0(%arg0: i32) -> (i32, i32, i32) {
    %c0_i32 = arith.constant 0 : i32
    %c0_i32_0 = arith.constant 0 : i32
    %c0_i32_1 = arith.constant 0 : i32
    return %arg0, %c0_i32, %c0_i32_0 : i32, i32, i32
  }
  func.func @transform_1(%arg0: i32) -> (i32, i32) {
    %c0_i32 = arith.constant 0 : i32
    %c0_i32_0 = arith.constant 0 : i32
    %c0_i32_1 = arith.constant 0 : i32
    return %c0_i32, %c0_i32_0 : i32, i32
  }
  func.func @transform_2(%arg0: i32) -> (i32, i32) {
    %c0_i32 = arith.constant 0 : i32
    %c0_i32_0 = arith.constant 0 : i32
    %c0_i32_1 = arith.constant 0 : i32
    return %c0_i32, %c0_i32_0 : i32, i32
  }
  func.func @transform_3(%arg0: i32) -> (i32, i32) {
    %c0_i32 = arith.constant 0 : i32
    %c0_i32_0 = arith.constant 0 : i32
    %c0_i32_1 = arith.constant 0 : i32
    return %c0_i32, %c0_i32_0 : i32, i32
  }
  func.func @transform_4(%arg0: i32) -> (i32, i32) {
    %c0_i32 = arith.constant 0 : i32
    %c0_i32_0 = arith.constant 0 : i32
    %c0_i32_1 = arith.constant 0 : i32
    return %c0_i32, %c0_i32_0 : i32, i32
  }
  func.func @transform_5(%arg0: i32) -> (i32, i32) {
    %c0_i32 = arith.constant 0 : i32
    %c0_i32_0 = arith.constant 0 : i32
    %c0_i32_1 = arith.constant 0 : i32
    return %c0_i32, %c0_i32_0 : i32, i32
  }
  func.func @transform_6(%arg0: i32) -> (i32, i32) {
    %c0_i32 = arith.constant 0 : i32
    %c0_i32_0 = arith.constant 0 : i32
    %c0_i32_1 = arith.constant 0 : i32
    return %c0_i32, %c0_i32_0 : i32, i32
  }
  func.func @transform_7(%arg0: i32) -> (i32, i32) {
    %c0_i32 = arith.constant 0 : i32
    %c0_i32_0 = arith.constant 0 : i32
    %c0_i32_1 = arith.constant 0 : i32
    return %c0_i32, %c0_i32_0 : i32, i32
  }
  func.func @transform_8(%arg0: i32) -> (i32, i32) {
    %c0_i32 = arith.constant 0 : i32
    %c0_i32_0 = arith.constant 0 : i32
    %c0_i32_1 = arith.constant 0 : i32
    return %c0_i32, %c0_i32_0 : i32, i32
  }
  func.func @transform_9(%arg0: i32) -> (i32, i32) {
    %c0_i32 = arith.constant 0 : i32
    %c0_i32_0 = arith.constant 0 : i32
    %c0_i32_1 = arith.constant 0 : i32
    return %c0_i32, %c0_i32_0 : i32, i32
  }
  func.func @transform_10(%arg0: i32) -> (i32, i32, i32) {
    %c0_i32 = arith.constant 0 : i32
    %c0_i32_0 = arith.constant 0 : i32
    %c0_i32_1 = arith.constant 0 : i32
    return %arg0, %c0_i32, %c0_i32_0 : i32, i32, i32
  }
}

</mosaic_0001>

<bundles_post_ra>
// kernel: residual_block_2d.1
= control target key start
LH: loop header
LB: loop body
LE: loop exit
PB: predicated region body
PF: predicated region fallthrough
CT: control target
= control target key end

     0   :  { %s2866_s13 = smov 0   ;;  %s3903_s0 = inlined_call_operand.vmem [shape: f32[2,4,256], index: 0, kind: input, shape index: {}]   ;;  %s3904_s1 = inlined_call_operand.vmem [shape: bf16[4,4], index: 1, kind: input, shape index: {}]   ;;  %s3905_s2 = inlined_call_operand.vmem [shape: bf16[8,220], index: 2, kind: input, shape index: {}]   ;;  %s3906_s3 = inlined_call_operand.vmem [shape: bf16[16,8], index: 3, kind: input, shape index: {}]   ;;  %s3907_s4 = inlined_call_operand.vmem [shape: bf16[16,4], index: 4, kind: input, shape index: {}]   ;;  %s3908_s5 = inlined_call_operand.vmem [shape: f32[4,1], index: 5, kind: input, shape index: {}]   ;;  %s3909_s6 = inlined_call_operand.vmem [shape: f32[8,1], index: 6, kind: input, shape index: {}]   ;;  %s3910_s7 = inlined_call_operand.vmem [shape: f32[16,1], index: 7, kind: input, shape index: {}]   ;;  %s3911_s8 = inlined_call_operand.vmem [shape: f32[16,1], index: 8, kind: input, shape index: {}]   ;;  %s3912_s9 = inlined_call_operand.vmem [shape: f32[5,256], index: 9, kind: input, shape index: {}]   ;;  %s3913_s10 = inlined_call_operand.vmem [shape: f32[2,16,256], index: 10, kind: output, shape index: {}]  }
   0x1 LB: > { %s2872_s14 = sadd.s32 4294967295, %s2768_s13   ;;  %p2629_p0 = scmp.ge.s32.totalorder %s2768_s13, 1  ;;  %s2768_s13 = sphi %s2866_s13, %s20_s13  }
   0x2   : > { %p312_p1 = scmp.lt.s32.totalorder %s2768_s13, 3 }
   0x4   : > { %p313_p2 = pnand %p2629_p0, %p312_p1 }
   0x5   : > { %p350_p3 = scmp.lt.s32.totalorder (!%p313_p2), %s2872_s14, 1  ;;  %v2770_v0 = vmov (!%p313_p2), 0   ;;  %v368_v1 = vld [vmem:[%s3908_s5] sm:$0xf] (!%p313_p2)  ;;  %vm3953_vm0 = vcmask (!%p313_p2), 1041408   ;;  %vm3952_vm1 = vcmask (!%p313_p2), 31744  }
   0x6   : > { %316 = sbr.rel (%p313_p2) target bundleno = 1269 (0x4f5), region = 60  ;;  %417 = vmatprep.mubr.bf16.mxu0 (!%p313_p2), %v2770_v0  ;;  %2745 = vset.pattern.permute.xlu0 (!%p313_p2), %v2770_v0  ;;  %v367_v7 = vld [vmem:[%s3904_s1] sm:$0x3] (!%p313_p2)  ;;  %p2636_p4 = scmp.ne.s32.totalorder (!%p313_p2), %s2872_s14, 0 }
   0x7   : > { %371 = vperm.xlu0 (!%p313_p2), %2745, %v368_v1  }
   0xd   : > { %s351_s17 = scalar_select %p350_p3, %s2872_s14, 1 }
   0xe   : > { %v2771_v17 = vmov (!%p2636_p4), 0.0  }
   0xf   : > { %s2682_s18 = sshll.u32 %s351_s17, 3  ;;  %s2683_s19 = sshll.u32 %s351_s17, 5  ;;  %432 = vst [vmem:[#allocation2] sm:$0xff] (!%p2636_p4), %v2771_v17  ;;  %433 = vst [vmem:[#allocation2 + $0x8] sm:$0xff] (!%p2636_p4), %v2771_v17 }
  0x10   : > { %s354_s22 = scalar_lea.vmem %s3903_s0, %s2682_s18  ;;  %s2889_s25 = scalar_lea.vmem %s3913_s10, %s2683_s19 }
  0x11   : > { %v361_v2 = vld [vmem:[%s354_s22] sm:$0xff] }
  0x12   : > { %v363_v3 = vcombine.high %v361_v2, %v361_v2  ;;  %v365_v4 = vpack.c.bf16 %v361_v2, %v361_v2 }
  0x14   : > { %v2891_v5 = vpack.c.bf16 %v363_v3, %v363_v3  ;;  %v2894_v6 = vsel %vm3953_vm0, %v365_v4, 0 }
  0x16   : > { %2634 = vmatprep.subr.msk.bf16.mxu0 %vm3953_vm0, %v2891_v5 }
  0x17   : > { %386 = vmatpush1.bf16.msra.mxu0 %v2894_v6 }
  0x1a   : > { %2635 = vmatmul.mubr.msk.bf16.vlgmr.msra.gmra.mrb[0].mxu0 %vm3952_vm1, %v367_v7 }
  0x86   : > { %v372_v8 = vpop.permute.xlu0 %371 }
  0xeb   : > { %431 = sbr.rel (%p2636_p4) target bundleno = 242 (0xf2), region = 64 }
  0xed   : > { %v419_v9 = vpop.f32.mrb[0].mxu0 }
  0xee   : > { %v420_v10 = vadd.f32 %v419_v9, %v372_v8  ;;  %v421_v11 = vpop.f32.mrb[1].mxu0 }
  0xef   : > { %v422_v12 = vadd.f32 %v421_v11, %v372_v8  ;;  %v423_v13 = vpop.f32.mrb[2].mxu0 }
  0xf0   : > { %v426_v14 = vmax.f32 %v420_v10, 0.0  ;;  %v424_v15 = vpop.f32.mrb[3].mxu0 }
  0xf1   : > { %v427_v16 = vmax.f32 %v422_v12, 0.0 }
  0xf2 PF: > { %v443_v18 = vlaneseq  ;;  %2747 = vset.pattern.permute.xlu0 %v2770_v0  ;;  %2748 = vset.pattern.permute.xlu1 %v2770_v0  ;;  %v2638_v21 = vld [vmem:[%s3912_s9 + $0x3] ss:$8 sm:$0x3]  ;;  %v441_v22 = vld [vmem:[%s3912_s9] ss:$8 sm:$0x3] }
  0xf3   : > { %v436_v19 = vcombine.low %v426_v14, %v427_v16  ;;  %2482 = vmatprep.mubr.bf16.mxu0 %v2770_v0  ;;  %v2639_v23 = vld [vmem:[%s3912_s9 + $0x4] ss:$8 sm:$0x3]  ;;  %v2637_v26 = vld [vmem:[%s3912_s9 + $0x1] ss:$8 sm:$0x3] }
  0xf4   : > { %v444_v20 = vshrl.u32 %v443_v18, 7  ;;  %v2640_v31 = vld [vmem:[%s3912_s9 + $0x1] ss:$8 sm:$0x3]  ;;  %s2772_s21 = smov 49   ;;  %s2773_s22 = smov 46  }
  0xf5   : > { %438 = vst [vmem:[#allocation2 + $0x4] sm:$0xff] %v436_v19  ;;  %v616_v36 = vld [vmem:[%s3912_s9] ss:$8 sm:$0x3]  ;;  %s2774_s28 = smov 50   ;;  %s2775_s29 = smov 47  }
  0xf6   : > { %v2916_v24 = vsub.s32 0, %v444_v20  ;;  %v2918_v25 = vsub.s32 1, %v444_v20  ;;  %v785_v45 = vld [vmem:[%s3912_s9] ss:$8 sm:$0x3]  ;;  %s2776_s17 = smov 63  }
  0xf7   : > { %v2641_v46 = vld [vmem:[%s3912_s9 + $0x3] ss:$8 sm:$0x3]  ;;  %v2643_v53 = vld [vmem:[%s3912_s9 + $0x1] ss:$8 sm:$0x3] }
  0xf8   : > { %v543_v27 = vrot.slane %v2638_v21, %v2916_v24  ;;  %v547_v28 = vrot.slane %v2638_v21, %v2918_v25  ;;  %v446_v29 = vrot.slane %v441_v22, %v2916_v24  ;;  %v450_v30 = vrot.slane %v441_v22, %v2918_v25  ;;  %v2642_v54 = vld [vmem:[%s3912_s9 + $0x4] ss:$8 sm:$0x3]  ;;  %v2644_v55 = vld [vmem:[%s3912_s9 + $0x3] ss:$8 sm:$0x3] }
  0xf9   : > { %v583_v32 = vrot.slane %v2639_v23, %v2916_v24  ;;  %v587_v33 = vrot.slane %v2639_v23, %v2918_v25  ;;  %v485_v34 = vrot.slane %v2637_v26, %v2916_v24  ;;  %v489_v35 = vrot.slane %v2637_v26, %v2918_v25  ;;  %s3950_s18 = smov 62   ;;  %v2645_v62 = vld [vmem:[%s3912_s9 + $0x4] ss:$8 sm:$0x3]  ;;  %s2778_s30 = smov 78  }
  0xfa   : > { %v548_v37 = vcombine.low %v543_v27, %v547_v28  ;;  %v451_v38 = vcombine.low %v446_v29, %v450_v30  ;;  %v660_v40 = vrot.slane %v2640_v31, %v2916_v24  ;;  %v664_v41 = vrot.slane %v2640_v31, %v2918_v25  ;;  %v2646_v3 = vld [vmem:[%s3912_s9 + $0x1] ss:$8 sm:$0x3]  ;;  %v949_v4 = vld [vmem:[%s3912_s9] ss:$8 sm:$0x3] }
  0xfb   : > { %v588_v39 = vcombine.low %v583_v32, %v587_v33  ;;  %v490_v42 = vcombine.low %v485_v34, %v489_v35  ;;  %v621_v43 = vrot.slane %v616_v36, %v2916_v24  ;;  %v625_v44 = vrot.slane %v616_v36, %v2918_v25  ;;  %s2779_s11 = smov 65   ;;  %v2648_v10 = vld [vmem:[%s3912_s9 + $0x4] ss:$8 sm:$0x3]  ;;  %s2780_s26 = smov 79  }
  0xfc   : > { %549 = vrot.lane.b32.xlu1 %v548_v37, %s2772_s21  ;;  %452 = vrot.lane.b32.xlu0 %v451_v38, %s2773_s22  ;;  %v665_v47 = vcombine.low %v660_v40, %v664_v41  ;;  %v790_v48 = vrot.slane %v785_v45, %v2916_v24  ;;  %v794_v49 = vrot.slane %v785_v45, %v2918_v25  ;;  %v2647_v11 = vld [vmem:[%s3912_s9 + $0x3] ss:$8 sm:$0x3]  ;;  %v2649_v13 = vld [vmem:[%s3912_s9 + $0x1] ss:$8 sm:$0x3] }
  0xfd   : > { %v626_v50 = vcombine.low %v621_v43, %v625_v44  ;;  %v717_v51 = vrot.slane %v2641_v46, %v2916_v24  ;;  %v721_v52 = vrot.slane %v2641_v46, %v2918_v25  ;;  %v826_v57 = vrot.slane %v2643_v53, %v2916_v24  ;;  %v1122_v22 = vld [vmem:[%s3912_s9] ss:$8 sm:$0x3]  ;;  %s2781_s27 = smov 66   ;;  %s3914_s19 = smov 81  }
  0xfe   : > { %v795_v56 = vcombine.low %v790_v48, %v794_v49  ;;  %v830_v58 = vrot.slane %v2643_v53, %v2918_v25  ;;  %v753_v60 = vrot.slane %v2642_v54, %v2916_v24  ;;  %v757_v61 = vrot.slane %v2642_v54, %v2918_v25  ;;  %v3012_v28 = vld [vmem:[%s3912_s9 + $0x4] ss:$8 sm:$0x3]  ;;  %v3017_v29 = vld [vmem:[%s3912_s9 + $0x3] ss:$8 sm:$0x3] }
  0xff   : > { %v722_v59 = vcombine.low %v717_v51, %v721_v52  ;;  %v881_v63 = vrot.slane %v2644_v55, %v2916_v24  ;;  %v885_v1 = vrot.slane %v2644_v55, %v2918_v25  ;;  %v918_v2 = vrot.slane %v2645_v62, %v2916_v24  ;;  %v2661_v33 = vld [vmem:[%s3912_s9 + $0x1] ss:$8 sm:$0x3]  ;;  %v1779_v34 = vld [vmem:[%s3912_s9] ss:$8 sm:$0x3] }
 0x100   : > { %589 = vrot.lane.b32.xlu1 %v588_v39, %s2774_s28  ;;  %491 = vrot.lane.b32.xlu0 %v490_v42, %s2775_s29  ;;  %v831_v7 = vcombine.low %v826_v57, %v830_v58  ;;  %v758_v8 = vcombine.low %v753_v60, %v757_v61  ;;  %v922_v9 = vrot.slane %v2645_v62, %v2918_v25  ;;  %v2663_v39 = vld [vmem:[%s3912_s9 + $0x4] ss:$8 sm:$0x3]  ;;  %v2662_v40 = vld [vmem:[%s3912_s9 + $0x3] ss:$8 sm:$0x3] }
 0x101   : > { %v886_v12 = vcombine.low %v881_v63, %v885_v1  ;;  %v993_v14 = vrot.slane %v2646_v3, %v2916_v24  ;;  %v997_v15 = vrot.slane %v2646_v3, %v2918_v25  ;;  %v954_v16 = vrot.slane %v949_v4, %v2916_v24  ;;  %s3916_s20 = smov 82   ;;  %v1942_v44 = vld [vmem:[%s3912_s9] ss:$8 sm:$0x3]  ;;  %s3920_s15 = smov 95  }
 0x102   : > { %v958_v17 = vrot.slane %v949_v4, %v2918_v25  ;;  %v1088_v18 = vrot.slane %v2648_v10, %v2916_v24  ;;  %v1092_v19 = vrot.slane %v2648_v10, %v2918_v25  ;;  %v1050_v20 = vrot.slane %v2647_v11, %v2916_v24  ;;  %v2664_v49 = vld [vmem:[%s3912_s9 + $0x1] ss:$8 sm:$0x3]  ;;  %v2665_v55 = vld [vmem:[%s3912_s9 + $0x3] ss:$8 sm:$0x3] }
 0x103   : > { %v1054_v21 = vrot.slane %v2647_v11, %v2918_v25  ;;  %v923_v23 = vcombine.low %v918_v2, %v922_v9  ;;  %v1165_v26 = vrot.slane %v2649_v13, %v2916_v24  ;;  %v1169_v27 = vrot.slane %v2649_v13, %v2918_v25  ;;  %v2666_v61 = vld [vmem:[%s3912_s9 + $0x4] ss:$8 sm:$0x3]  ;;  %s3918_s16 = smov 94   ;;  %s3928_s12 = smov 111  }
 0x104   : > { %666 = vrot.lane.b32.xlu0 %v665_v47, %s2776_s17  ;;  %627 = vrot.lane.b32.xlu1 %v626_v50, %s3950_s18  ;;  %v998_v30 = vcombine.low %v993_v14, %v997_v15  ;;  %v1127_v31 = vrot.slane %v1122_v22, %v2916_v24  ;;  %v1131_v32 = vrot.slane %v1122_v22, %v2918_v25  ;;  %v2106_v50 = vld [vmem:[%s3912_s9] ss:$8 sm:$0x3]  ;;  %v2669_v2 = vld [vmem:[%s3912_s9 + $0x4] ss:$8 sm:$0x3] }
 0x105   : > { %v959_v35 = vcombine.low %v954_v16, %v958_v17  ;;  %v1093_v36 = vcombine.low %v1088_v18, %v1092_v19  ;;  %v1055_v37 = vcombine.low %v1050_v20, %v1054_v21  ;;  %v1261_v38 = vrot.slane %v3012_v28, %v2916_v24  ;;  %v2668_v3 = vld [vmem:[%s3912_s9 + $0x3] ss:$8 sm:$0x3]  ;;  %v1294_v14 = vld [vmem:[%s3912_s9] ss:$8 sm:$0x3] }
 0x106   : > { %v1170_v41 = vcombine.low %v1165_v26, %v1169_v27  ;;  %v1265_v42 = vrot.slane %v3012_v28, %v2918_v25  ;;  %v1222_v43 = vrot.slane %v3017_v29, %v2916_v24  ;;  %v1226_v45 = vrot.slane %v3017_v29, %v2918_v25  ;;  %v2652_v19 = vld [vmem:[%s3912_s9 + $0x1] ss:$8 sm:$0x3]  ;;  %s3926_s14 = smov 110   ;;  %s2800_s23 = smov 31  }
 0x107   : > { %v1820_v46 = vrot.slane %v2661_v33, %v2916_v24  ;;  %v1824_v47 = vrot.slane %v2661_v33, %v2918_v25  ;;  %v1784_v48 = vrot.slane %v1779_v34, %v2916_v24  ;;  %v1132_v51 = vcombine.low %v1127_v31, %v1131_v32  ;;  %v1450_v28 = vld [vmem:[%s3912_s9] ss:$8 sm:$0x3]  ;;  %s2801_s24 = smov 30  }
 0x108   : > { %796 = vrot.lane.b32.xlu1 %v795_v56, %s2778_s30  ;;  %723 = vrot.lane.b32.xlu0 %v722_v59, %s2779_s11  ;;  %v1788_v52 = vrot.slane %v1779_v34, %v2918_v25  ;;  %v1911_v53 = vrot.slane %v2663_v39, %v2916_v24  ;;  %v1915_v54 = vrot.slane %v2663_v39, %v2918_v25  ;;  %v2667_v56 = vld [vmem:[%s3912_s9 + $0x1] ss:$8 sm:$0x3]  ;;  %vm494_vm2 = vcmask 384000  }
 0x109   : > { %v3064_v57 = vcombine.low %v1820_v46, %v1824_v47  ;;  %v1874_v58 = vrot.slane %v2662_v40, %v2916_v24  ;;  %v1878_v59 = vrot.slane %v2662_v40, %v2918_v25  ;;  %v1947_v60 = vrot.slane %v1942_v44, %v2916_v24  ;;  %v2655_v47 = vld [vmem:[%s3912_s9 + $0x1] ss:$8 sm:$0x3] }
 0x10a   : > { %v3074_v62 = vcombine.low %v1784_v48, %v1788_v52  ;;  %v3076_v63 = vcombine.low %v1911_v53, %v1915_v54  ;;  %v1951_v1 = vrot.slane %v1942_v44, %v2918_v25  ;;  %v2111_v9 = vrot.slane %v2106_v50, %v2916_v24  ;;  %v2654_v48 = vld [vmem:[%s3912_s9 + $0x4] ss:$8 sm:$0x3] }
 0x10b   : > { %v3085_v4 = vcombine.low %v1874_v58, %v1878_v59  ;;  %v2115_v11 = vrot.slane %v2106_v50, %v2918_v25  ;;  %v2042_v13 = vrot.slane %v2665_v55, %v2918_v25  ;;  %v2147_v16 = vrot.slane %v2667_v56, %v2916_v24 }
 0x10c   : > { %832 = vrot.lane.b32.xlu1 %v831_v7, %s2780_s26  ;;  %759 = vrot.lane.b32.xlu0 %v758_v8, %s2781_s27  ;;  %v1984_v7 = vrot.slane %v2664_v49, %v2916_v24  ;;  %v1988_v8 = vrot.slane %v2664_v49, %v2918_v25  ;;  %v3090_v10 = vcombine.low %v1947_v60, %v1951_v1  ;;  %vm552_vm3 = vcmask 400384  }
 0x10d   : > { %v2151_v17 = vrot.slane %v2667_v56, %v2918_v25  ;;  %v2074_v18 = vrot.slane %v2666_v61, %v2916_v24  ;;  %v3108_v20 = vcombine.low %v2111_v9, %v2115_v11  ;;  %v2078_v22 = vrot.slane %v2666_v61, %v2918_v25  ;;  %v2657_v56 = vld [vmem:[%s3912_s9 + $0x4] ss:$8 sm:$0x3] }
 0x10e   : > { %v3098_v15 = vcombine.low %v1984_v7, %v1988_v8  ;;  %v2238_v26 = vrot.slane %v2669_v2, %v2916_v24  ;;  %v2242_v27 = vrot.slane %v2669_v2, %v2918_v25  ;;  %v1299_v31 = vrot.slane %v1294_v14, %v2916_v24  ;;  %v1614_v7 = vld [vmem:[%s3912_s9] ss:$8 sm:$0x3] }
 0x10f   : > { %v3119_v32 = vcombine.low %v2074_v18, %v2078_v22  ;;  %v2205_v33 = vrot.slane %v2668_v3, %v2918_v25  ;;  %v1266_v34 = vcombine.low %v1261_v38, %v1265_v42  ;;  %v1227_v39 = vcombine.low %v1222_v43, %v1226_v45  ;;  %v2653_v42 = vld [vmem:[%s3912_s9 + $0x3] ss:$8 sm:$0x3] }
 0x110   : > { %887 = vrot.lane.b32.xlu1 %v886_v12, %s3914_s19  ;;  %924 = vrot.lane.b32.xlu0 %v923_v23, %s3916_s20  ;;  %v2038_v12 = vrot.slane %v2665_v55, %v2916_v24  ;;  %s3924_s19 = smov 98   ;;  %s3922_s20 = smov 97   ;;  %v3113_v23 = vcombine.low %v2147_v16, %v2151_v17  ;;  %v1342_v40 = vrot.slane %v2652_v19, %v2918_v25  ;;  %v2656_v55 = vld [vmem:[%s3912_s9 + $0x3] ss:$8 sm:$0x3]  ;;  %vm455_vm4 = vcmask 375808  }
 0x111   : > { %v1455_v44 = vrot.slane %v1450_v28, %v2916_v24  ;;  %v1459_v46 = vrot.slane %v1450_v28, %v2918_v25  ;;  %v1382_v43 = vrot.slane %v2653_v42, %v2916_v24  ;;  %v1386_v45 = vrot.slane %v2653_v42, %v2918_v25  ;;  %v2660_v16 = vld [vmem:[%s3912_s9 + $0x4] ss:$8 sm:$0x3]  ;;  %v2659_v17 = vld [vmem:[%s3912_s9 + $0x3] ss:$8 sm:$0x3] }
 0x112   : > { %v3110_v21 = vcombine.low %v2038_v12, %v2042_v13  ;;  %v1491_v50 = vrot.slane %v2655_v47, %v2916_v24  ;;  %v1418_v53 = vrot.slane %v2654_v48, %v2916_v24  ;;  %v1422_v54 = vrot.slane %v2654_v48, %v2918_v25  ;;  %v654_v42 = vld [vmem:[#allocation2 + $0x8] sm:$0xf] }
 0x113   : > { %v1460_v49 = vcombine.low %v1455_v44, %v1459_v46  ;;  %v1387_v52 = vcombine.low %v1382_v43, %v1386_v45  ;;  %v1546_v59 = vrot.slane %v2656_v55, %v2916_v24  ;;  %v1550_v60 = vrot.slane %v2656_v55, %v2918_v25  ;;  %v478_v44 = vld [vmem:[#allocation2 + $0x8] sm:$0xf] }
 0x114   : > { %999 = vrot.lane.b32.xlu1 %v998_v30, %s3920_s15  ;;  %960 = vrot.lane.b32.xlu0 %v959_v35, %s3918_s16  ;;  %v2201_v30 = vrot.slane %v2668_v3, %v2916_v24  ;;  %v1303_v35 = vrot.slane %v1294_v14, %v2918_v25  ;;  %v1423_v61 = vcombine.low %v1418_v53, %v1422_v54  ;;  %v2658_v3 = vld [vmem:[%s3912_s9 + $0x1] ss:$8 sm:$0x3]  ;;  %s2802_s15 = smov 34   ;;  %s2803_s16 = smov 33   ;;  %vm630_vm5 = vcmask 506880  }
 0x115   : > { %v1583_v1 = vrot.slane %v2657_v56, %v2916_v24  ;;  %v1587_v2 = vrot.slane %v2657_v56, %v2918_v25  ;;  %v1551_v8 = vcombine.low %v1546_v59, %v1550_v60  ;;  %v1656_v9 = vrot.slane %v2658_v3, %v2916_v24  ;;  %v536_v48 = vld [vmem:[#allocation2 + $0x8] sm:$0xf] }
 0x116   : > { %v3138_v38 = vcombine.low %v2201_v30, %v2205_v33  ;;  %v1660_v11 = vrot.slane %v2658_v3, %v2918_v25  ;;  %v1619_v13 = vrot.slane %v1614_v7, %v2916_v24  ;;  %v1623_v14 = vrot.slane %v1614_v7, %v2918_v25  ;;  %v615_v56 = vld [vmem:[#allocation2 + $0x8] sm:$0xf] }
 0x117   : > { %v1588_v12 = vcombine.low %v1583_v1, %v1587_v2  ;;  %v1747_v18 = vrot.slane %v2660_v16, %v2916_v24  ;;  %v1711_v22 = vrot.slane %v2659_v17, %v2916_v24  ;;  %v1715_v30 = vrot.slane %v2659_v17, %v2918_v25 }
 0x118   : > { %1094 = vrot.lane.b32.xlu1 %v1093_v36, %s3924_s19  ;;  %1056 = vrot.lane.b32.xlu0 %v1055_v37, %s3922_s20  ;;  %v1338_v36 = vrot.slane %v2652_v19, %v2916_v24  ;;  %v3127_v37 = vcombine.low %v2238_v26, %v2242_v27  ;;  %s3932_s20 = smov 114   ;;  %s3930_s19 = smov 113   ;;  %v1751_v19 = vrot.slane %v2660_v16, %v2918_v25  ;;  %v3221_v24 = vld [vmem:[#allocation2] sm:$0xff]  ;;  %vm592_vm6 = vcmask 408576  }
 0x119   : > { %v1661_v26 = vcombine.low %v1656_v9, %v1660_v11  ;;  %v1624_v27 = vcombine.low %v1619_v13, %v1623_v14  ;;  %v1716_v33 = vcombine.low %v1711_v22, %v1715_v30  ;;  %vm669_vm7 = vcmask 515072  }
 0x11a   : > { %v1343_v29 = vcombine.low %v1338_v36, %v1342_v40  ;;  %vm3972_vm8 = vcmask 531456   ;;  %vm3970_vm9 = vcmask 637952   ;;  %vm3969_vm10 = vcmask 539648  }
 0x11b   : > { %vm3967_vm11 = vcmask 646144   ;;  %vm3963_vm12 = vcmask 662528   ;;  %vm3965_vm13 = vcmask 670720   ;;  %vm3954_vm14 = vcmask 769024  }
 0x11c   : > { %1171 = vrot.lane.b32.xlu1 %v1170_v41, %s3928_s12  ;;  %1133 = vrot.lane.b32.xlu0 %v1132_v51, %s3926_s14  ;;  %v1304_v41 = vcombine.low %v1299_v31, %v1303_v35  ;;  %v1495_v51 = vrot.slane %v2655_v47, %v2918_v25  ;;  %s3934_s14 = smov 126   ;;  %s3936_s12 = smov 127   ;;  %v1752_v31 = vcombine.low %v1747_v18, %v1751_v19  ;;  %vm3955_vm15 = vcmask 777216  }
 0x11d   : > { %v3229_v25 = vcombine.high %v3221_v24, %v3221_v24  ;;  %vm3957_vm1 = vcmask 654336   ;;  %vm3958_vm0 = vcmask 793600  }
 0x11e   : > { %v1496_v58 = vcombine.low %v1491_v50, %v1495_v51 }
 0x120   : > { %1267 = vrot.lane.b32.xlu1 %v1266_v34, %s3932_s20  ;;  %1228 = vrot.lane.b32.xlu0 %v1227_v39, %s3930_s19  ;;  %s3942_s19 = smov 14   ;;  %s3938_s20 = smov 1   ;;  %v576_v34 = vld [vmem:[#allocation2 + $0x8] sm:$0xf] }
 0x124   : > { %1305 = vrot.lane.b32.xlu1 %v1304_v41, %s3934_s14  ;;  %1344 = vrot.lane.b32.xlu0 %v1343_v29, %s3936_s12  ;;  %s3944_s14 = smov 15   ;;  %s3940_s12 = smov 2  }
 0x128   : > { %1461 = vrot.lane.b32.xlu1 %v1460_v49, %s3942_s19  ;;  %1388 = vrot.lane.b32.xlu0 %v1387_v52, %s3938_s20  ;;  %s3946_s20 = smov 17   ;;  %s3974_s19 = smov 82  }
 0x12c   : > { %1497 = vrot.lane.b32.xlu1 %v1496_v58, %s3944_s14  ;;  %1424 = vrot.lane.b32.xlu0 %v1423_v61, %s3940_s12  ;;  %s3948_s12 = smov 18   ;;  %s3975_s14 = smov 81  }
 0x130   : > { %1552 = vrot.lane.b32.xlu1 %v1551_v8, %s3946_s20  ;;  %1589 = vrot.lane.b32.xlu0 %v1588_v12, %s3948_s12  ;;  %s2804_s20 = smov 80   ;;  %s2805_s12 = smov 64  }
 0x134   : > { %1662 = vrot.lane.b32.xlu1 %v1661_v26, %s2800_s23  ;;  %1625 = vrot.lane.b32.xlu0 %v1624_v27, %s2801_s24 }
 0x138   : > { %1753 = vrot.lane.b32.xlu1 %v1752_v31, %s2802_s15  ;;  %1717 = vrot.lane.b32.xlu0 %v1716_v33, %s2803_s16 }
 0x13c   : > { %1826 = vrot.lane.b32.xlu1 %v3064_v57, %s2775_s29  ;;  %1790 = vrot.lane.b32.xlu0 %v3074_v62, %s2773_s22  ;;  %v518_v57 = vld [vmem:[#allocation2 + $0x8] sm:$0xf] }
 0x13d   : > { %v2750_v62 = vld [vmem:[#allocation2 + $0x8] ss:$0 sps:$4 sm:$0xff]  }
 0x140   : > { %1917 = vrot.lane.b32.xlu1 %v3076_v63, %s2774_s28  ;;  %1880 = vrot.lane.b32.xlu0 %v3085_v4, %s2772_s21  ;;  %v3239_v63 = vcombine.low %v3221_v24, %v3221_v24 }
 0x144   : > { %1953 = vrot.lane.b32.xlu1 %v3090_v10, %s3950_s18  ;;  %1990 = vrot.lane.b32.xlu0 %v3098_v15, %s2776_s17  ;;  %v440_v15 = vld [vmem:[#allocation2 + $0x8] sm:$0xf] }
 0x148   : > { %2117 = vrot.lane.b32.xlu1 %v3108_v20, %s2778_s30  ;;  %2044 = vrot.lane.b32.xlu0 %v3110_v21, %s2779_s11 }
 0x14c   : > { %2153 = vrot.lane.b32.xlu1 %v3113_v23, %s2780_s26  ;;  %2080 = vrot.lane.b32.xlu0 %v3119_v32, %s2781_s27 }
 0x150   : > { %2244 = vrot.lane.b32.xlu1 %v3127_v37, %s3974_s19  ;;  %2207 = vrot.lane.b32.xlu0 %v3138_v38, %s3975_s14 }
 0x154   : > { %526 = vrot.lane.b32.xlu1 %v518_v57, %s2804_s20  ;;  %524 = vrot.lane.b32.xlu0 %v3229_v25, %s2804_s20  ;;  %v711_v57 = vld [vmem:[#allocation2 + $0x8] sm:$0xf] }
 0x158   : > { %701 = vrot.lane.b32.xlu1 %v2750_v62, %s2805_s12  ;;  %522 = vrot.lane.b32.xlu0 %v3221_v24, %s2804_s20  ;;  %v747_v62 = vld [vmem:[#allocation2 + $0x8] sm:$0xf] }
 0x15c   : > { %697 = vrot.lane.b32.xlu1 %v3239_v63, %s2805_s12  ;;  %699 = vrot.lane.b32.xlu0 %v3221_v24, %s2805_s12 }
 0x16e   : > { %v550_v4 = vpop.permute.xlu1 %549  ;;  %v453_v10 = vpop.permute.xlu0 %452 }
 0x16f   : > { %v454_v20 = vrot.slane %v453_v10, 4  ;;  %v551_v35 = vrot.slane %v550_v4, 4 }
 0x171   : > { %v460_v21 = vmul.f32 %v454_v20, %v440_v15  ;;  %v553_v46 = vsel %vm552_vm3, %v551_v35, %v550_v4  ;;  %v456_v51 = vsel %vm455_vm4, %v454_v20, %v453_v10  ;;  %v557_v54 = vmul.f32 %v551_v35, %v536_v48 }
 0x172   : > { %v590_v23 = vpop.permute.xlu1 %589  ;;  %v492_v32 = vpop.permute.xlu0 %491  ;;  %v556_v47 = vmul.f32 %v553_v46, %v3221_v24  ;;  %v459_v55 = vmul.f32 %v3221_v24, %v456_v51 }
 0x173   : > { %v591_v36 = vrot.slane %v590_v23, 4  ;;  %v493_v37 = vrot.slane %v492_v32, 4  ;;  %468 = vrot.lane.b32.xlu1 %v460_v21, %s3974_s19  ;;  %v561_v61 = vcombine.low %v557_v54, %v557_v54 }
 0x174   : > { %v560_v22 = vcombine.low %v556_v47, %v556_v47  ;;  %v463_v26 = vcombine.high %v459_v55, %v459_v55 }
 0x175   : > { %v495_v39 = vsel %vm494_vm2, %v493_v37, %v492_v32  ;;  %v597_v40 = vmul.f32 %v591_v36, %v576_v34  ;;  %v499_v45 = vmul.f32 %v493_v37, %v478_v44  ;;  %v593_v8 = vsel %vm592_vm6, %v591_v36, %v590_v23 }
 0x176   : > { %v667_v28 = vpop.permute.xlu0 %666  ;;  %v498_v38 = vmul.f32 %v3221_v24, %v495_v39  ;;  %v628_v41 = vpop.permute.xlu1 %627  ;;  %v596_v11 = vmul.f32 %v593_v8, %v3221_v24  ;;  %v875_v8 = vld [vmem:[#allocation2 + $0x8] sm:$0xf] }
 0x177   : > { %v668_v29 = vrot.slane %v667_v28, 4  ;;  %605 = vrot.lane.b32.xlu1 %v597_v40, %s2778_s30  ;;  %v629_v52 = vrot.slane %v628_v41, 4  ;;  %v503_v53 = vcombine.low %v499_v45, %v499_v45  ;;  %v3321_v45 = vld [vmem:[#allocation2 + $0x4] sm:$0xff] }
 0x178   : > { %506 = vrot.lane.b32.xlu0 %v498_v38, %s3975_s14  ;;  %v502_v16 = vcombine.low %v498_v38, %v498_v38  ;;  %v600_v10 = vcombine.high %v596_v11, %v596_v11  ;;  %v784_v38 = vld [vmem:[#allocation2 + $0x8] sm:$0xf]  ;;  %1374 = vst [vmem:[#allocation3 + $0xd8] sm:$0xf0] %v3321_v45 }
 0x179   : > { %v674_v43 = vmul.f32 %v668_v29, %v654_v42  ;;  %v631_v60 = vsel %vm630_vm5, %v629_v52, %v628_v41  ;;  %v635_v1 = vmul.f32 %v629_v52, %v615_v56  ;;  %v670_v14 = vsel %vm669_vm7, %v668_v29, %v667_v28  ;;  %v820_v42 = vld [vmem:[#allocation2 + $0x8] sm:$0xf] }
 0x17a   : > { %v3252_v49 = vpop.permute.xlu1 %796  ;;  %v724_v50 = vpop.permute.xlu0 %723  ;;  %v634_v2 = vmul.f32 %v631_v60, %v3221_v24  ;;  %v673_v17 = vmul.f32 %v670_v14, %v3221_v24 }
 0x17b   : > { %682 = vrot.lane.b32.xlu1 %v674_v43, %s2779_s11  ;;  %v639_v9 = vcombine.low %v635_v1, %v635_v1  ;;  %v725_v31 = vrot.slane %v724_v50, 4  ;;  %v798_v39 = vrot.slane %v3252_v49, 4 }
 0x17c   : > { %564 = vrot.lane.b32.xlu0 %v556_v47, %s2780_s26  ;;  %v638_v4 = vcombine.low %v634_v2, %v634_v2  ;;  %v677_v35 = vcombine.high %v673_v17, %v673_v17 }
 0x17d   : > { %v726_v21 = vsel %vm3972_vm8, %v725_v31, %v724_v50  ;;  %v730_v23 = vmul.f32 %v725_v31, %v711_v57  ;;  %v799_v46 = vsel %vm3970_vm9, %v798_v39, %v3252_v49  ;;  %v803_v47 = vmul.f32 %v798_v39, %v784_v38  ;;  %v912_v57 = vld [vmem:[#allocation2 + $0x8] sm:$0xf] }
 0x17e   : > { %v3258_v58 = vpop.permute.xlu1 %832  ;;  %v3260_v59 = vpop.permute.xlu0 %759  ;;  %v729_v34 = vmul.f32 %v726_v21, %v3221_v24  ;;  %v802_v50 = vmul.f32 %v799_v46, %v3221_v24 }
 0x17f   : > { %508 = vrot.lane.b32.xlu1 %v503_v53, %s3975_s14  ;;  %v761_v33 = vrot.slane %v3260_v59, 4  ;;  %v834_v29 = vrot.slane %v3258_v58, 4 }
 0x180   : > { %464 = vrot.lane.b32.xlu0 %v459_v55, %s3974_s19  ;;  %v733_v28 = vcombine.high %v729_v34, %v729_v34  ;;  %v806_v55 = vcombine.high %v802_v50, %v802_v50 }
 0x181   : > { %v766_v32 = vmul.f32 %v761_v33, %v747_v62  ;;  %v762_v43 = vsel %vm3969_vm10, %v761_v33, %v3260_v59  ;;  %v839_v48 = vmul.f32 %v834_v29, %v820_v42  ;;  %v835_v54 = vsel %vm3967_vm11, %v834_v29, %v3258_v58  ;;  %v948_v62 = vld [vmem:[#allocation2 + $0x8] sm:$0xf] }
 0x182   : > { %v3266_v3 = vpop.permute.xlu1 %887  ;;  %v3268_v7 = vpop.permute.xlu0 %924  ;;  %v765_v51 = vmul.f32 %v762_v43, %v3221_v24  ;;  %v3391_v43 = vcombine.low %v3321_v45, %v3321_v45 }
 0x183   : > { %566 = vrot.lane.b32.xlu1 %v561_v61, %s2780_s26  ;;  %v770_v40 = vcombine.low %v766_v32, %v766_v32  ;;  %v843_v53 = vcombine.low %v839_v48, %v839_v48  ;;  %v838_v61 = vmul.f32 %v835_v54, %v3221_v24  ;;  %v889_v14 = vrot.slane %v3266_v3, 4  ;;  %v987_v54 = vld [vmem:[#allocation2 + $0x8] sm:$0xf] }
 0x184   : > { %642 = vrot.lane.b32.xlu0 %v634_v2, %s2781_s27  ;;  %v769_v60 = vcombine.low %v765_v51, %v765_v51  ;;  %v926_v31 = vrot.slane %v3268_v7, 4  ;;  %1373 = vst [vmem:[#allocation3 + $0xd0] sm:$0xf0] %v3391_v43 }
 0x185   : > { %v842_v58 = vcombine.low %v838_v61, %v838_v61  ;;  %v890_v21 = vsel %vm3963_vm12, %v889_v14, %v3266_v3 }
 0x186   : > { %v3274_v12 = vpop.permute.xlu1 %999  ;;  %v3276_v13 = vpop.permute.xlu0 %960 }
 0x187   : > { %644 = vrot.lane.b32.xlu1 %v639_v9, %s2781_s27  ;;  %v962_v32 = vrot.slane %v3276_v13, 4 }
 0x188   : > { %601 = vrot.lane.b32.xlu0 %v596_v11, %s2778_s30 }
 0x18a   : > { %v3282_v18 = vpop.permute.xlu1 %1094  ;;  %v3284_v19 = vpop.permute.xlu0 %1056 }
 0x18b   : > { %504 = vrot.lane.b32.xlu1 %v502_v16, %s3975_s14  ;;  %v857_v16 = vld [vmem:[#allocation2 + $0x8] sm:$0xf] }
 0x18c   : > { %678 = vrot.lane.b32.xlu0 %v673_v17, %s2779_s11  ;;  %v894_v17 = vmul.f32 %v889_v14, %v875_v8 }
 0x18e   : > { %v3288_v27 = vpop.permute.xlu1 %1171  ;;  %v3290_v30 = vpop.permute.xlu0 %1133  ;;  %v898_v33 = vcombine.low %v894_v17, %v894_v17  ;;  %v1058_v17 = vrot.slane %v3284_v19, 4 }
 0x18f   : > { %562 = vrot.lane.b32.xlu1 %v560_v22, %s2780_s26 }
 0x190   : > { %466 = vrot.lane.b32.xlu0 %v463_v26, %s3974_s19 }
 0x192   : > { %v3295_v15 = vpop.permute.xlu1 %1267  ;;  %v3297_v20 = vpop.permute.xlu0 %1228 }
 0x193   : > { %640 = vrot.lane.b32.xlu1 %v638_v4, %s2781_s27 }
 0x194   : > { %603 = vrot.lane.b32.xlu0 %v600_v10, %s2778_s30 }
 0x196   : > { %v3303_v36 = vpop.permute.xlu1 %1305  ;;  %v3305_v37 = vpop.permute.xlu0 %1344 }
 0x197   : > { %738 = vrot.lane.b32.xlu1 %v730_v23, %s2776_s17  ;;  %v927_v23 = vsel %vm3965_vm13, %v926_v31, %v3268_v7  ;;  %v964_v7 = vsel %vm3954_vm14, %v962_v32, %v3276_v13  ;;  %v1001_v13 = vrot.slane %v3274_v12, 4  ;;  %vm3956_vm14 = vcmask 523264  }
 0x198   : > { %680 = vrot.lane.b32.xlu0 %v677_v35, %s2779_s11  ;;  %v968_v35 = vmul.f32 %v962_v32, %v948_v62  ;;  %v930_v39 = vmul.f32 %v927_v23, %v3221_v24  ;;  %v967_v48 = vmul.f32 %v964_v7, %v3221_v24  ;;  %v1044_v62 = vld [vmem:[#allocation2 + $0x8] sm:$0xf]  ;;  %v1096_v32 = vrot.slane %v3282_v18, 4 }
 0x19a   : > { %v3310_v41 = vpop.permute.xlu1 %1461  ;;  %v3312_v44 = vpop.permute.xlu0 %1388  ;;  %v972_v3 = vcombine.low %v968_v35, %v968_v35  ;;  %v934_v42 = vcombine.high %v930_v39, %v930_v39 }
 0x19b   : > { %775 = vrot.lane.b32.xlu1 %v770_v40, %s3950_s18  ;;  %v893_v40 = vmul.f32 %v890_v21, %v3221_v24 }
 0x19c   : > { %736 = vrot.lane.b32.xlu0 %v733_v28, %s2776_s17 }
 0x19e   : > { %v3326_v49 = vpop.permute.xlu1 %1497  ;;  %v3328_v52 = vpop.permute.xlu0 %1424 }
 0x19f   : > { %811 = vrot.lane.b32.xlu1 %v803_v47, %s2774_s28  ;;  %v897_v47 = vcombine.low %v893_v40, %v893_v40 }
 0x1a0   : > { %773 = vrot.lane.b32.xlu0 %v765_v51, %s3950_s18 }
 0x1a2   : > { %v3334_v56 = vpop.permute.xlu1 %1552  ;;  %v3336_v59 = vpop.permute.xlu0 %1589 }
 0x1a3   : > { %848 = vrot.lane.b32.xlu1 %v843_v53, %s2772_s21  ;;  %v971_v53 = vcombine.low %v967_v48, %v967_v48 }
 0x1a4   : > { %809 = vrot.lane.b32.xlu0 %v806_v55, %s2774_s28 }
 0x1a6   : > { %v3341_v1 = vpop.permute.xlu1 %1662  ;;  %v3343_v2 = vpop.permute.xlu0 %1625 }
 0x1a7   : > { %771 = vrot.lane.b32.xlu1 %v769_v60, %s3950_s18  ;;  %s2806_s18 = smov 48  }
 0x1a8   : > { %846 = vrot.lane.b32.xlu0 %v838_v61, %s2772_s21  ;;  %v1003_v61 = vsel %vm3955_vm15, %v1001_v13, %v3274_v12  ;;  %v1082_v12 = vld [vmem:[#allocation2 + $0x8] sm:$0xf]  ;;  %vm3959_vm15 = vcmask 801792  }
 0x1a9   : > { %v1006_v8 = vmul.f32 %v1003_v61, %v3221_v24  ;;  %v1135_v61 = vrot.slane %v3290_v30, 4 }
 0x1aa   : > { %v3347_v9 = vpop.permute.xlu1 %1753  ;;  %v3349_v11 = vpop.permute.xlu0 %1717 }
 0x1ab   : > { %844 = vrot.lane.b32.xlu1 %v842_v58, %s2772_s21  ;;  %v1007_v58 = vmul.f32 %v1001_v13, %v987_v54  ;;  %v1098_v13 = vsel %vm3959_vm15, %v1096_v32, %v3282_v18  ;;  %vm3964_vm15 = vcmask 932864  }
 0x1ac   : > { %734 = vrot.lane.b32.xlu0 %v729_v34, %s2776_s17  ;;  %v931_v34 = vmul.f32 %v926_v31, %v912_v57  ;;  %v2752_v31 = vld [vmem:[#allocation2 + $0x8] ss:$0 sps:$4 sm:$0xff]   ;;  %v1010_v57 = vcombine.high %v1006_v8, %v1006_v8  ;;  %v1101_v54 = vmul.f32 %v1098_v13, %v3221_v24 }
 0x1ad   : > { %v1255_v13 = vld [vmem:[#allocation2 + $0x8] sm:$0xf] }
 0x1ae   : > { %v3354_v22 = vpop.permute.xlu1 %1826  ;;  %v3356_v26 = vpop.permute.xlu0 %1790 }
 0x1af   : > { %865 = vrot.lane.b32.xlu1 %v857_v16, %s2806_s18 }
 0x1b0   : > { %807 = vrot.lane.b32.xlu0 %v802_v50, %s2774_s28 }
 0x1b2   : > { %v3361_v4 = vpop.permute.xlu1 %1917  ;;  %v3363_v10 = vpop.permute.xlu0 %1880 }
 0x1b3   : > { %903 = vrot.lane.b32.xlu1 %v898_v33, %s2775_s29 }
 0x1b4   : > { %863 = vrot.lane.b32.xlu0 %v3229_v25, %s2806_s18 }
 0x1b6   : > { %v3375_v28 = vpop.permute.xlu1 %1953  ;;  %v3377_v38 = vpop.permute.xlu0 %1990 }
 0x1b7   : > { %939 = vrot.lane.b32.xlu1 %v931_v34, %s2773_s22  ;;  %v1060_v34 = vsel %vm3958_vm0, %v1058_v17, %v3284_v19  ;;  %vm3962_vm0 = vcmask 924672  }
 0x1b8   : > { %901 = vrot.lane.b32.xlu0 %v893_v40, %s2775_s29  ;;  %v1064_v40 = vmul.f32 %v1058_v17, %v1044_v62  ;;  %v1173_v17 = vrot.slane %v3288_v27, 4  ;;  %v1216_v62 = vld [vmem:[#allocation2 + $0x8] sm:$0xf] }
 0x1ba   : > { %v3383_v46 = vpop.permute.xlu1 %2117  ;;  %v3385_v29 = vpop.permute.xlu0 %2044 }
 0x1bb   : > { %977 = vrot.lane.b32.xlu1 %v972_v3, %s2802_s15  ;;  %v1063_v3 = vmul.f32 %v1060_v34, %v3221_v24 }
 0x1bc   : > { %937 = vrot.lane.b32.xlu0 %v934_v42, %s2773_s22 }
 0x1be   : > { %v3394_v50 = vpop.permute.xlu1 %2153  ;;  %v3396_v51 = vpop.permute.xlu0 %2080 }
 0x1bf   : > { %899 = vrot.lane.b32.xlu1 %v897_v47, %s2775_s29 }
 0x1c0   : > { %975 = vrot.lane.b32.xlu0 %v967_v48, %s2802_s15 }
 0x1c2   : > { %v3402_v55 = vpop.permute.xlu1 %2244  ;;  %v3404_v60 = vpop.permute.xlu0 %2207 }
 0x1c3   : > { %973 = vrot.lane.b32.xlu1 %v971_v53, %s2802_s15  ;;  %s2807_s15 = smov 32   ;;  %v1067_v53 = vcombine.high %v1063_v3, %v1063_v3 }
 0x1c4   : > { %861 = vrot.lane.b32.xlu0 %v3221_v24, %s2806_s18 }
 0x1c6   : > { %v527_v14 = vpop.permute.xlu1 %526  ;;  %v525_v16 = vpop.permute.xlu0 %524 }
 0x1c7   : > { %1015 = vrot.lane.b32.xlu1 %v1007_v58, %s2803_s16  ;;  %v530_v33 = vsel %vm3957_vm1, %v525_v16, %v527_v14  ;;  %v1105_v58 = vcombine.low %v1101_v54, %v1101_v54  ;;  %v1159_v14 = vld [vmem:[#allocation2 + $0x8] sm:$0xf] }
 0x1c8   : > { %935 = vrot.lane.b32.xlu0 %v930_v39, %s2773_s22  ;;  %534 = vst [vmem:[#allocation3 + $0x18] sm:$0xf] %v530_v33  ;;  %v1102_v39 = vmul.f32 %v1096_v32, %v1082_v12 }
 0x1ca   : > { %v702_v21 = vpop.permute.xlu1 %701  ;;  %v523_v23 = vpop.permute.xlu0 %522  ;;  %v1106_v48 = vcombine.low %v1102_v39, %v1102_v39 }
 0x1cb   : > { %1034 = vrot.lane.b32.xlu1 %v2752_v31, %s2807_s15  ;;  %v529_v35 = vsel %vm3957_vm1, %v523_v23, %v525_v16  ;;  %v1121_v16 = vld [vmem:[#allocation2 + $0x8] sm:$0xf]  ;;  %v1179_v31 = vmul.f32 %v1173_v17, %v1159_v14  ;;  %vm3961_vm1 = vcmask 908288  }
 0x1cc   : > { %1013 = vrot.lane.b32.xlu0 %v1010_v57, %s2803_s16  ;;  %533 = vst [vmem:[#allocation3 + $0x10] sm:$0xf] %v529_v35  ;;  %v1141_v33 = vmul.f32 %v1135_v61, %v1121_v16 }
 0x1ce   : > { %v698_v7 = vpop.permute.xlu1 %697  ;;  %v700_v42 = vpop.permute.xlu0 %699 }
 0x1cf   : > { %1072 = vrot.lane.b32.xlu1 %v1064_v40, %s2800_s23  ;;  %v704_v47 = vsel %vm3956_vm14, %v698_v7, %v700_v42  ;;  %v705_v19 = vsel %vm3956_vm14, %v700_v42, %v702_v21  ;;  %vm3960_vm14 = vcmask 900096   ;;  %v1175_v21 = vsel %vm3961_vm1, %v1173_v17, %v3288_v27 }
 0x1d0   : > { %1032 = vrot.lane.b32.xlu0 %v3221_v24, %s2807_s15  ;;  %708 = vst [vmem:[#allocation3 + $0x30] sm:$0xf0] %v704_v47  ;;  %709 = vst [vmem:[#allocation3 + $0x38] sm:$0xf0] %v705_v19  ;;  %v1137_v18 = vsel %vm3960_vm14, %v1135_v61, %v3290_v30  ;;  %v1230_v30 = vrot.slane %v3297_v20, 4  ;;  %v1178_v34 = vmul.f32 %v1175_v21, %v3221_v24  ;;  %v1269_v19 = vrot.slane %v3295_v15, 4 }
 0x1d1   : > { %v1140_v12 = vmul.f32 %v1137_v18, %v3221_v24  ;;  %vm3966_vm14 = vcmask 1031168   ;;  %vm3968_vm1 = vcmask 1039360   ;;  %v1332_v21 = vld [vmem:[#allocation2 + $0x8] sm:$0xf] }
 0x1d2   : > { %v1236_v23 = vmul.f32 %v1230_v30, %v1216_v62  ;;  %v1232_v39 = vsel %vm3962_vm0, %v1230_v30, %v3297_v20  ;;  %v1271_v61 = vsel %vm3964_vm15, %v1269_v19, %v3295_v15  ;;  %v1275_v14 = vmul.f32 %v1269_v19, %v1255_v13 }
 0x1d3   : > { %1111 = vrot.lane.b32.xlu1 %v1106_v48, %s2801_s24  ;;  %v1144_v57 = vcombine.high %v1140_v12, %v1140_v12  ;;  %v1235_v7 = vmul.f32 %v1232_v39, %v3221_v24  ;;  %v1274_v18 = vmul.f32 %v1271_v61, %v3221_v24  ;;  %v1390_v30 = vrot.slane %v3312_v44, 4 }
 0x1d4   : > { %1070 = vrot.lane.b32.xlu0 %v1067_v53, %s2800_s23  ;;  %v1240_v35 = vcombine.low %v1236_v23, %v1236_v23  ;;  %v1293_v53 = vld [vmem:[#allocation2 + $0x8] sm:$0xf]  ;;  %vm3971_vm0 = vcmask 7168   ;;  %v1426_v61 = vrot.slane %v3328_v52, 4  ;;  %vm1324_vm15 = vcmask 15360  }
 0x1d5   : > { %v1239_v20 = vcombine.low %v1235_v7, %v1235_v7 }
 0x1d7   : > { %1030 = vrot.lane.b32.xlu1 %v3239_v63, %s2807_s15  ;;  %s3976_s15 = smov 18   ;;  %v1183_v63 = vcombine.low %v1179_v31, %v1179_v31 }
 0x1d8   : > { %1109 = vrot.lane.b32.xlu0 %v1101_v54, %s2801_s24 }
 0x1db   : > { %1107 = vrot.lane.b32.xlu1 %v1105_v58, %s2801_s24  ;;  %s3977_s24 = smov 17   ;;  %v1307_v58 = vrot.slane %v3303_v36, 4 }
 0x1dc   : > { %1011 = vrot.lane.b32.xlu0 %v1006_v8, %s2803_s16  ;;  %v1198_v8 = vld [vmem:[#allocation2 + $0x8] sm:$0xf]  ;;  %s3978_s16 = smov 15  }
 0x1dd   : > { %v1313_v16 = vmul.f32 %v1307_v58, %v1293_v53  ;;  %v1309_v62 = vsel %vm3966_vm14, %v1307_v58, %v3303_v36  ;;  %vm1190_vm14 = vcmask 138240  }
 0x1df   : > { %1149 = vrot.lane.b32.xlu1 %v1141_v33, %s3976_s15  ;;  %v1317_v15 = vcombine.low %v1313_v16, %v1313_v16 }
 0x1e0   : > { %1068 = vrot.lane.b32.xlu0 %v1063_v3, %s2800_s23  ;;  %s2808_s23 = smov 16   ;;  %v1182_v3 = vcombine.low %v1178_v34, %v1178_v34 }
 0x1e3   : > { %1188 = vrot.lane.b32.xlu1 %v1183_v63, %s3977_s24  ;;  %v1346_v63 = vrot.slane %v3305_v37, 4 }
 0x1e4   : > { %1147 = vrot.lane.b32.xlu0 %v1144_v57, %s3976_s15  ;;  %v1278_v57 = vcombine.high %v1274_v18, %v1274_v18 }
 0x1e5   : > { %v3447_v32 = vpop.permute.xlu1 %468  ;;  %v1352_v39 = vmul.f32 %v1346_v63, %v1332_v21  ;;  %v1499_v21 = vrot.slane %v3326_v49, 4 }
 0x1e7   : > { %1206 = vrot.lane.b32.xlu1 %v1198_v8, %s2808_s23 }
 0x1e8   : > { %1186 = vrot.lane.b32.xlu0 %v1178_v34, %s3977_s24  ;;  %v1348_v34 = vsel %vm3968_vm1, %v1346_v63, %v3305_v37  ;;  %vm1113_vm1 = vcmask 244736  }
 0x1e9   : > { %v3452_v27 = vpop.permute.xlu1 %605  ;;  %v1351_v36 = vmul.f32 %v1348_v34, %v3221_v24 }
 0x1ea   : > { %v507_v40 = vpop.permute.xlu0 %506 }
 0x1eb   : > { %1245 = vrot.lane.b32.xlu1 %v1240_v35, %s3978_s16  ;;  %v1312_v35 = vmul.f32 %v1309_v62, %v3221_v24  ;;  %v1355_v53 = vcombine.high %v1351_v36, %v1351_v36  ;;  %v1376_v62 = vld [vmem:[#allocation2 + $0xc] sm:$0xf] }
 0x1ec   : > { %1204 = vrot.lane.b32.xlu0 %v3229_v25, %s2808_s23 }
 0x1ed   : > { %v3460_v42 = vpop.permute.xlu1 %682 }
 0x1ee   : > { %v565_v47 = vpop.permute.xlu0 %564 }
 0x1ef   : > { %1184 = vrot.lane.b32.xlu1 %v1182_v3, %s3977_s24  ;;  %s3979_s24 = smov 14  }
 0x1f0   : > { %1243 = vrot.lane.b32.xlu0 %v1235_v7, %s3978_s16  ;;  %v1391_v7 = vsel %vm3971_vm0, %v1390_v30, %v3312_v44  ;;  %v1449_v44 = vld [vmem:[#allocation2 + $0xc] sm:$0xf]  ;;  %vm979_vm0 = vcmask 277504  }
 0x1f1   : > { %v509_v48 = vpop.permute.xlu1 %508 }
 0x1f2   : > { %v512_v54 = vsel %vm3963_vm12, %v507_v40, %v509_v48  ;;  %v465_v25 = vpop.permute.xlu0 %464  ;;  %v3494_v48 = vld [vmem:[#allocation2 + $0x4] sm:$0xff] }
 0x1f3   : > { %516 = vst [vmem:[#allocation3 + $0x8] sm:$0xf0] %v512_v54  ;;  %1241 = vrot.lane.b32.xlu1 %v1239_v20, %s3978_s16  ;;  %v1316_v20 = vcombine.low %v1312_v35, %v1312_v35  ;;  %v3497_v13 = vmul.f32 %v3494_v48, %v1391_v7  ;;  %v1463_v54 = vrot.slane %v3310_v41, 4  ;;  %s3982_s16 = smov 127  }
 0x1f4   : > { %1145 = vrot.lane.b32.xlu0 %v1140_v12, %s3976_s15  ;;  %s3980_s15 = smov 2  }
 0x1f5   : > { %v567_v17 = vpop.permute.xlu1 %566 }
 0x1f6   : > { %v570_v31 = vsel %vm3967_vm11, %v565_v47, %v567_v17  ;;  %v643_v33 = vpop.permute.xlu0 %642  ;;  %v1398_v17 = vcombine.high %v3497_v13, %v3497_v13 }
 0x1f7   : > { %574 = vst [vmem:[#allocation3 + $0x18] sm:$0xf0] %v570_v31  ;;  %1283 = vrot.lane.b32.xlu1 %v1275_v14, %s3979_s24 }
 0x1f8   : > { %1202 = vrot.lane.b32.xlu0 %v3221_v24, %s2808_s23  ;;  %s3981_s23 = smov 1  }
 0x1f9   : > { %v645_v12 = vpop.permute.xlu1 %644 }
 0x1fa   : > { %v648_v8 = vsel %vm3969_vm10, %v643_v33, %v645_v12  ;;  %v602_v23 = vpop.permute.xlu0 %601 }
 0x1fb   : > { %652 = vst [vmem:[#allocation3 + $0x28] sm:$0xf0] %v648_v8  ;;  %1322 = vrot.lane.b32.xlu1 %v1317_v15, %s3980_s15  ;;  %v1412_v8 = vld [vmem:[#allocation2 + $0xc] sm:$0xf] }
 0x1fc   : > { %1281 = vrot.lane.b32.xlu0 %v1278_v57, %s3979_s24 }
 0x1fd   : > { %v505_v3 = vpop.permute.xlu1 %504 }
 0x1fe   : > { %v511_v19 = vsel %vm3963_vm12, %v505_v3, %v507_v40  ;;  %v679_v37 = vpop.permute.xlu0 %678  ;;  %vm1285_vm12 = vcmask 113664  }
 0x1ff   : > { %515 = vst [vmem:[#allocation3] sm:$0xf0] %v511_v19  ;;  %1360 = vrot.lane.b32.xlu1 %v1352_v39, %s3981_s23  ;;  %v2271_v39 = vld [vmem:[#allocation3 + $0x18] sm:$0xff] }
 0x200   : > { %1320 = vrot.lane.b32.xlu0 %v1312_v35, %s3980_s15 }
 0x201   : > { %v563_v24 = vpop.permute.xlu1 %562 }
 0x202   : > { %v569_v40 = vsel %vm3967_vm11, %v563_v24, %v565_v47  ;;  %v467_v58 = vpop.permute.xlu0 %466  ;;  %v1464_v47 = vsel %vm1285_vm12, %v1463_v54, %v3310_v41  ;;  %vm1151_vm11 = vcmask 146432  }
 0x203   : > { %573 = vst [vmem:[#allocation3 + $0x10] sm:$0xf0] %v569_v40  ;;  %v471_v14 = vsel %vm3965_vm13, %v465_v25, %v467_v58  ;;  %v472_v16 = vsel %vm3965_vm13, %v467_v58, %v3447_v32  ;;  %1318 = vrot.lane.b32.xlu1 %v1316_v20, %s3980_s15  ;;  %v1427_v25 = vsel %vm1324_vm15, %v1426_v61, %v3328_v52  ;;  %vm1247_vm13 = vcmask 121856   ;;  %s3984_s15 = smov 114  }
 0x204   : > { %475 = vst [vmem:[#allocation3] sm:$0xf] %v471_v14  ;;  %476 = vst [vmem:[#allocation3 + $0x8] sm:$0xf] %v472_v16  ;;  %1358 = vrot.lane.b32.xlu0 %v1355_v53, %s3981_s23  ;;  %v3522_v57 = vmul.f32 %v3494_v48, %v1464_v47  ;;  %v3525_v52 = vmul.f32 %v3494_v48, %v1427_v25  ;;  %v1431_v53 = vmul.f32 %v1426_v61, %v1412_v8 }
 0x205   : > { %v641_v31 = vpop.permute.xlu1 %640 }
 0x206   : > { %v647_v32 = vsel %vm3969_vm10, %v641_v31, %v643_v33  ;;  %v604_v63 = vpop.permute.xlu0 %603  ;;  %v1471_v20 = vcombine.high %v3522_v57, %v3522_v57  ;;  %v1435_v16 = vcombine.low %v1431_v53, %v1431_v53  ;;  %vm3973_vm10 = vcmask 392192  }
 0x207   : > { %651 = vst [vmem:[#allocation3 + $0x20] sm:$0xf0] %v647_v32  ;;  %v608_v15 = vsel %vm3970_vm9, %v602_v23, %v604_v63  ;;  %v609_v12 = vsel %vm3970_vm9, %v604_v63, %v3452_v27  ;;  %1401 = vrot.lane.b32.xlu1 %v1398_v17, %s3982_s16  ;;  %vm1074_vm9 = vcmask 252928  }
 0x208   : > { %612 = vst [vmem:[#allocation3 + $0x20] sm:$0xf] %v608_v15  ;;  %613 = vst [vmem:[#allocation3 + $0x28] sm:$0xf] %v609_v12  ;;  %1279 = vrot.lane.b32.xlu0 %v1274_v18, %s3979_s24  ;;  %s3983_s24 = smov 126   ;;  %v1468_v12 = vmul.f32 %v1463_v54, %v1449_v44 }
 0x209   : > { %v739_v33 = vpop.permute.xlu1 %738 }
 0x20a   : > { %v681_v23 = vpop.permute.xlu0 %680  ;;  %v2270_v34 = vld [vmem:[#allocation3 + $0x10] sm:$0xff] }
 0x20b   : > { %v685_v27 = vsel %vm3972_vm8, %v679_v37, %v681_v23  ;;  %v686_v35 = vsel %vm3972_vm8, %v681_v23, %v3460_v42  ;;  %1438 = vrot.lane.b32.xlu1 %v3525_v52, %s3983_s24  ;;  %v2269_v18 = vld [vmem:[#allocation3 + $0x8] sm:$0xff]  ;;  %v2268_v3 = vld [vmem:[#allocation3] sm:$0xff]  ;;  %v1395_v37 = vmul.f32 %v1390_v30, %v1376_v62  ;;  %v1500_v42 = vsel %vm1247_vm13, %v1499_v21, %v3326_v49  ;;  %v1485_v30 = vld [vmem:[#allocation2 + $0xc] sm:$0xf] }
 0x20c   : > { %689 = vst [vmem:[#allocation3 + $0x30] sm:$0xf] %v685_v27  ;;  %690 = vst [vmem:[#allocation3 + $0x38] sm:$0xf] %v686_v35  ;;  %1356 = vrot.lane.b32.xlu0 %v1351_v36, %s3981_s23  ;;  %v2325_v7 = vpack.c.bf16 %v2271_v39, %v2269_v18  ;;  %v2324_v19 = vpack.c.bf16 %v2270_v34, %v2268_v3  ;;  %v3544_v36 = vmul.f32 %v3494_v48, %v1500_v42  ;;  %s3985_s23 = smov 113   ;;  %vm1017_vm8 = vcmask 269312  }
 0x20d   : > { %v776_v24 = vpop.permute.xlu1 %775  ;;  %v1554_v27 = vrot.slane %v3334_v56, 4  ;;  %v1591_v35 = vrot.slane %v3336_v59, 4  ;;  %v1434_v39 = vcombine.low %v3525_v52, %v3525_v52  ;;  %v1627_v42 = vrot.slane %v3343_v2, 4 }
 0x20e   : > { %2375 = vmatprep.subr.bf16.mxu1 %v2325_v7  ;;  %v737_v40 = vpop.permute.xlu0 %736 }
 0x20f   : > { %v741_v58 = vsel %vm669_vm7, %v737_v40, %v739_v33  ;;  %1474 = vrot.lane.b32.xlu1 %v1471_v20, %s3984_s15  ;;  %2376 = vmatpush1.bf16.msra.mxu1 %v2324_v19  ;;  %v2273_v49 = vld [vmem:[#allocation3 + $0x28] sm:$0xff]  ;;  %v2272_v47 = vld [vmem:[#allocation3 + $0x20] sm:$0xff]  ;;  %v1504_v33 = vmul.f32 %v1499_v21, %v1485_v30  ;;  %v1555_v3 = vsel %vm1190_vm14, %v1554_v27, %v3334_v56 }
 0x210   : > { %745 = vst [vmem:[#allocation3 + $0x48] sm:$0xf] %v741_v58  ;;  %1403 = vrot.lane.b32.xlu0 %v1395_v37, %s3982_s16  ;;  %v1592_v7 = vsel %vm1151_vm11, %v1591_v35, %v3336_v59  ;;  %v3581_v56 = vmul.f32 %v3494_v48, %v1555_v3  ;;  %v1507_v37 = vcombine.low %v3544_v36, %v3544_v36 }
 0x211   : > { %v812_v14 = vpop.permute.xlu1 %811  ;;  %v1508_v34 = vcombine.low %v1504_v33, %v1504_v33  ;;  %v1595_v52 = vmul.f32 %v3494_v48, %v1592_v7 }
 0x212   : > { %v774_v17 = vpop.permute.xlu0 %773 }
 0x213   : > { %v778_v61 = vsel %vm630_vm5, %v774_v17, %v776_v24  ;;  %1511 = vrot.lane.b32.xlu1 %v3544_v36, %s3985_s23  ;;  %v2275_v31 = vld [vmem:[#allocation3 + $0x38] sm:$0xff]  ;;  %v2274_v25 = vld [vmem:[#allocation3 + $0x30] sm:$0xff] }
 0x214   : > { %782 = vst [vmem:[#allocation3 + $0x48] sm:$0xf0] %v778_v61  ;;  %1440 = vrot.lane.b32.xlu0 %v1435_v16, %s3983_s24  ;;  %v2327_v32 = vpack.c.bf16 %v2275_v31, %v2273_v49  ;;  %v2326_v63 = vpack.c.bf16 %v2274_v25, %v2272_v47  ;;  %v1599_v16 = vcombine.high %v1595_v52, %v1595_v52  ;;  %v1522_v36 = vld [vmem:[#allocation2 + $0xc] sm:$0xf] }
 0x215   : > { %v849_v15 = vpop.permute.xlu1 %848  ;;  %v1628_v61 = vsel %vm1113_vm1, %v1627_v42, %v3343_v2 }
 0x216   : > { %2377 = vmatprep.subr.bf16.mxu1 %v2327_v32  ;;  %v810_v62 = vpop.permute.xlu0 %809  ;;  %v1631_v25 = vmul.f32 %v3494_v48, %v1628_v61 }
 0x217   : > { %v814_v8 = vsel %vm592_vm6, %v810_v62, %v812_v14  ;;  %1399 = vrot.lane.b32.xlu1 %v3497_v13, %s3982_s16  ;;  %2378 = vmatpush1.bf16.msra.mxu1 %v2326_v63  ;;  %v3564_v13 = vcombine.high %v3321_v45, %v3321_v45  ;;  %s2809_s16 = smov 112  }
 0x218   : > { %818 = vst [vmem:[#allocation3 + $0x58] sm:$0xf] %v814_v8  ;;  %1476 = vrot.lane.b32.xlu0 %v1468_v12, %s3984_s15  ;;  %v1664_v12 = vrot.slane %v3341_v1, 4 }
 0x219   : > { %v772_v23 = vpop.permute.xlu1 %771 }
 0x21a   : > { %v777_v41 = vsel %vm630_vm5, %v772_v23, %v774_v17  ;;  %v847_v54 = vpop.permute.xlu0 %846 }
 0x21b   : > { %781 = vst [vmem:[#allocation3 + $0x40] sm:$0xf0] %v777_v41  ;;  %v851_v21 = vsel %vm552_vm3, %v847_v54, %v849_v15  ;;  %1472 = vrot.lane.b32.xlu1 %v3522_v57, %s3984_s15  ;;  %s3986_s15 = smov 111   ;;  %v2277_v14 = vld [vmem:[#allocation3 + $0x48] sm:$0xff]  ;;  %v1577_v15 = vld [vmem:[#allocation2 + $0xc] sm:$0xf] }
 0x21c   : > { %855 = vst [vmem:[#allocation3 + $0x58] sm:$0xf0] %v851_v21  ;;  %1513 = vrot.lane.b32.xlu0 %v1508_v34, %s3985_s23  ;;  %v1596_v41 = vmul.f32 %v1591_v35, %v1577_v15  ;;  %v1719_v35 = vrot.slane %v3349_v11, 4  ;;  %v2755_v15 = vld [vmem:[#allocation2 + $0xc] ss:$0 sps:$4 sm:$0xff]  }
 0x21d   : > { %v845_v18 = vpop.permute.xlu1 %844 }
 0x21e   : > { %v850_v57 = vsel %vm552_vm3, %v845_v18, %v847_v54  ;;  %v735_v19 = vpop.permute.xlu0 %734  ;;  %v1665_v54 = vsel %vm1074_vm9, %v1664_v12, %v3341_v1 }
 0x21f   : > { %854 = vst [vmem:[#allocation3 + $0x50] sm:$0xf0] %v850_v57  ;;  %v740_v20 = vsel %vm669_vm7, %v735_v19, %v737_v40  ;;  %1528 = vrot.lane.b32.xlu1 %v3564_v13, %s2809_s16  ;;  %v1540_v40 = vld [vmem:[#allocation2 + $0xc] sm:$0xf]  ;;  %v3610_v3 = vmul.f32 %v3494_v48, %v1665_v54 }
 0x220   : > { %744 = vst [vmem:[#allocation3 + $0x40] sm:$0xf] %v740_v20  ;;  %1436 = vrot.lane.b32.xlu0 %v1434_v39, %s3983_s24  ;;  %v1559_v49 = vmul.f32 %v1554_v27, %v1540_v40  ;;  %s3987_s24 = smov 110  }
 0x221   : > { %v866_v24 = vpop.permute.xlu1 %865  ;;  %v1672_v20 = vcombine.high %v3610_v3, %v3610_v3 }
 0x222   : > { %v808_v53 = vpop.permute.xlu0 %807  ;;  %v1563_v63 = vcombine.low %v1559_v49, %v1559_v49 }
 0x223   : > { %v813_v58 = vsel %vm592_vm6, %v808_v53, %v810_v62  ;;  %1566 = vrot.lane.b32.xlu1 %v3581_v56, %s3986_s15  ;;  %v2279_v44 = vld [vmem:[#allocation3 + $0x58] sm:$0xff] }
 0x224   : > { %817 = vst [vmem:[#allocation3 + $0x50] sm:$0xf] %v813_v58  ;;  %1509 = vrot.lane.b32.xlu0 %v1507_v37, %s3985_s23  ;;  %v2329_v30 = vpack.c.bf16 %v2279_v44, %v2277_v14  ;;  %v1613_v62 = vld [vmem:[#allocation2 + $0xc] sm:$0xf]  ;;  %s3988_s23 = smov 98   ;;  %v1562_v37 = vcombine.low %v3581_v56, %v3581_v56  ;;  %v1635_v44 = vcombine.low %v1631_v25, %v1631_v25  ;;  %v1755_v56 = vrot.slane %v3347_v9, 4 }
 0x225   : > { %v904_v17 = vpop.permute.xlu1 %903  ;;  %v1632_v21 = vmul.f32 %v1627_v42, %v1613_v62  ;;  %v1720_v42 = vsel %vm1017_vm8, %v1719_v35, %v3349_v11 }
 0x226   : > { %2379 = vmatprep.subr.bf16.mxu1 %v2329_v30  ;;  %v864_v31 = vpop.permute.xlu0 %863 }
 0x227   : > { %v869_v47 = vsel %vm3973_vm10, %v864_v31, %v866_v24  ;;  %1602 = vrot.lane.b32.xlu1 %v1599_v16, %s3987_s24  ;;  %v2276_v8 = vld [vmem:[#allocation3 + $0x40] sm:$0xff]  ;;  %v1636_v59 = vcombine.low %v1632_v21, %v1632_v21  ;;  %v1650_v16 = vld [vmem:[#allocation2 + $0xc] sm:$0xf] }
 0x228   : > { %873 = vst [vmem:[#allocation3 + $0x68] sm:$0xf] %v869_v47  ;;  %1530 = vrot.lane.b32.xlu0 %v1522_v36, %s2809_s16  ;;  %v1669_v47 = vmul.f32 %v1664_v12, %v1650_v16  ;;  %v1792_v12 = vrot.slane %v3356_v26, 4  ;;  %v1778_v16 = vld [vmem:[#allocation2 + $0xc] sm:$0xf] }
 0x229   : > { %v940_v32 = vpop.permute.xlu1 %939 }
 0x22a   : > { %v902_v33 = vpop.permute.xlu0 %901 }
 0x22b   : > { %v906_v2 = vsel %vm494_vm2, %v902_v33, %v904_v17  ;;  %1639 = vrot.lane.b32.xlu1 %v1631_v25, %s3988_s23  ;;  %v2278_v23 = vld [vmem:[#allocation3 + $0x50] sm:$0xff]  ;;  %v1756_v25 = vsel %vm979_vm0, %v1755_v56, %v3347_v9 }
 0x22c   : > { %910 = vst [vmem:[#allocation3 + $0x68] sm:$0xf0] %v906_v2  ;;  %1568 = vrot.lane.b32.xlu0 %v1563_v63, %s3986_s15  ;;  %v2328_v34 = vpack.c.bf16 %v2278_v23, %v2276_v8  ;;  %v1741_v2 = vld [vmem:[#allocation2 + $0xc] sm:$0xf] }
 0x22d   : > { %v978_v27 = vpop.permute.xlu1 %977  ;;  %v1705_v23 = vld [vmem:[#allocation2 + $0xc] sm:$0xf]  ;;  %v1760_v21 = vmul.f32 %v1755_v56, %v1741_v2  ;;  %v1919_v2 = vrot.slane %v3361_v4, 4 }
 0x22e   : > { %2380 = vmatpush1.bf16.msra.mxu1 %v2328_v34  ;;  %v938_v18 = vpop.permute.xlu0 %937  ;;  %v1814_v56 = vld [vmem:[#allocation2 + $0xc] sm:$0xf] }
 0x22f   : > { %v942_v39 = vsel %vm455_vm4, %v938_v18, %v940_v32  ;;  %1526 = vrot.lane.b32.xlu1 %v3321_v45, %s2809_s16  ;;  %s3989_s16 = smov 97  }
 0x230   : > { %946 = vst [vmem:[#allocation3 + $0x78] sm:$0xf] %v942_v39  ;;  %1604 = vrot.lane.b32.xlu0 %v1596_v41, %s3987_s24  ;;  %v1793_v39 = vsel %vm455_vm4, %v1792_v12, %v3356_v26 }
 0x231   : > { %v900_v7 = vpop.permute.xlu1 %899 }
 0x232   : > { %v905_v1 = vsel %vm494_vm2, %v900_v7, %v902_v33  ;;  %v976_v57 = vpop.permute.xlu0 %975  ;;  %v1759_v33 = vmul.f32 %v3494_v48, %v1756_v25 }
 0x233   : > { %909 = vst [vmem:[#allocation3 + $0x60] sm:$0xf0] %v905_v1  ;;  %v981_v19 = vsel %vm979_vm0, %v976_v57, %v978_v27  ;;  %1600 = vrot.lane.b32.xlu1 %v1595_v52, %s3987_s24  ;;  %v1723_v52 = vmul.f32 %v3494_v48, %v1720_v42  ;;  %s2810_s24 = smov 96   ;;  %v2281_v17 = vld [vmem:[#allocation3 + $0x68] sm:$0xff]  ;;  %v3650_v1 = vmul.f32 %v3494_v48, %v1793_v39 }
 0x234   : > { %985 = vst [vmem:[#allocation3 + $0x78] sm:$0xf0] %v981_v19  ;;  %1641 = vrot.lane.b32.xlu0 %v1636_v59, %s3988_s23  ;;  %v1764_v19 = vcombine.low %v1760_v21, %v1760_v21 }
 0x235   : > { %v974_v24 = vpop.permute.xlu1 %973  ;;  %v1727_v61 = vcombine.high %v1723_v52, %v1723_v52 }
 0x236   : > { %v980_v53 = vsel %vm979_vm0, %v974_v24, %v976_v57  ;;  %v862_v40 = vpop.permute.xlu0 %861  ;;  %vm1208_vm0 = vcmask 130048  }
 0x237   : > { %984 = vst [vmem:[#allocation3 + $0x70] sm:$0xf0] %v980_v53  ;;  %v868_v58 = vsel %vm3973_vm10, %v862_v40, %v864_v31  ;;  %1675 = vrot.lane.b32.xlu1 %v1672_v20, %s3989_s16  ;;  %vm1036_vm10 = vcmask 261120  }
 0x238   : > { %872 = vst [vmem:[#allocation3 + $0x60] sm:$0xf] %v868_v58  ;;  %1564 = vrot.lane.b32.xlu0 %v1562_v37, %s3986_s15  ;;  %s3990_s15 = smov 95  }
 0x239   : > { %v1016_v14 = vpop.permute.xlu1 %1015 }
 0x23a   : > { %v936_v30 = vpop.permute.xlu0 %935 }
 0x23b   : > { %v941_v11 = vsel %vm455_vm4, %v936_v30, %v938_v18  ;;  %1693 = vrot.lane.b32.xlu1 %v3321_v45, %s2810_s24  ;;  %v2283_v36 = vld [vmem:[#allocation3 + $0x78] sm:$0xff]  ;;  %v1724_v18 = vmul.f32 %v1719_v35, %v1705_v23  ;;  %v1828_v35 = vrot.slane %v3354_v22, 4 }
 0x23c   : > { %945 = vst [vmem:[#allocation3 + $0x70] sm:$0xf] %v941_v11  ;;  %1637 = vrot.lane.b32.xlu0 %v1635_v44, %s3988_s23  ;;  %v2331_v49 = vpack.c.bf16 %v2283_v36, %v2281_v17  ;;  %s3991_s23 = smov 94   ;;  %v1763_v44 = vcombine.low %v1759_v33, %v1759_v33 }
 0x23d   : > { %v1035_v31 = vpop.permute.xlu1 %1034  ;;  %v1829_v42 = vsel %vm494_vm2, %v1828_v35, %v3354_v22  ;;  %v1882_v22 = vrot.slane %v3363_v10, 4 }
 0x23e   : > { %2381 = vmatprep.subr.bf16.mxu1 %v2331_v49  ;;  %v1014_v32 = vpop.permute.xlu0 %1013 }
 0x23f   : > { %v1019_v63 = vsel %vm1017_vm8, %v1014_v32, %v1016_v14  ;;  %1730 = vrot.lane.b32.xlu1 %v1727_v61, %s3990_s15  ;;  %v2280_v34 = vld [vmem:[#allocation3 + $0x60] sm:$0xff]  ;;  %v1883_v25 = vsel %vm552_vm3, %v1882_v22, %v3363_v10 }
 0x240   : > { %1023 = vst [vmem:[#allocation3 + $0x88] sm:$0xf] %v1019_v63  ;;  %1677 = vrot.lane.b32.xlu0 %v1669_v47, %s3989_s16  ;;  %v1797_v47 = vmul.f32 %v1792_v12, %v1778_v16 }
 0x241   : > { %v1073_v62 = vpop.permute.xlu1 %1072 }
 0x242   : > { %v1033_v8 = vpop.permute.xlu0 %1032 }
 0x243   : > { %v1038_v9 = vsel %vm1036_vm10, %v1033_v8, %v1035_v31  ;;  %1767 = vrot.lane.b32.xlu1 %v1759_v33, %s3991_s23  ;;  %v2282_v27 = vld [vmem:[#allocation3 + $0x70] sm:$0xff]  ;;  %v1833_v31 = vmul.f32 %v1828_v35, %v1814_v56 }
 0x244   : > { %1042 = vst [vmem:[#allocation3 + $0x88] sm:$0xf0] %v1038_v9  ;;  %1695 = vrot.lane.b32.xlu0 %v2755_v15, %s2810_s24  ;;  %v2330_v41 = vpack.c.bf16 %v2282_v27, %v2280_v34  ;;  %v1886_v15 = vmul.f32 %v3494_v48, %v1883_v25 }
 0x245   : > { %v1112_v54 = vpop.permute.xlu1 %1111 }
 0x246   : > { %2382 = vmatpush1.bf16.msra.mxu1 %v2330_v41  ;;  %v1071_v7 = vpop.permute.xlu0 %1070  ;;  %v1851_v41 = vld [vmem:[#allocation2 + $0xc] sm:$0xf]  ;;  %v1890_v56 = vcombine.low %v1886_v15, %v1886_v15 }
 0x247   : > { %v1076_v59 = vsel %vm1074_vm9, %v1071_v7, %v1073_v62  ;;  %1673 = vrot.lane.b32.xlu1 %v3610_v3, %s3989_s16  ;;  %v1800_v3 = vcombine.high %v3650_v1, %v3650_v1  ;;  %v1837_v62 = vcombine.low %v1833_v31, %v1833_v31 }
 0x248   : > { %1080 = vst [vmem:[#allocation3 + $0x98] sm:$0xf] %v1076_v59  ;;  %1732 = vrot.lane.b32.xlu0 %v1724_v18, %s3990_s15 }
 0x249   : > { %v1031_v57 = vpop.permute.xlu1 %1030 }
 0x24a   : > { %v1037_v20 = vsel %vm1036_vm10, %v1031_v57, %v1033_v8  ;;  %v1110_v26 = vpop.permute.xlu0 %1109  ;;  %v1868_v8 = vld [vmem:[#allocation2 + $0xc] sm:$0xf]  ;;  %vm3995_vm10 = vcmask 539648  }
 0x24b   : > { %1041 = vst [vmem:[#allocation3 + $0x80] sm:$0xf0] %v1037_v20  ;;  %v1115_v24 = vsel %vm1113_vm1, %v1110_v26, %v1112_v54  ;;  %1728 = vrot.lane.b32.xlu1 %v1723_v52, %s3990_s15  ;;  %v3667_v52 = vmul.f32 %v3494_v48, %v1829_v42  ;;  %v2285_v17 = vld [vmem:[#allocation3 + $0x88] sm:$0xff]  ;;  %v1920_v54 = vsel %vm592_vm6, %v1919_v2, %v3361_v4  ;;  %v1992_v4 = vrot.slane %v3377_v38, 4 }
 0x24c   : > { %1119 = vst [vmem:[#allocation3 + $0x98] sm:$0xf0] %v1115_v24  ;;  %1769 = vrot.lane.b32.xlu0 %v1764_v19, %s3991_s23  ;;  %v1887_v21 = vmul.f32 %v1882_v22, %v1868_v8  ;;  %v1955_v19 = vrot.slane %v3375_v28, 4  ;;  %v1941_v22 = vld [vmem:[#allocation2 + $0xc] sm:$0xf] }
 0x24d   : > { %v1108_v37 = vpop.permute.xlu1 %1107  ;;  %v1993_v42 = vsel %vm669_vm7, %v1992_v4, %v3377_v38 }
 0x24e   : > { %v1114_v53 = vsel %vm1113_vm1, %v1108_v37, %v1110_v26  ;;  %v1012_v40 = vpop.permute.xlu0 %1011  ;;  %v1891_v57 = vcombine.low %v1887_v21, %v1887_v21  ;;  %v1956_v37 = vsel %vm630_vm5, %v1955_v19, %v3375_v28  ;;  %v1960_v31 = vmul.f32 %v1955_v19, %v1941_v22  ;;  %v2756_v21 = vld [vmem:[#allocation2 + $0xc] ss:$0 sps:$4 sm:$0xff]  }
 0x24f   : > { %1118 = vst [vmem:[#allocation3 + $0x90] sm:$0xf0] %v1114_v53  ;;  %v1018_v58 = vsel %vm1017_vm8, %v1012_v40, %v1014_v32  ;;  %1803 = vrot.lane.b32.xlu1 %v1800_v3, %s3974_s19  ;;  %v1836_v3 = vcombine.low %v3667_v52, %v3667_v52  ;;  %vm3992_vm1 = vcmask 531456   ;;  %vm3993_vm8 = vcmask 7168  }
 0x250   : > { %1022 = vst [vmem:[#allocation3 + $0x80] sm:$0xf] %v1018_v58  ;;  %1691 = vrot.lane.b32.xlu0 %v3391_v43, %s2810_s24 }
 0x251   : > { %v1150_v14 = vpop.permute.xlu1 %1149 }
 0x252   : > { %v1069_v30 = vpop.permute.xlu0 %1068 }
 0x253   : > { %v1075_v11 = vsel %vm1074_vm9, %v1069_v30, %v1071_v7  ;;  %1840 = vrot.lane.b32.xlu1 %v3667_v52, %s3975_s14  ;;  %v2287_v36 = vld [vmem:[#allocation3 + $0x98] sm:$0xff]  ;;  %v3692_v7 = vmul.f32 %v3494_v48, %v1920_v54  ;;  %v1996_v52 = vmul.f32 %v3494_v48, %v1993_v42  ;;  %vm3994_vm9 = vcmask 637952  }
 0x254   : > { %1079 = vst [vmem:[#allocation3 + $0x90] sm:$0xf] %v1075_v11  ;;  %1765 = vrot.lane.b32.xlu0 %v1763_v44, %s3991_s23  ;;  %v2333_v49 = vpack.c.bf16 %v2287_v36, %v2285_v17  ;;  %v1905_v44 = vld [vmem:[#allocation2 + $0xc] sm:$0xf] }
 0x255   : > { %v1189_v61 = vpop.permute.xlu1 %1188  ;;  %v2000_v36 = vcombine.high %v1996_v52, %v1996_v52 }
 0x256   : > { %2383 = vmatprep.subr.bf16.mxu1 %v2333_v49  ;;  %v1148_v32 = vpop.permute.xlu0 %1147 }
 0x257   : > { %v1153_v63 = vsel %vm1151_vm11, %v1148_v32, %v1150_v14  ;;  %1857 = vrot.lane.b32.xlu1 %v3564_v13, %s2804_s20  ;;  %v2284_v23 = vld [vmem:[#allocation3 + $0x80] sm:$0xff]  ;;  %v3714_v14 = vmul.f32 %v3494_v48, %v1956_v37 }
 0x258   : > { %1157 = vst [vmem:[#allocation3 + $0xa8] sm:$0xf] %v1153_v63  ;;  %1805 = vrot.lane.b32.xlu0 %v1797_v47, %s3974_s19  ;;  %v1964_v63 = vcombine.low %v1960_v31, %v1960_v31 }
 0x259   : > { %v1207_v33 = vpop.permute.xlu1 %1206 }
 0x25a   : > { %v1187_v12 = vpop.permute.xlu0 %1186 }
 0x25b   : > { %v1192_v10 = vsel %vm1190_vm14, %v1187_v12, %v1189_v61  ;;  %1894 = vrot.lane.b32.xlu1 %v1886_v15, %s2780_s26  ;;  %v2286_v9 = vld [vmem:[#allocation3 + $0x90] sm:$0xff]  ;;  %v1924_v61 = vmul.f32 %v1919_v2, %v1905_v44  ;;  %v2046_v15 = vrot.slane %v3385_v29, 4 }
 0x25c   : > { %1196 = vst [vmem:[#allocation3 + $0xa8] sm:$0xf0] %v1192_v10  ;;  %1842 = vrot.lane.b32.xlu0 %v1837_v62, %s3975_s14  ;;  %v2332_v34 = vpack.c.bf16 %v2286_v9, %v2284_v23  ;;  %v1978_v62 = vld [vmem:[#allocation2 + $0xc] sm:$0xf] }
 0x25d   : > { %v1246_v27 = vpop.permute.xlu1 %1245  ;;  %v1997_v9 = vmul.f32 %v1992_v4, %v1978_v62 }
 0x25e   : > { %2384 = vmatpush1.bf16.msra.mxu1 %v2332_v34  ;;  %v1205_v18 = vpop.permute.xlu0 %1204  ;;  %v2047_v34 = vsel %vm3992_vm1, %v2046_v15, %v3385_v29  ;;  %v2119_v29 = vrot.slane %v3383_v46, 4 }
 0x25f   : > { %v1210_v39 = vsel %vm1208_vm0, %v1205_v18, %v1207_v33  ;;  %1801 = vrot.lane.b32.xlu1 %v3650_v1, %s3974_s19  ;;  %v1927_v1 = vcombine.high %v3692_v7, %v3692_v7 }
 0x260   : > { %1214 = vst [vmem:[#allocation3 + $0xb8] sm:$0xf] %v1210_v39  ;;  %1859 = vrot.lane.b32.xlu0 %v1851_v41, %s2804_s20 }
 0x261   : > { %v1185_v59 = vpop.permute.xlu1 %1184 }
 0x262   : > { %v1191_v35 = vsel %vm1190_vm14, %v1185_v59, %v1187_v12  ;;  %v1244_v20 = vpop.permute.xlu0 %1243  ;;  %v2082_v59 = vrot.slane %v3396_v51, 4  ;;  %vm4000_vm14 = vcmask 1031168  }
 0x263   : > { %1195 = vst [vmem:[#allocation3 + $0xa0] sm:$0xf0] %v1191_v35  ;;  %v1249_v26 = vsel %vm1247_vm13, %v1244_v20, %v1246_v27  ;;  %1855 = vrot.lane.b32.xlu1 %v3321_v45, %s2804_s20  ;;  %v2289_v16 = vld [vmem:[#allocation3 + $0xa8] sm:$0xff]  ;;  %v1963_v35 = vcombine.low %v3714_v14, %v3714_v14 }
 0x264   : > { %1253 = vst [vmem:[#allocation3 + $0xb8] sm:$0xf0] %v1249_v26  ;;  %1896 = vrot.lane.b32.xlu0 %v1891_v57, %s2780_s26  ;;  %v2083_v26 = vsel %vm3995_vm10, %v2082_v59, %v3396_v51 }
 0x265   : > { %v1242_v24 = vpop.permute.xlu1 %1241 }
 0x266   : > { %v1248_v53 = vsel %vm1247_vm13, %v1242_v24, %v1244_v20  ;;  %v1146_v40 = vpop.permute.xlu0 %1145  ;;  %v2120_v20 = vsel %vm3994_vm9, %v2119_v29, %v3383_v46  ;;  %vm3999_vm13 = vcmask 646144   ;;  %vm4005_vm9 = vmmov %vm4000_vm14 }
 0x267   : > { %1252 = vst [vmem:[#allocation3 + $0xb0] sm:$0xf0] %v1248_v53  ;;  %v1152_v58 = vsel %vm1151_vm11, %v1146_v40, %v1148_v32  ;;  %1930 = vrot.lane.b32.xlu1 %v1927_v1, %s2778_s30  ;;  %vm3996_vm11 = vmmov %vm3993_vm8  ;;  %v2123_v53 = vmul.f32 %v3494_v48, %v2120_v20  ;;  %v3759_v40 = vmul.f32 %v3494_v48, %v2083_v26 }
 0x268   : > { %1156 = vst [vmem:[#allocation3 + $0xa0] sm:$0xf] %v1152_v58  ;;  %1838 = vrot.lane.b32.xlu0 %v1836_v3, %s3975_s14  ;;  %v2155_v58 = vrot.slane %v3394_v50, 4 }
 0x269   : > { %v1284_v28 = vpop.permute.xlu1 %1283  ;;  %v2127_v44 = vcombine.high %v2123_v53, %v2123_v53 }
 0x26a   : > { %v1203_v38 = vpop.permute.xlu0 %1202  ;;  %v2156_v22 = vsel %vm3999_vm13, %v2155_v58, %v3394_v50  ;;  %vm4008_vm13 = vcmask 670720  }
 0x26b   : > { %v1209_v30 = vsel %vm1208_vm0, %v1203_v38, %v1205_v18  ;;  %1967 = vrot.lane.b32.xlu1 %v3714_v14, %s2781_s27  ;;  %v2291_v11 = vld [vmem:[#allocation3 + $0xb8] sm:$0xff]  ;;  %v3737_v18 = vmul.f32 %v3494_v48, %v2047_v34  ;;  %vm4002_vm0 = vcmask 932864  }
 0x26c   : > { %1213 = vst [vmem:[#allocation3 + $0xb0] sm:$0xf] %v1209_v30  ;;  %1892 = vrot.lane.b32.xlu0 %v1890_v56, %s2780_s26  ;;  %v2335_v17 = vpack.c.bf16 %v2291_v11, %v2289_v16  ;;  %v2032_v14 = vld [vmem:[#allocation2 + $0xc] sm:$0xf]  ;;  %vm4003_vm1 = vmmov %vm4002_vm0 }
 0x26d   : > { %v1323_v49 = vpop.permute.xlu1 %1322  ;;  %v2051_v38 = vmul.f32 %v2046_v15, %v2032_v14 }
 0x26e   : > { %2385 = vmatprep.subr.bf16.mxu1 %v2335_v17  ;;  %v1282_v47 = vpop.permute.xlu0 %1281 }
 0x26f   : > { %v1287_v25 = vsel %vm1285_vm12, %v1282_v47, %v1284_v28  ;;  %2003 = vrot.lane.b32.xlu1 %v2000_v36, %s2779_s11  ;;  %v2288_v2 = vld [vmem:[#allocation3 + $0xa0] sm:$0xff] }
 0x270   : > { %1291 = vst [vmem:[#allocation3 + $0xc8] sm:$0xf] %v1287_v25  ;;  %1932 = vrot.lane.b32.xlu0 %v1924_v61, %s2778_s30  ;;  %v2105_v25 = vld [vmem:[#allocation2 + $0xc] sm:$0xf] }
 0x271   : > { %v1361_v32 = vpop.permute.xlu1 %1360 }
 0x272   : > { %v1321_v33 = vpop.permute.xlu0 %1320 }
 0x273   : > { %v1326_v12 = vsel %vm1324_vm15, %v1321_v33, %v1323_v49  ;;  %2021 = vrot.lane.b32.xlu1 %v3321_v45, %s2805_s12  ;;  %v2290_v8 = vld [vmem:[#allocation3 + $0xb0] sm:$0xff] }
 0x274   : > { %1330 = vst [vmem:[#allocation3 + $0xc8] sm:$0xf0] %v1326_v12  ;;  %1969 = vrot.lane.b32.xlu0 %v1964_v63, %s2781_s27  ;;  %v2334_v10 = vpack.c.bf16 %v2290_v8, %v2288_v2 }
 0x275   : > { %v1319_v23 = vpop.permute.xlu1 %1318 }
 0x276   : > { %v1325_v27 = vsel %vm1324_vm15, %v1319_v23, %v1321_v33  ;;  %2386 = vmatpush1.bf16.msra.mxu1 %v2334_v10  ;;  %v1359_v41 = vpop.permute.xlu0 %1358  ;;  %v2124_v33 = vmul.f32 %v2119_v29, %v2105_v25 }
 0x277   : > { %1329 = vst [vmem:[#allocation3 + $0xc0] sm:$0xf0] %v1325_v27  ;;  %v1364_v54 = vsel %vm3993_vm8, %v1359_v41, %v1361_v32  ;;  %1928 = vrot.lane.b32.xlu1 %v3692_v7, %s2778_s30  ;;  %v2054_v7 = vcombine.high %v3737_v18, %v3737_v18  ;;  %s3998_s30 = smov 62   ;;  %v2141_v32 = vld [vmem:[#allocation2 + $0xc] sm:$0xf]  ;;  %vm4004_vm8 = vcmask 924672  }
 0x278   : > { %1368 = vst [vmem:[#allocation3 + $0xd8] sm:$0xf] %v1364_v54  ;;  %2005 = vrot.lane.b32.xlu0 %v1997_v9, %s2779_s11  ;;  %v2160_v62 = vmul.f32 %v2155_v58, %v2141_v32  ;;  %v2209_v54 = vrot.slane %v3404_v60, 4  ;;  %vm4006_vm10 = vmmov %vm4004_vm8 }
 0x279   : > { %v1402_v39 = vpop.permute.xlu1 %1401 }
 0x27a   : > { %v1280_v57 = vpop.permute.xlu0 %1279  ;;  %v2164_v23 = vcombine.low %v2160_v62, %v2160_v62  ;;  %v2495_v62 = vld [vmem:[%s3911_s8] sm:$0xff] }
 0x27b   : > { %v1286_v19 = vsel %vm1285_vm12, %v1280_v57, %v1282_v47  ;;  %2001 = vrot.lane.b32.xlu1 %v1996_v52, %s2779_s11  ;;  %v2293_v3 = vld [vmem:[#allocation3 + $0xc8] sm:$0xff]  ;;  %v2068_v52 = vld [vmem:[#allocation2 + $0xc] sm:$0xf]  ;;  %vm3997_vm12 = vcmask 1039360  }
 0x27c   : > { %1290 = vst [vmem:[#allocation3 + $0xc0] sm:$0xf] %v1286_v19  ;;  %2023 = vrot.lane.b32.xlu0 %v2756_v21, %s2805_s12  ;;  %v2087_v30 = vmul.f32 %v2082_v59, %v2068_v52  ;;  %vm4001_vm15 = vmmov %vm3997_vm12  ;;  %v2178_v57 = vld [vmem:[#allocation2 + $0xc] sm:$0xf] }
 0x27d   : > { %v3746_v4 = vpop.permute.xlu1 %1438 }
 0x27e   : > { %v1357_v1 = vpop.permute.xlu0 %1356  ;;  %v2091_v31 = vcombine.low %v2087_v30, %v2087_v30 }
 0x27f   : > { %v1363_v24 = vsel %vm3996_vm11, %v1357_v1, %v1359_v41  ;;  %2057 = vrot.lane.b32.xlu1 %v2054_v7, %s2776_s17  ;;  %v2295_v37 = vld [vmem:[#allocation3 + $0xd8] sm:$0xff]  ;;  %v2090_v41 = vcombine.low %v3759_v40, %v3759_v40  ;;  %vm1532_vm11 = vcmask 916480  }
 0x280   : > { %1367 = vst [vmem:[#allocation3 + $0xd0] sm:$0xf] %v1363_v24  ;;  %1965 = vrot.lane.b32.xlu0 %v1963_v35, %s2781_s27  ;;  %v2337_v42 = vpack.c.bf16 %v2295_v37, %v2293_v3  ;;  %v2195_v37 = vld [vmem:[#allocation2 + $0xc] sm:$0xf] }
 0x281   : > { %v1475_v46 = vpop.permute.xlu1 %1474  ;;  %v2214_v14 = vmul.f32 %v2209_v54, %v2195_v37 }
 0x282   : > { %2387 = vmatprep.subr.bf16.mxu1 %v2337_v42  ;;  %v1404_v51 = vpop.permute.xlu0 %1403 }
 0x283   : > { %v1406_v28 = vsel %vm3997_vm12, %v1402_v39, %v1404_v51  ;;  %2094 = vrot.lane.b32.xlu1 %v3759_v40, %s3998_s30  ;;  %v2292_v17 = vld [vmem:[#allocation3 + $0xc0] sm:$0xff]  ;;  %vm4007_vm12 = vcmask 662528   ;;  %v2232_v51 = vld [vmem:[#allocation2 + $0xc] sm:$0xf] }
 0x284   : > { %1410 = vst [vmem:[#allocation3 + $0xe8] sm:$0xf] %v1406_v28  ;;  %2019 = vrot.lane.b32.xlu0 %v3391_v43, %s2805_s12  ;;  %v2159_v43 = vmul.f32 %v3494_v48, %v2156_v22  ;;  %v2210_v35 = vsel %vm4007_vm12, %v2209_v54, %v3404_v60  ;;  %vm1697_vm12 = vcmask 785408  }
 0x285   : > { %v1512_v56 = vpop.permute.xlu1 %1511 }
 0x286   : > { %v1441_v16 = vpop.permute.xlu0 %1440  ;;  %v2163_v7 = vcombine.low %v2159_v43, %v2159_v43 }
 0x287   : > { %v1443_v11 = vsel %vm4000_vm14, %v3746_v4, %v1441_v16  ;;  %2130 = vrot.lane.b32.xlu1 %v2127_v44, %s2774_s28  ;;  %v2294_v36 = vld [vmem:[#allocation3 + $0xd0] sm:$0xff]  ;;  %vm4009_vm14 = vcmask 908288  }
 0x288   : > { %1447 = vst [vmem:[#allocation3 + $0xe8] sm:$0xf0] %v1443_v11  ;;  %2059 = vrot.lane.b32.xlu0 %v2051_v38, %s2776_s17  ;;  %v2336_v49 = vpack.c.bf16 %v2294_v36, %v2292_v17  ;;  %v2218_v38 = vcombine.low %v2214_v14, %v2214_v14  ;;  %v3822_v36 = vld [vmem:[%s3905_s2] sm:$0xff] }
 0x289   : > { %v1400_v61 = vpop.permute.xlu1 %1399 }
 0x28a   : > { %v1405_v47 = vsel %vm4001_vm15, %v1400_v61, %v1402_v39  ;;  %2388 = vmatpush1.bf16.msra.mxu1 %v2336_v49  ;;  %v1477_v50 = vpop.permute.xlu0 %1476  ;;  %vm4010_vm15 = vcmask 900096  }
 0x28b   : > { %1409 = vst [vmem:[#allocation3 + $0xe0] sm:$0xf] %v1405_v47  ;;  %v1479_v63 = vsel %vm4002_vm0, %v1475_v46, %v1477_v50  ;;  %2167 = vrot.lane.b32.xlu1 %v2159_v43, %s2772_s21  ;;  %vm4011_vm0 = vmmov %vm4010_vm15  ;;  %v2671_v43 = vcombine.high %v3822_v36, %v3822_v36  ;;  %v2352_v47 = vld [vmem:[%s3909_s6] sm:$0xff] }
 0x28c   : > { %1483 = vst [vmem:[#allocation3 + $0xf8] sm:$0xf] %v1479_v63  ;;  %2096 = vrot.lane.b32.xlu0 %v2091_v31, %s3998_s30  ;;  %v2422_v50 = vld [vmem:[%s3910_s7] sm:$0xff] }
 0x28d   : > { %v1473_v15 = vpop.permute.xlu1 %1472 }
 0x28e   : > { %v1478_v12 = vsel %vm4003_vm1, %v1473_v15, %v1475_v46  ;;  %v1514_v2 = vpop.permute.xlu0 %1513  ;;  %vm4012_vm1 = vcmask 801792  }
 0x28f   : > { %1482 = vst [vmem:[#allocation3 + $0xf0] sm:$0xf] %v1478_v12  ;;  %v1516_v8 = vsel %vm4004_vm8, %v1512_v56, %v1514_v2  ;;  %2055 = vrot.lane.b32.xlu1 %v3737_v18, %s2776_s17  ;;  %v2297_v39 = vld [vmem:[#allocation3 + $0xe8] sm:$0xff]  ;;  %vm4013_vm8 = vmmov %vm4009_vm14 }
 0x290   : > { %1520 = vst [vmem:[#allocation3 + $0xf8] sm:$0xf0] %v1516_v8  ;;  %2132 = vrot.lane.b32.xlu0 %v2124_v33, %s2774_s28 }
 0x291   : > { %v1529_v10 = vpop.permute.xlu1 %1528 }
 0x292   : > { %v1437_v9 = vpop.permute.xlu0 %1436 }
 0x293   : > { %v1442_v34 = vsel %vm4005_vm9, %v1437_v9, %v3746_v4  ;;  %2128 = vrot.lane.b32.xlu1 %v2123_v53, %s2774_s28  ;;  %v2246_v4 = vrot.slane %v3402_v55, 4  ;;  %vm2364_vm9 = vcmask 752640  }
 0x294   : > { %1446 = vst [vmem:[#allocation3 + $0xe0] sm:$0xf0] %v1442_v34  ;;  %2169 = vrot.lane.b32.xlu0 %v2164_v23, %s2772_s21  ;;  %2673 = vmatprep.mubr.msk.bf16.mxu1 %vm2364_vm9, %v2671_v43  ;;  %vm4022_vm9 = vcmask 662528  }
 0x295   : > { %v3787_v27 = vpop.permute.xlu1 %1566  ;;  %v2247_v24 = vsel %vm4008_vm13, %v2246_v4, %v3402_v55 }
 0x296   : > { %v1510_v21 = vpop.permute.xlu0 %1509  ;;  %v2250_v46 = vmul.f32 %v3494_v48, %v2247_v24 }
 0x297   : > { %v1515_v18 = vsel %vm4006_vm10, %v1510_v21, %v1512_v56  ;;  %2182 = vrot.lane.b32.xlu1 %v3321_v45, %s2806_s18  ;;  %v2299_v29 = vld [vmem:[#allocation3 + $0xf8] sm:$0xff]  ;;  %v2213_v45 = vmul.f32 %v3494_v48, %v2210_v35  ;;  %vm4014_vm10 = vmmov %vm4012_vm1 }
 0x298   : > { %1519 = vst [vmem:[#allocation3 + $0xf0] sm:$0xf0] %v1515_v18  ;;  %2092 = vrot.lane.b32.xlu0 %v2090_v41, %s3998_s30  ;;  %v2339_v59 = vpack.c.bf16 %v2299_v29, %v2297_v39  ;;  %v2254_v11 = vcombine.high %v2250_v46, %v2250_v46 }
 0x299   : > { %v1603_v19 = vpop.permute.xlu1 %1602  ;;  %v2217_v55 = vcombine.low %v2213_v45, %v2213_v45 }
 0x29a   : > { %2389 = vmatprep.subr.bf16.mxu1 %v2339_v59  ;;  %v1531_v20 = vpop.permute.xlu0 %1530 }
 0x29b   : > { %v1534_v26 = vsel %vm1532_vm11, %v1529_v10, %v1531_v20  ;;  %2186 = vrot.lane.b32.xlu1 %v2178_v57, %s2806_s18  ;;  %v2296_v42 = vld [vmem:[#allocation3 + $0xe0] sm:$0xff] }
 0x29c   : > { %1538 = vst [vmem:[#allocation3 + $0x108] sm:$0xf] %v1534_v26  ;;  %2165 = vrot.lane.b32.xlu0 %v2163_v7, %s2772_s21 }
 0x29d   : > { %v1640_v1 = vpop.permute.xlu1 %1639 }
 0x29e   : > { %v1569_v3 = vpop.permute.xlu0 %1568 }
 0x29f   : > { %v1571_v60 = vsel %vm4009_vm14, %v3787_v27, %v1569_v3  ;;  %2221 = vrot.lane.b32.xlu1 %v2213_v45, %s2775_s29  ;;  %v2298_v53 = vld [vmem:[#allocation3 + $0xf0] sm:$0xff]  ;;  %vm4017_vm14 = vcmask 777216  }
 0x2a0   : > { %1575 = vst [vmem:[#allocation3 + $0x108] sm:$0xf0] %v1571_v60  ;;  %2184 = vrot.lane.b32.xlu0 %v3564_v13, %s2806_s18  ;;  %v2338_v40 = vpack.c.bf16 %v2298_v53, %v2296_v42  ;;  %v2251_v13 = vmul.f32 %v2246_v4, %v2232_v51 }
 0x2a1   : > { %v1527_v58 = vpop.permute.xlu1 %1526 }
 0x2a2   : > { %v1533_v52 = vsel %vm1532_vm11, %v1527_v58, %v1529_v10  ;;  %2390 = vmatpush1.bf16.msra.mxu1 %v2338_v40  ;;  %v1605_v28 = vpop.permute.xlu0 %1604  ;;  %vm4015_vm11 = vcmask 793600  }
 0x2a3   : > { %1537 = vst [vmem:[#allocation3 + $0x100] sm:$0xf] %v1533_v52  ;;  %v1607_v44 = vsel %vm4010_vm15, %v1603_v19, %v1605_v28  ;;  %2255 = vrot.lane.b32.xlu1 %v2250_v46, %s2773_s22  ;;  %vm4016_vm13 = vmmov %vm4015_vm11 }
 0x2a4   : > { %1611 = vst [vmem:[#allocation3 + $0x118] sm:$0xf] %v1607_v44  ;;  %2219 = vrot.lane.b32.xlu0 %v2217_v55, %s2775_s29  ;;  %vm4018_vm15 = vmmov %vm4017_vm14 }
 0x2a5   : > { %v1601_v56 = vpop.permute.xlu1 %1600 }
 0x2a6   : > { %v1606_v48 = vsel %vm4011_vm0, %v1601_v56, %v1603_v19  ;;  %v1642_v22 = vpop.permute.xlu0 %1641  ;;  %vm4019_vm0 = vcmask 769024  }
 0x2a7   : > { %1610 = vst [vmem:[#allocation3 + $0x110] sm:$0xf] %v1606_v48  ;;  %v1644_v30 = vsel %vm4012_vm1, %v1640_v1, %v1642_v22  ;;  %2259 = vrot.lane.b32.xlu1 %v2251_v13, %s2773_s22  ;;  %v2301_v32 = vld [vmem:[#allocation3 + $0x108] sm:$0xff]  ;;  %vm4020_vm1 = vmmov %vm4019_vm0 }
 0x2a8   : > { %1648 = vst [vmem:[#allocation3 + $0x118] sm:$0xf0] %v1644_v30  ;;  %2223 = vrot.lane.b32.xlu0 %v2218_v38, %s2775_s29 }
 0x2a9   : > { %v1676_v16 = vpop.permute.xlu1 %1675 }
 0x2aa   : > { %v1565_v17 = vpop.permute.xlu0 %1564 }
 0x2ab   : > { %v1570_v49 = vsel %vm4013_vm8, %v1565_v17, %v3787_v27  ;;  %2426 = vperm.xlu1 %2748, %v2422_v50   ;;  %vm4021_vm8 = vcmask 670720  }
 0x2ac   : > { %1574 = vst [vmem:[#allocation3 + $0x100] sm:$0xf0] %v1570_v49  ;;  %2257 = vrot.lane.b32.xlu0 %v2254_v11, %s2773_s22 }
 0x2ad   : > { %v1694_v61 = vpop.permute.xlu1 %1693 }
 0x2ae   : > { %v1638_v31 = vpop.permute.xlu0 %1637 }
 0x2af   : > { %v1643_v25 = vsel %vm4014_vm10, %v1638_v31, %v1640_v1  ;;  %v2303_v63 = vld [vmem:[#allocation3 + $0x118] sm:$0xff]  ;;  %vm4023_vm10 = vmmov %vm4021_vm8 }
 0x2b0   : > { %1647 = vst [vmem:[#allocation3 + $0x110] sm:$0xf0] %v1643_v25  ;;  %v2341_v15 = vpack.c.bf16 %v2303_v63, %v2301_v32  ;;  %2355 = vperm.xlu0 %2747, %v2352_v47  }
 0x2b1   : > { %v1731_v33 = vpop.permute.xlu1 %1730 }
 0x2b2   : > { %2391 = vmatprep.subr.bf16.mxu1 %v2341_v15  ;;  %v1678_v12 = vpop.permute.xlu0 %1677 }
 0x2b3   : > { %v1680_v2 = vsel %vm4015_vm11, %v1676_v16, %v1678_v12  ;;  %v2300_v9 = vld [vmem:[#allocation3 + $0x100] sm:$0xff]  ;;  %vm4024_vm11 = vcmask 654336  }
 0x2b4   : > { %1684 = vst [vmem:[#allocation3 + $0x128] sm:$0xf] %v1680_v2  ;;  %2499 = vperm.xlu0 %2747, %v2495_v62  }
 0x2b5   : > { %v1768_v8 = vpop.permute.xlu1 %1767 }
 0x2b6   : > { %v1696_v10 = vpop.permute.xlu0 %1695 }
 0x2b7   : > { %v1699_v23 = vsel %vm1697_vm12, %v1694_v61, %v1696_v10  ;;  %v2302_v34 = vld [vmem:[#allocation3 + $0x110] sm:$0xff] }
 0x2b8   : > { %1703 = vst [vmem:[#allocation3 + $0x128] sm:$0xf0] %v1699_v23  ;;  %v2340_v27 = vpack.c.bf16 %v2302_v34, %v2300_v9 }
 0x2b9   : > { %v1674_v41 = vpop.permute.xlu1 %1673 }
 0x2ba   : > { %v1679_v54 = vsel %vm4016_vm13, %v1674_v41, %v1676_v16  ;;  %2392 = vmatpush1.bf16.msra.mxu1 %v2340_v27  ;;  %v1733_v21 = vpop.permute.xlu0 %1732  ;;  %vm4026_vm13 = vcmask 646144  }
 0x2bb   : > { %1683 = vst [vmem:[#allocation3 + $0x120] sm:$0xf] %v1679_v54  ;;  %v1735_v18 = vsel %vm4017_vm14, %v1731_v33, %v1733_v21  ;;  %vm4027_vm14 = vmmov %vm4022_vm9 }
 0x2bc   : > { %1739 = vst [vmem:[#allocation3 + $0x138] sm:$0xf] %v1735_v18 }
 0x2bd   : > { %v1729_v39 = vpop.permute.xlu1 %1728 }
 0x2be   : > { %v1734_v29 = vsel %vm4018_vm15, %v1729_v39, %v1731_v33  ;;  %v1770_v59 = vpop.permute.xlu0 %1769  ;;  %vm4028_vm15 = vmmov %vm4026_vm13 }
 0x2bf   : > { %1738 = vst [vmem:[#allocation3 + $0x130] sm:$0xf] %v1734_v29  ;;  %v1772_v57 = vsel %vm4019_vm0, %v1768_v8, %v1770_v59  ;;  %v2305_v45 = vld [vmem:[#allocation3 + $0x128] sm:$0xff]  ;;  %vm4029_vm0 = vcmask 637952  }
 0x2c0   : > { %1776 = vst [vmem:[#allocation3 + $0x138] sm:$0xf0] %v1772_v57 }
 0x2c1   : > { %v1804_v19 = vpop.permute.xlu1 %1803 }
 0x2c2   : > { %v1692_v7 = vpop.permute.xlu0 %1691 }
 0x2c3   : > { %v1698_v4 = vsel %vm1697_vm12, %v1692_v7, %v1694_v61  ;;  %vm4025_vm12 = vmmov %vm4024_vm11 }
 0x2c4   : > { %1702 = vst [vmem:[#allocation3 + $0x120] sm:$0xf0] %v1698_v4 }
 0x2c5   : > { %v1841_v35 = vpop.permute.xlu1 %1840 }
 0x2c6   : > { %v1766_v20 = vpop.permute.xlu0 %1765 }
 0x2c7   : > { %v1771_v26 = vsel %vm4020_vm1, %v1766_v20, %v1768_v8  ;;  %v2307_v1 = vld [vmem:[#allocation3 + $0x138] sm:$0xff]  ;;  %vm4030_vm1 = vcmask 539648  }
 0x2c8   : > { %1775 = vst [vmem:[#allocation3 + $0x130] sm:$0xf0] %v1771_v26  ;;  %v2343_v24 = vpack.c.bf16 %v2307_v1, %v2305_v45 }
 0x2c9   : > { %v1858_v3 = vpop.permute.xlu1 %1857 }
 0x2ca   : > { %2393 = vmatprep.subr.bf16.mxu1 %v2343_v24  ;;  %v1806_v37 = vpop.permute.xlu0 %1805 }
 0x2cb   : > { %v1808_v60 = vsel %vm4021_vm8, %v1804_v19, %v1806_v37  ;;  %v2304_v46 = vld [vmem:[#allocation3 + $0x120] sm:$0xff]  ;;  %vm4031_vm8 = vmmov %vm4029_vm0 }
 0x2cc   : > { %1812 = vst [vmem:[#allocation3 + $0x148] sm:$0xf] %v1808_v60 }
 0x2cd   : > { %v1895_v42 = vpop.permute.xlu1 %1894 }
 0x2ce   : > { %v1843_v53 = vpop.permute.xlu0 %1842 }
 0x2cf   : > { %v1845_v40 = vsel %vm4022_vm9, %v1841_v35, %v1843_v53  ;;  %v2306_v58 = vld [vmem:[#allocation3 + $0x130] sm:$0xff]  ;;  %vm4032_vm9 = vcmask 531456  }
 0x2d0   : > { %1849 = vst [vmem:[#allocation3 + $0x148] sm:$0xf0] %v1845_v40  ;;  %v2342_v51 = vpack.c.bf16 %v2306_v58, %v2304_v46 }
 0x2d1   : > { %v1802_v14 = vpop.permute.xlu1 %1801 }
 0x2d2   : > { %v1807_v55 = vsel %vm4023_vm10, %v1802_v14, %v1804_v19  ;;  %2394 = vmatpush1.bf16.msra.mxu1 %v2342_v51  ;;  %v1860_v52 = vpop.permute.xlu0 %1859  ;;  %vm4033_vm10 = vmmov %vm4032_vm9 }
 0x2d3   : > { %1811 = vst [vmem:[#allocation3 + $0x140] sm:$0xf] %v1807_v55  ;;  %v1862_v28 = vsel %vm4024_vm11, %v1858_v3, %v1860_v52  ;;  %vm4034_vm11 = vcmask 523264  }
 0x2d4   : > { %1866 = vst [vmem:[#allocation3 + $0x158] sm:$0xf] %v1862_v28 }
 0x2d5   : > { %v1856_v44 = vpop.permute.xlu1 %1855 }
 0x2d6   : > { %v1861_v13 = vsel %vm4025_vm12, %v1856_v44, %v1858_v3  ;;  %v1897_v56 = vpop.permute.xlu0 %1896  ;;  %vm4035_vm12 = vmmov %vm4030_vm1 }
 0x2d7   : > { %1865 = vst [vmem:[#allocation3 + $0x150] sm:$0xf] %v1861_v13  ;;  %v1899_v38 = vsel %vm4026_vm13, %v1895_v42, %v1897_v56  ;;  %v2309_v49 = vld [vmem:[#allocation3 + $0x148] sm:$0xff]  ;;  %vm4036_vm13 = vmmov %vm4034_vm11 }
 0x2d8   : > { %1903 = vst [vmem:[#allocation3 + $0x158] sm:$0xf0] %v1899_v38 }
 0x2d9   : > { %v1931_v48 = vpop.permute.xlu1 %1930 }
 0x2da   : > { %v1839_v22 = vpop.permute.xlu0 %1838 }
 0x2db   : > { %v1844_v30 = vsel %vm4027_vm14, %v1839_v22, %v1841_v35  ;;  %vm4040_vm14 = vcmask 31744  }
 0x2dc   : > { %1848 = vst [vmem:[#allocation3 + $0x140] sm:$0xf0] %v1844_v30 }
 0x2dd   : > { %v1968_v16 = vpop.permute.xlu1 %1967 }
 0x2de   : > { %v1893_v11 = vpop.permute.xlu0 %1892 }
 0x2df   : > { %v1898_v17 = vsel %vm4028_vm15, %v1893_v11, %v1895_v42  ;;  %v2311_v43 = vld [vmem:[#allocation3 + $0x158] sm:$0xff] }
 0x2e0   : > { %1902 = vst [vmem:[#allocation3 + $0x150] sm:$0xf0] %v1898_v17  ;;  %v2345_v61 = vpack.c.bf16 %v2311_v43, %v2309_v49 }
 0x2e1   : > { %v2004_v31 = vpop.permute.xlu1 %2003 }
 0x2e2   : > { %2395 = vmatprep.subr.bf16.mxu1 %v2345_v61  ;;  %v1933_v47 = vpop.permute.xlu0 %1932 }
 0x2e3   : > { %v1935_v50 = vsel %vm4029_vm0, %v1931_v48, %v1933_v47  ;;  %v2308_v15 = vld [vmem:[#allocation3 + $0x140] sm:$0xff] }
 0x2e4   : > { %1939 = vst [vmem:[#allocation3 + $0x168] sm:$0xf] %v1935_v50 }
 0x2e5   : > { %v2022_v25 = vpop.permute.xlu1 %2021 }
 0x2e6   : > { %v1970_v32 = vpop.permute.xlu0 %1969 }
 0x2e7   : > { %v1972_v63 = vsel %vm4030_vm1, %v1968_v16, %v1970_v32  ;;  %v2310_v33 = vld [vmem:[#allocation3 + $0x150] sm:$0xff] }
 0x2e8   : > { %1976 = vst [vmem:[#allocation3 + $0x168] sm:$0xf0] %v1972_v63  ;;  %v2344_v62 = vpack.c.bf16 %v2310_v33, %v2308_v15 }
 0x2e9   : > { %v1929_v12 = vpop.permute.xlu1 %1928 }
 0x2ea   : > { %v1934_v2 = vsel %vm4031_vm8, %v1929_v12, %v1931_v48  ;;  %2396 = vmatpush1.bf16.msra.mxu1 %v2344_v62  ;;  %v2006_v8 = vpop.permute.xlu0 %2005 }
 0x2eb   : > { %1938 = vst [vmem:[#allocation3 + $0x160] sm:$0xf] %v1934_v2  ;;  %v2008_v10 = vsel %vm4032_vm9, %v2004_v31, %v2006_v8 }
 0x2ec   : > { %2012 = vst [vmem:[#allocation3 + $0x178] sm:$0xf] %v2008_v10 }
 0x2ed   : > { %v2002_v23 = vpop.permute.xlu1 %2001 }
 0x2ee   : > { %v2007_v9 = vsel %vm4033_vm10, %v2002_v23, %v2004_v31  ;;  %v2024_v34 = vpop.permute.xlu0 %2023 }
 0x2ef   : > { %2011 = vst [vmem:[#allocation3 + $0x170] sm:$0xf] %v2007_v9  ;;  %v2026_v27 = vsel %vm4034_vm11, %v2022_v25, %v2024_v34  ;;  %v2313_v59 = vld [vmem:[#allocation3 + $0x168] sm:$0xff]  ;;  %v2670_v34 = vcombine.low %v3822_v36, %v3822_v36 }
 0x2f0   : > { %2030 = vst [vmem:[#allocation3 + $0x178] sm:$0xf0] %v2026_v27  ;;  %v2423_v27 = vld [vmem:[%s3910_s7 + $0x8] sm:$0xff] }
 0x2f1   : > { %v2058_v41 = vpop.permute.xlu1 %2057  ;;  %2431 = vperm.xlu1 %2748, %v2423_v27  }
 0x2f2   : > { %v1966_v54 = vpop.permute.xlu0 %1965 }
 0x2f3   : > { %v1971_v21 = vsel %vm4035_vm12, %v1966_v54, %v1968_v16 }
 0x2f4   : > { %1975 = vst [vmem:[#allocation3 + $0x160] sm:$0xf0] %v1971_v21 }
 0x2f5   : > { %v2095_v18 = vpop.permute.xlu1 %2094 }
 0x2f6   : > { %v2020_v39 = vpop.permute.xlu0 %2019 }
 0x2f7   : > { %v2025_v29 = vsel %vm4036_vm13, %v2020_v39, %v2022_v25  ;;  %v2315_v57 = vld [vmem:[#allocation3 + $0x178] sm:$0xff] }
 0x2f8   : > { %2029 = vst [vmem:[#allocation3 + $0x170] sm:$0xf0] %v2025_v29  ;;  %v2347_v19 = vpack.c.bf16 %v2315_v57, %v2313_v59 }
 0x2f9   : > { %v2131_v7 = vpop.permute.xlu1 %2130 }
 0x2fa   : > { %2397 = vmatprep.subr.bf16.mxu1 %v2347_v19  ;;  %v2060_v4 = vpop.permute.xlu0 %2059 }
 0x2fb   : > { %v2062_v35 = vsel %vm669_vm7, %v2058_v41, %v2060_v4  ;;  %v2312_v1 = vld [vmem:[#allocation3 + $0x160] sm:$0xff] }
 0x2fc   : > { %2066 = vst [vmem:[#allocation3 + $0x188] sm:$0xf] %v2062_v35 }
 0x2fd   : > { %v2168_v20 = vpop.permute.xlu1 %2167 }
 0x2fe   : > { %v2097_v26 = vpop.permute.xlu0 %2096 }
 0x2ff   : > { %v2099_v45 = vsel %vm630_vm5, %v2095_v18, %v2097_v26  ;;  %v2314_v24 = vld [vmem:[#allocation3 + $0x170] sm:$0xff] }
 0x300   : > { %2103 = vst [vmem:[#allocation3 + $0x188] sm:$0xf0] %v2099_v45  ;;  %v2346_v3 = vpack.c.bf16 %v2314_v24, %v2312_v1  ;;  %v2760_v26 = vld [vmem:[%s3907_s4] sm:$0xff]  }
 0x301   : > { %v2056_v37 = vpop.permute.xlu1 %2055 }
 0x302   : > { %v2061_v60 = vsel %vm669_vm7, %v2056_v37, %v2058_v41  ;;  %2398 = vmatpush1.bf16.msra.mxu1 %v2346_v3  ;;  %v2133_v42 = vpop.permute.xlu0 %2132  ;;  %v2496_v41 = vld [vmem:[%s3911_s8 + $0x8] sm:$0xff] }
 0x303   : > { %2065 = vst [vmem:[#allocation3 + $0x180] sm:$0xf] %v2061_v60  ;;  %v2135_v53 = vsel %vm592_vm6, %v2131_v7, %v2133_v42  ;;  %2504 = vperm.xlu1 %2748, %v2496_v41  }
 0x304   : > { %2139 = vst [vmem:[#allocation3 + $0x198] sm:$0xf] %v2135_v53 }
 0x305   : > { %v2129_v40 = vpop.permute.xlu1 %2128 }
 0x306   : > { %v2134_v46 = vsel %vm592_vm6, %v2129_v40, %v2131_v7  ;;  %v2170_v58 = vpop.permute.xlu0 %2169  ;;  %vm4037_vm6 = vcmask 392192  }
 0x307   : > { %2138 = vst [vmem:[#allocation3 + $0x190] sm:$0xf] %v2134_v46  ;;  %v2172_v51 = vsel %vm552_vm3, %v2168_v20, %v2170_v58  ;;  %v2317_v56 = vld [vmem:[#allocation3 + $0x188] sm:$0xff]  ;;  %vm4038_vm7 = vmmov %vm4037_vm6 }
 0x308   : > { %2176 = vst [vmem:[#allocation3 + $0x198] sm:$0xf0] %v2172_v51 }
 0x309   : > { %v2183_v14 = vpop.permute.xlu1 %2182 }
 0x30a   : > { %v2093_v55 = vpop.permute.xlu0 %2092 }
 0x30b   : > { %v2098_v52 = vsel %vm630_vm5, %v2093_v55, %v2095_v18  ;;  %vm4039_vm5 = vcmask 1041408  }
 0x30c   : > { %2102 = vst [vmem:[#allocation3 + $0x180] sm:$0xf0] %v2098_v52 }
 0x30d   : > { %v2187_v28 = vpop.permute.xlu1 %2186 }
 0x30e   : > { %v2166_v44 = vpop.permute.xlu0 %2165 }
 0x30f   : > { %v2171_v13 = vsel %vm552_vm3, %v2166_v44, %v2168_v20  ;;  %v2319_v38 = vld [vmem:[#allocation3 + $0x198] sm:$0xff]  ;;  %vm2368_vm3 = vcmask 1045504   ;;  %v2759_v20 = vld [vmem:[%s3906_s3] sm:$0xff]  }
 0x310   : > { %2175 = vst [vmem:[#allocation3 + $0x190] sm:$0xf0] %v2171_v13  ;;  %v2349_v48 = vpack.c.bf16 %v2319_v38, %v2317_v56 }
 0x311   : > { %v2222_v22 = vpop.permute.xlu1 %2221 }
 0x312   : > { %2399 = vmatprep.subr.bf16.mxu1 %v2349_v48  ;;  %v2185_v30 = vpop.permute.xlu0 %2184 }
 0x313   : > { %v2188_v16 = vsel %vm4037_vm6, %v2183_v14, %v2185_v30  ;;  %v2189_v11 = vsel %vm4038_vm7, %v2185_v30, %v2187_v28  ;;  %v2316_v43 = vld [vmem:[#allocation3 + $0x180] sm:$0xff] }
 0x314   : > { %2192 = vst [vmem:[#allocation3 + $0x1a0] sm:$0xf] %v2188_v16  ;;  %2193 = vst [vmem:[#allocation3 + $0x1a8] sm:$0xf] %v2189_v11 }
 0x315   : > { %v2256_v31 = vpop.permute.xlu1 %2255 }
 0x316   : > { %v2220_v17 = vpop.permute.xlu0 %2219 }
 0x317   : > { %v2225_v49 = vsel %vm494_vm2, %v2220_v17, %v2222_v22  ;;  %v2318_v61 = vld [vmem:[#allocation3 + $0x190] sm:$0xff] }
 0x318   : > { %2229 = vst [vmem:[#allocation3 + $0x1a0] sm:$0xf0] %v2225_v49  ;;  %v2348_v47 = vpack.c.bf16 %v2318_v61, %v2316_v43 }
 0x319   : > { %v2260_v32 = vpop.permute.xlu1 %2259 }
 0x31a   : > { %2400 = vmatpush1.bf16.msra.mxu1 %v2348_v47  ;;  %v2224_v50 = vpop.permute.xlu0 %2223 }
 0x31b   : > { %v2226_v25 = vsel %vm494_vm2, %v2222_v22, %v2224_v50  ;;  %vm2443_vm2 = vcmask 1043456  }
 0x31c   : > { %2230 = vst [vmem:[#allocation3 + $0x1a8] sm:$0xf0] %v2226_v25 }
 0x31e   : > { %v2258_v63 = vpop.permute.xlu0 %2257 }
 0x31f   : > { %v2261_v15 = vsel %vm455_vm4, %v2256_v31, %v2258_v63  ;;  %v2262_v33 = vsel %vm455_vm4, %v2258_v63, %v2260_v32  ;;  %v2320_v62 = vld [vmem:[#allocation3 + $0x1a0] sm:$0xff]  ;;  %vm2439_vm4 = vcmask 64512  }
 0x320   : > { %2265 = vst [vmem:[#allocation3 + $0x1b0] sm:$0xf] %v2261_v15  ;;  %2266 = vst [vmem:[#allocation3 + $0x1b8] sm:$0xf] %v2262_v33 }
 0x323   : > { %v2321_v12 = vld [vmem:[#allocation3 + $0x1a8] sm:$0xff] }
 0x327   : > { %v2323_v2 = vld [vmem:[#allocation3 + $0x1b8] sm:$0xf]  ;;  %v2322_v8 = vld [vmem:[#allocation3 + $0x1b0] sm:$0xf] }
 0x328   : > { %v2351_v10 = vpack.c.bf16 %v2323_v2, %v2321_v12  ;;  %v2350_v23 = vpack.c.bf16 %v2322_v8, %v2320_v62 }
 0x32a   : > { %2672 = vmatprep.subr.msk.bf16.mxu1 %vm2368_vm3, %v2351_v10  ;;  %v2370_v9 = vsel %vm2368_vm3, %v2350_v23, 0  ;;  %v2427_v45 = vpop.permute.xlu1 %2426 }
 0x32b   : > { %2402 = vmatpush1.bf16.msra.mxu1 %v2370_v9 }
 0x32e   : > { %2408 = vmatmul.mubr.bf16.vlgmr.msra.gmra.mrb[0].mxu1 %v2670_v34 }
 0x32f   : > { %v2356_v54 = vpop.permute.xlu0 %2355 }
 0x333   : > { %v2500_v24 = vpop.permute.xlu0 %2499 }
 0x334   : > { %v2684_v37 = vadd.f32 %v2500_v24, %v2427_v45 }
 0x370   : > { %v2432_v1 = vpop.permute.xlu1 %2431 }
 0x382   : > { %v2505_v3 = vpop.permute.xlu1 %2504 }
 0x383   : > { %v2688_v60 = vadd.f32 %v2505_v3, %v2432_v1 }
 0x401   : > { %v2409_v21 = vpop.f32.mrb[0].mxu1 }
 0x402   : > { %v2410_v18 = vadd.f32 %v2409_v21, %v2356_v54  ;;  %v2411_v39 = vpop.f32.mrb[1].mxu1 }
 0x403   : > { %v2412_v29 = vadd.f32 %v2411_v39, %v2356_v54  ;;  %v2413_v59 = vpop.f32.mrb[2].mxu1 }
 0x404   : > { %v2416_v57 = vmax.f32 %v2410_v18, 0.0  ;;  %v2414_v36 = vpop.f32.mrb[3].mxu1 }
 0x405   : > { %v2417_v19 = vmax.f32 %v2412_v29, 0.0 }
 0x406   : > { %v2420_v7 = vpack.c.bf16 %v2416_v57, %v2416_v57 }
 0x407   : > { %v2421_v4 = vpack.c.bf16 %v2417_v19, %v2417_v19 }
 0x408   : > { %v2445_v35 = vsel %vm2443_vm2, %v2420_v7, 0 }
 0x409   : > { %2675 = vmatprep.subr.msk.bf16.mxu0 %vm2443_vm2, %v2421_v4 }
 0x40a   : > { %2451 = vmatpush1.bf16.msra.mxu0 %v2445_v35 }
 0x40b   : > { %2678 = vmatprep.subr.msk.bf16.mxu0 %vm4039_vm5, %v2891_v5 }
 0x40d   : > { %2676 = vmatmul.mubr.msk.bf16.vlgmr.msra.gmra.mrb[4].mxu0 %vm2439_vm4, %v2759_v20 }
 0x40e   : > { %2516 = vmatpush1.bf16.msra.mxu0 %v2894_v6  ;;  %2547 = vmatprep.mubr.bf16.mxu0 %v2770_v0 }
 0x419   : > { %2679 = vmatmul.mubr.msk.bf16.vlgmr.msra.gmra.mrb[4].mxu0 %vm4040_vm14, %v2760_v26 }
 0x4ec   : > { %v2549_v5 = vpop.f32.mrb[4].mxu0 }
 0x4ed   : > { %v2685_v6 = vadd.f32 %v2684_v37, %v2549_v5  ;;  %v2551_v42 = vpop.f32.mrb[5].mxu0 }
 0x4ee   : > { %v2687_v0 = vadd.f32 %v2684_v37, %v2551_v42  ;;  %v2553_v53 = vpop.f32.mrb[6].mxu0 }
 0x4ef   : > { %v2562_v40 = vmax.f32 %v2685_v6, 0.0  ;;  %v2689_v46 = vadd.f32 %v2688_v60, %v2553_v53  ;;  %v2555_v58 = vpop.f32.mrb[7].mxu0 }
 0x4f0   : > { %v2563_v51 = vmax.f32 %v2687_v0, 0.0  ;;  %v2691_v14 = vadd.f32 %v2688_v60, %v2555_v58 }
 0x4f1   : > { %2566 = vst [vmem:[%s2889_s25] sm:$0xff] %v2562_v40  ;;  %v2564_v55 = vmax.f32 %v2689_v46, 0.0 }
 0x4f2   : > { %2567 = vst [vmem:[%s2889_s25 + $0x8] sm:$0xff] %v2563_v51  ;;  %v2565_v52 = vmax.f32 %v2691_v14, 0.0 }
 0x4f3   : > { %2568 = vst [vmem:[%s2889_s25 + $0x10] sm:$0xff] %v2564_v55 }
 0x4f4   : > { %2569 = vst [vmem:[%s2889_s25 + $0x18] sm:$0xff] %v2565_v52 }
 0x4f5 PF: > { %s20_s13 = sadd.s32 1, %s2768_s13  }
 0x4f6   : > { %p17_p5 = scmp.ge.s32.totalorder %s20_s13, 4  }
 0x4f8   :  { %19 = sbr.rel (!%p17_p5) target bundleno = 1 (0x1), region = 97 }

</bundles_post_ra>
